<compile_context>
chip_gen: v7x
topology: tpu7x:2x2x1
jax: 0.10.0
libtpu: 0.0.40
codegen_flags: <defaults>
</compile_context>

<pallas_src>
import math
from functools import partial

import jax
import jax.numpy as jnp
from jax import lax
from jax.experimental import pallas as pl
from jax.experimental.pallas import tpu as pltpu

# ----------------------------- model dims (small, deterministic) ------------
C = 3          # image channels
IMG = 16       # image spatial size
PS = 8         # patch size
N_PATCH = (IMG // PS) ** 2          # 4 patches
PATCH_DIM = C * PS * PS             # 192
D_VIS = 32     # visual_cfg['embed_dim'] (vision_width)
H_VIS = 4      # visual num_heads
MLP_VIS = 4 * D_VIS                 # mlp_ratio = 4
NUM_QUERY = 8  # num_learnable_token (scaled down)
D_TEXT = 32    # text_cfg.hidden_size (text_width)
H_TEXT = 4
MLP_TEXT = 4 * D_TEXT
VOCAB = 128
SEQ_LEN = 8
LN_EPS = 1e-6  # LayerNormWithForceFP32 eps
NEG_INF = -1e9

N_VIS_VALID = 1 + N_PATCH           # 5 real visual tokens (cls + patches)
N_VIS_TOK = 8                       # padded to a sublane multiple
V_TILE = 64                         # vocab tile for the online-LSE CE kernel


# ----------------------------- in-kernel helpers ------------------------------
def _layernorm(x, g, b, eps):
    # LayerNormWithForceFP32: stats in fp32
    x = x.astype(jnp.float32)
    mu = jnp.mean(x, axis=-1, keepdims=True)
    var = jnp.mean(jnp.square(x - mu), axis=-1, keepdims=True)
    return (x - mu) * lax.rsqrt(var + eps) * g + b


def _softmax_rows(s):
    # approx reciprocal goes to the EUP slot (review-approved; tiny drift vs torch)
    s = s - jnp.max(s, axis=-1, keepdims=True)
    p = jnp.exp(s)
    return p * pl.reciprocal(jnp.sum(p, axis=-1, keepdims=True), approx=True)


def _keep_mask(bb, n_q, n_k, *, causal=False, n_k_valid=None):
    """Static attention mask for batch folded into rows: block-diagonal batch mask,
    optional key-padding window, optional causal (self-attn only)."""
    if n_k_valid is None:
        n_k_valid = n_k
    if bb == 1 and not causal and n_k_valid == n_k:
        return None
    rows_n, cols_n = bb * n_q, bb * n_k
    rows = lax.broadcasted_iota(jnp.int32, (rows_n, cols_n), 0)
    cols = lax.broadcasted_iota(jnp.int32, (rows_n, cols_n), 1)
    keep = None
    for b in range(bb):   # static unroll; no integer division needed
        t = ((rows >= b * n_q) & (rows < (b + 1) * n_q) &
             (cols >= b * n_k) & (cols < b * n_k + n_k_valid))
        keep = t if keep is None else (keep | t)
    if causal:
        # valid because for self-attention n_q == n_k and batch blocks sit on the diagonal
        keep = keep & (rows >= cols)
    return keep


def _attention(q, k, v, projh_w_ref, *, num_heads, keep):
    """q: (Rq, D) f32, k/v: (Rk, D) f32. projh_w_ref: (H, dh, D) bf16 ref.
    Per-head attention with the output projection fused into the head loop, so there is
    no lane-wise concat of head outputs. Returns (Rq, D) f32 (pre output-bias)."""
    D = q.shape[-1]
    dh = D // num_heads
    scale = 1.0 / math.sqrt(dh)
    out = None
    for h in range(num_heads):
        sl = slice(h * dh, (h + 1) * dh)
        qh = q[:, sl].astype(jnp.bfloat16)
        kh = k[:, sl].astype(jnp.bfloat16)
        vh = v[:, sl].astype(jnp.bfloat16)
        # q @ k^T via transposed contraction (no in-kernel transpose materialized)
        s = lax.dot_general(qh, kh, (((1,), (1,)), ((), ())),
                            preferred_element_type=jnp.float32) * scale
        if keep is not None:
            s = jnp.where(keep, s, NEG_INF)
        p = _softmax_rows(s)
        oh = jnp.dot(p.astype(jnp.bfloat16), vh, preferred_element_type=jnp.float32)
        contrib = jnp.dot(oh.astype(jnp.bfloat16), projh_w_ref[h],
                          preferred_element_type=jnp.float32)
        out = contrib if out is None else out + contrib
    return out


def _block_body(x, ln1_g, ln1_b, qkv_w, qkv_b, projh_w, proj_b,
                ln2_g, ln2_b, fc1_w, fc1_b, fc2_w, fc2_b,
                *, num_heads, keep, eps):
    """Pre-norm transformer block on batch-folded rows x: (rows, D) f32."""
    D = x.shape[-1]
    h1 = _layernorm(x, ln1_g[...], ln1_b[...], eps)
    qkv = jnp.dot(h1.astype(jnp.bfloat16), qkv_w[...],
                  preferred_element_type=jnp.float32) + qkv_b[...]
    q, k, v = qkv[:, :D], qkv[:, D:2 * D], qkv[:, 2 * D:]
    a = _attention(q, k, v, projh_w, num_heads=num_heads, keep=keep) + proj_b[...]
    x = x + a
    h2 = _layernorm(x, ln2_g[...], ln2_b[...], eps)
    m = jnp.dot(h2.astype(jnp.bfloat16), fc1_w[...],
                preferred_element_type=jnp.float32) + fc1_b[...]
    m = jax.nn.gelu(m)
    m = jnp.dot(m.astype(jnp.bfloat16), fc2_w[...],
                preferred_element_type=jnp.float32) + fc2_b[...]
    return x + m


# ----------------------------- fused Pallas kernels ---------------------------
def _vit_block_kernel(x_ref, ln1_g, ln1_b, qkv_w, qkv_b, projh_w, proj_b,
                      ln2_g, ln2_b, fc1_w, fc1_b, fc2_w, fc2_b,
                      lnf_g, lnf_b, o_ref, *, bb, num_heads, n_valid, eps):
    _, n, D = x_ref.shape
    x = x_ref[...].reshape(bb * n, D)                      # sublane-aligned (n = 8)
    keep = _keep_mask(bb, n, n, causal=False, n_k_valid=n_valid)
    y = _block_body(x, ln1_g, ln1_b, qkv_w, qkv_b, projh_w, proj_b,
                    ln2_g, ln2_b, fc1_w, fc1_b, fc2_w, fc2_b,
                    num_heads=num_heads, keep=keep, eps=eps)
    y = _layernorm(y, lnf_g[...], lnf_b[...], eps)         # final ViT LayerNorm fused
    o_ref[...] = y.reshape(bb, n, D)


def _attn_pool_kernel(img_ref, lq_ref,
                      ln_q_g, ln_q_b, ln_k_g, ln_k_b,
                      q_w, q_b, kv_w, kv_b, projh_w, proj_b,
                      ln2_g, ln2_b, fc1_w, fc1_b, fc2_w, fc2_b,
                      vfc_w, vfc_b, o_ref, *, bb, num_heads, n_k_valid, eps):
    # AttentionPool (cross-attn + MLP) fused with the downstream visual_fc linear.
    nq, D = lq_ref.shape
    nk = img_ref.shape[1]
    xq = jnp.broadcast_to(lq_ref[...].reshape(1, nq, D), (bb, nq, D)).reshape(bb * nq, D)
    xk = img_ref[...].reshape(bb * nk, D)
    qn = _layernorm(xq, ln_q_g[...], ln_q_b[...], eps)
    kn = _layernorm(xk, ln_k_g[...], ln_k_b[...], eps)
    q = jnp.dot(qn.astype(jnp.bfloat16), q_w[...],
                preferred_element_type=jnp.float32) + q_b[...]
    kv = jnp.dot(kn.astype(jnp.bfloat16), kv_w[...],
                 preferred_element_type=jnp.float32) + kv_b[...]
    k, v = kv[:, :D], kv[:, D:]
    keep = _keep_mask(bb, nq, nk, causal=False, n_k_valid=n_k_valid)
    a = _attention(q, k, v, projh_w, num_heads=num_heads, keep=keep) + proj_b[...]
    x = xq + a
    h2 = _layernorm(x, ln2_g[...], ln2_b[...], eps)
    m = jnp.dot(h2.astype(jnp.bfloat16), fc1_w[...],
                preferred_element_type=jnp.float32) + fc1_b[...]
    m = jax.nn.gelu(m)
    m = jnp.dot(m.astype(jnp.bfloat16), fc2_w[...],
                preferred_element_type=jnp.float32) + fc2_b[...]
    x = x + m
    # visual_fc (visual_norm = Identity), fused
    y = jnp.dot(x.astype(jnp.bfloat16), vfc_w[...],
                preferred_element_type=jnp.float32) + vfc_b[...]
    o_ref[...] = y.reshape(bb, nq, -1)


def _decoder_block_kernel(qf_ref, temb_ref, pos_ref,
                          ln1_g, ln1_b, qkv_w, qkv_b, projh_w, proj_b,
                          ln2_g, ln2_b, fc1_w, fc1_b, fc2_w, fc2_b,
                          o_ref, *, bb, num_heads, eps):
    # Fuses [query_features ; token_embeds] concat + pos-emb add into the causal block.
    _, seq_t, D = pos_ref.shape
    x3 = jnp.concatenate([qf_ref[...], temb_ref[...]], axis=1) + pos_ref[...]
    x = x3.reshape(bb * seq_t, D)
    keep = _keep_mask(bb, seq_t, seq_t, causal=True)
    y = _block_body(x, ln1_g, ln1_b, qkv_w, qkv_b, projh_w, proj_b,
                    ln2_g, ln2_b, fc1_w, fc1_b, fc2_w, fc2_b,
                    num_heads=num_heads, keep=keep, eps=eps)
    o_ref[...] = y.reshape(bb, seq_t, D)


def _lmhead_ce_kernel(x_ref, lnf_g, lnf_b, w_ref, tgt_ref, mask_ref, o_ref,
                      xn_s, m_s, l_s, t_s, *, eps, v_tile):
    # final LayerNorm + tied LM head + masked token-level CE, vocab-tiled with
    # online log-sum-exp (flash-CE): logits never hit HBM, VMEM holds one vocab tile.
    v = pl.program_id(0)

    @pl.when(v == 0)
    def _():
        xn_s[...] = _layernorm(x_ref[...], lnf_g[...], lnf_b[...], eps)
        m_s[...] = jnp.full_like(m_s, -1e30)
        l_s[...] = jnp.zeros_like(l_s)
        t_s[...] = jnp.zeros_like(t_s)

    # logits = xn @ word_emb_tile^T via transposed contraction (no weight transpose)
    logits = lax.dot_general(xn_s[...].astype(jnp.bfloat16), w_ref[...],
                             (((1,), (1,)), ((), ())),
                             preferred_element_type=jnp.float32)      # (M, V_TILE)
    m_prev = m_s[...]
    m_new = jnp.maximum(m_prev, jnp.max(logits, axis=-1, keepdims=True))
    l_s[...] = (l_s[...] * jnp.exp(m_prev - m_new) +
                jnp.sum(jnp.exp(logits - m_new), axis=-1, keepdims=True))
    m_s[...] = m_new
    # compare+select instead of a one-hot multiply
    vocab_idx = v * v_tile + lax.broadcasted_iota(jnp.int32, logits.shape, 1)
    t_s[...] = t_s[...] + jnp.sum(
        jnp.where(vocab_idx == tgt_ref[...], logits, 0.0), axis=-1, keepdims=True)

    @pl.when(v == pl.num_programs(0) - 1)
    def _():
        nll = (m_s[...] + jnp.log(l_s[...])) - t_s[...]               # (M, 1)
        msk = mask_ref[...]
        o_ref[0, 0] = jnp.sum(nll * msk) / jnp.maximum(jnp.sum(msk), 1.0)


# ----------------------------- Pallas wrappers --------------------------------
def _grid_and_bb(batch):
    """Collapse the batch into one grid step on single-TC chips (v5e/v6e); keep a
    per-sample 'parallel' grid on v7x (2 TensorCores/chip)."""
    try:
        kind = jax.devices()[0].device_kind.lower()
    except Exception:
        kind = ""
    if batch > 1 and ("v7" in kind or "7x" in kind):
        return batch, 1, ("parallel",)
    return 1, batch, ("arbitrary",)


def _fs(arr):
    # whole-array (weight-like) block, same block for every grid step
    nd = arr.ndim
    return pl.BlockSpec(arr.shape, lambda b, _n=nd: (0,) * _n)


def _block_weight_args(bp, num_heads):
    d = bp['ln1_g'].shape[0]
    dh_mlp = bp['fc1_w'].shape[1]
    return [bp['ln1_g'].reshape(1, d), bp['ln1_b'].reshape(1, d),
            bp['qkv_w'].astype(jnp.bfloat16), bp['qkv_b'].reshape(1, 3 * d),
            bp['proj_w'].reshape(num_heads, d // num_heads, d).astype(jnp.bfloat16),
            bp['proj_b'].reshape(1, d),
            bp['ln2_g'].reshape(1, d), bp['ln2_b'].reshape(1, d),
            bp['fc1_w'].astype(jnp.bfloat16), bp['fc1_b'].reshape(1, dh_mlp),
            bp['fc2_w'].astype(jnp.bfloat16), bp['fc2_b'].reshape(1, d)]


def p_vit_block(x, p):
    B, N, D = x.shape
    grid_b, bb, sem = _grid_and_bb(B)
    w = _block_weight_args(p['block'], H_VIS) + [p['lnf_g'].reshape(1, D),
                                                 p['lnf_b'].reshape(1, D)]
    return pl.pallas_call(
        partial(_vit_block_kernel, bb=bb, num_heads=H_VIS,
                n_valid=N_VIS_VALID, eps=LN_EPS),
        grid=(grid_b,),
        in_specs=[pl.BlockSpec((bb, N, D), lambda b: (b, 0, 0))] + [_fs(a) for a in w],
        out_specs=pl.BlockSpec((bb, N, D), lambda b: (b, 0, 0)),
        out_shape=jax.ShapeDtypeStruct((B, N, D), jnp.float32),
        compiler_params=pltpu.CompilerParams(dimension_semantics=sem),
    )(x, *w)


def p_attn_pool_fc(image_embeds, learnable_queries, p, vfc_w, vfc_b, num_heads):
    B, Nk, D = image_embeds.shape
    Nq = learnable_queries.shape[0]
    Dt = vfc_w.shape[1]
    grid_b, bb, sem = _grid_and_bb(B)
    dh_mlp = p['fc1_w'].shape[1]
    w = [learnable_queries,
         p['ln_q_g'].reshape(1, D), p['ln_q_b'].reshape(1, D),
         p['ln_k_g'].reshape(1, D), p['ln_k_b'].reshape(1, D),
         p['q_w'].astype(jnp.bfloat16), p['q_b'].reshape(1, D),
         p['kv_w'].astype(jnp.bfloat16), p['kv_b'].reshape(1, 2 * D),
         p['proj_w'].reshape(num_heads, D // num_heads, D).astype(jnp.bfloat16),
         p['proj_b'].reshape(1, D),
         p['ln2_g'].reshape(1, D), p['ln2_b'].reshape(1, D),
         p['fc1_w'].astype(jnp.bfloat16), p['fc1_b'].reshape(1, dh_mlp),
         p['fc2_w'].astype(jnp.bfloat16), p['fc2_b'].reshape(1, D),
         vfc_w.astype(jnp.bfloat16), vfc_b.reshape(1, Dt)]
    return pl.pallas_call(
        partial(_attn_pool_kernel, bb=bb, num_heads=num_heads,
                n_k_valid=N_VIS_VALID, eps=LN_EPS),
        grid=(grid_b,),
        in_specs=[pl.BlockSpec((bb, Nk, D), lambda b: (b, 0, 0))] + [_fs(a) for a in w],
        out_specs=pl.BlockSpec((bb, Nq, Dt), lambda b: (b, 0, 0)),
        out_shape=jax.ShapeDtypeStruct((B, Nq, Dt), jnp.float32),
        compiler_params=pltpu.CompilerParams(dimension_semantics=sem),
    )(image_embeds, *w)


def p_decoder_block(query_features, token_embeds, p, num_heads):
    B, Nq, D = query_features.shape
    L = token_embeds.shape[1]
    T = Nq + L
    grid_b, bb, sem = _grid_and_bb(B)
    w = [p['pos_emb'].reshape(1, T, D)] + _block_weight_args(p['block'], num_heads)
    return pl.pallas_call(
        partial(_decoder_block_kernel, bb=bb, num_heads=num_heads, eps=LN_EPS),
        grid=(grid_b,),
        in_specs=[pl.BlockSpec((bb, Nq, D), lambda b: (b, 0, 0)),
                  pl.BlockSpec((bb, L, D), lambda b: (b, 0, 0))] + [_fs(a) for a in w],
        out_specs=pl.BlockSpec((bb, T, D), lambda b: (b, 0, 0)),
        out_shape=jax.ShapeDtypeStruct((B, T, D), jnp.float32),
        compiler_params=pltpu.CompilerParams(dimension_semantics=sem),
    )(query_features, token_embeds, *w)


def p_lmhead_masked_ce(x, lnf_g, lnf_b, word_emb, targets, loss_mask):
    B, T, D = x.shape
    M = B * T
    V = word_emb.shape[0]
    v_tile = V_TILE if V % V_TILE == 0 else V
    x2 = x.reshape(M, D)
    tgt = targets.reshape(M, 1).astype(jnp.int32)
    msk = loss_mask.reshape(M, 1).astype(jnp.float32)
    out = pl.pallas_call(
        partial(_lmhead_ce_kernel, eps=LN_EPS, v_tile=v_tile),
        grid=(V // v_tile,),
        in_specs=[pl.BlockSpec((M, D), lambda v: (0, 0)),
                  pl.BlockSpec((1, D), lambda v: (0, 0)),
                  pl.BlockSpec((1, D), lambda v: (0, 0)),
                  pl.BlockSpec((v_tile, D), lambda v: (v, 0)),
                  pl.BlockSpec((M, 1), lambda v: (0, 0)),
                  pl.BlockSpec((M, 1), lambda v: (0, 0))],
        out_specs=pl.BlockSpec(memory_space=pltpu.MemorySpace.SMEM),
        out_shape=jax.ShapeDtypeStruct((1, 1), jnp.float32),
        scratch_shapes=[pltpu.VMEM((M, D), jnp.float32),   # normalized x (resident)
                        pltpu.VMEM((M, 1), jnp.float32),   # running max
                        pltpu.VMEM((M, 1), jnp.float32),   # running sum-exp
                        pltpu.VMEM((M, 1), jnp.float32)],  # target logit
        compiler_params=pltpu.CompilerParams(dimension_semantics=("arbitrary",)),
    )(x2, lnf_g.reshape(1, D), lnf_b.reshape(1, D),
      word_emb.astype(jnp.bfloat16), tgt, msk)
    return out[0, 0]


# ----------------------------- model building blocks -------------------------
def vit_forward(image, p):
    # simplified TimeSformer / ViT (single frame, 1 block); final LN fused into block.
    B = image.shape[0]
    nH = IMG // PS
    patches = image.reshape(B, C, nH, PS, nH, PS).transpose(0, 2, 4, 1, 3, 5)
    patches = patches.reshape(B, N_PATCH, PATCH_DIM)
    # Patch projection + cls/pos assembly left to plain XLA (removes the old standalone
    # patch-embed pallas_call; a 8x192x32 matmul is cheaper than a kernel launch).
    pe = jnp.einsum('bpc,cd->bpd', patches, p['patch_w']) + p['patch_b']
    cls = jnp.broadcast_to(p['cls_token'], (B, 1, D_VIS))
    x = jnp.concatenate([cls, pe], axis=1) + p['pos_embed']          # (B, 5, D)
    # pad token axis 5 -> 8 so all in-kernel reshapes are sublane aligned; padded rows
    # are masked out as attention keys inside the kernels.
    x = jnp.pad(x, ((0, 0), (0, N_VIS_TOK - N_VIS_VALID), (0, 0)))
    return p_vit_block(x, p)       # (B, 8, D_VIS); rows >= N_VIS_VALID are padding


def gpt_decoder_loss(query_features, token_embeds, p, num_heads, targets, loss_mask):
    # simplified DistributedGPT3 decoder (1 causal layer, tied LM head) + masked CE.
    x = p_decoder_block(query_features, token_embeds, p, num_heads)
    return p_lmhead_masked_ce(x, p['lnf_g'], p['lnf_b'], p['word_emb'],
                              targets, loss_mask)


# ----------------------------- top level forward ------------------------------
def distributed_gpt3_pretrain_forward(params, image, input_ids, attention_mask):
    B = image.shape[0]
    image_embeds = vit_forward(image, params['vit'])
    # image_atts = ones(...) in torch is computed but unused.

    query_features = p_attn_pool_fc(
        image_embeds, params['learnable_queries'].reshape(NUM_QUERY, D_VIS),
        params['attn_pool'], params['visual_fc_w'], params['visual_fc_b'],
        H_VIS)                                           # visual_norm = Identity
    query_atts = jnp.ones((B, NUM_QUERY), jnp.int32)

    targets = jnp.concatenate([input_ids[:, 1:], input_ids[:, 0:1]], axis=1)
    text_loss_atts = attention_mask[:, 1:]
    empty_targets = jnp.full((B, NUM_QUERY), 100, jnp.int32)  # matches torch fill_(100);
    # relies on loss_mask being 0 at those positions (same as the torch module).
    targets = jnp.concatenate([empty_targets, targets], axis=1)      # (B, Nq+L)

    # TODO(synk): token-embedding gather left to XLA (data-dependent gather).
    token_embeds = jnp.take(params['text']['word_emb'], input_ids, axis=0)
    loss_mask = jnp.concatenate(
        [(1 - query_atts).astype(jnp.float32),
         text_loss_atts.astype(jnp.float32),
         # TODO(synk): original loss_mask is one token shorter than targets (handled
         # inside Megatron); pad with 0 so the wrap-around final target is ignored.
         jnp.zeros((B, 1), jnp.float32)], axis=1)

    loss_caption = gpt_decoder_loss(query_features, token_embeds, params['text'],
                                    H_TEXT, targets, loss_mask)
    loss_contrastive = jnp.float32(0.0)   # use_contrastive defaults to False
    return loss_caption, loss_contrastive


# ----------------------------- deterministic parameter init -------------------
def init_params(seed=0):
    keys = jax.random.split(jax.random.PRNGKey(seed), 128)
    ctr = [0]

    def nxt():
        k = keys[ctr[0]]
        ctr[0] += 1
        return k

    def nrm(shape, std=0.02):
        return (std * jax.random.normal(nxt(), shape)).astype(jnp.float32)

    def zeros(shape):
        return jnp.zeros(shape, jnp.float32)

    def ones(shape):
        return jnp.ones(shape, jnp.float32)

    def block(d, dh):
        return dict(ln1_g=ones((d,)), ln1_b=zeros((d,)),
                    qkv_w=nrm((d, 3 * d)), qkv_b=zeros((3 * d,)),
                    proj_w=nrm((d, d)), proj_b=zeros((d,)),
                    ln2_g=ones((d,)), ln2_b=zeros((d,)),
                    fc1_w=nrm((d, dh)), fc1_b=zeros((dh,)),
                    fc2_w=nrm((dh, d)), fc2_b=zeros((d,)))

    return dict(
        vit=dict(patch_w=nrm((PATCH_DIM, D_VIS)), patch_b=zeros((D_VIS,)),
                 cls_token=nrm((1, 1, D_VIS), 0.015),
                 pos_embed=nrm((1, 1 + N_PATCH, D_VIS), 0.015),
                 block=block(D_VIS, MLP_VIS),
                 lnf_g=ones((D_VIS,)), lnf_b=zeros((D_VIS,))),
        learnable_queries=nrm((1, NUM_QUERY, D_VIS), 0.015),
        attn_pool=dict(ln_q_g=ones((D_VIS,)), ln_q_b=zeros((D_VIS,)),
                       ln_k_g=ones((D_VIS,)), ln_k_b=zeros((D_VIS,)),
                       q_w=nrm((D_VIS, D_VIS)), q_b=zeros((D_VIS,)),
                       kv_w=nrm((D_VIS, 2 * D_VIS)), kv_b=zeros((2 * D_VIS,)),
                       proj_w=nrm((D_VIS, D_VIS)), proj_b=zeros((D_VIS,)),
                       ln2_g=ones((D_VIS,)), ln2_b=zeros((D_VIS,)),
                       fc1_w=nrm((D_VIS, MLP_VIS)), fc1_b=zeros((MLP_VIS,)),
                       fc2_w=nrm((MLP_VIS, D_VIS)), fc2_b=zeros((D_VIS,))),
        visual_fc_w=nrm((D_VIS, D_TEXT), 0.015), visual_fc_b=zeros((D_TEXT,)),
        text=dict(word_emb=nrm((VOCAB, D_TEXT)),
                  pos_emb=nrm((1, NUM_QUERY + SEQ_LEN, D_TEXT)),
                  block=block(D_TEXT, MLP_TEXT),
                  lnf_g=ones((D_TEXT,)), lnf_b=zeros((D_TEXT,))),
    )


# ----------------------------- main -------------------------------------------
if __name__ == "__main__":
    B = 2
    params = init_params(0)
    k_img, k_ids = jax.random.split(jax.random.PRNGKey(0))
    image = jax.random.normal(k_img, (B, C, IMG, IMG), jnp.float32)
    input_ids = jax.random.randint(k_ids, (B, SEQ_LEN), 0, VOCAB, jnp.int32)
    lens = jnp.array([SEQ_LEN, SEQ_LEN - 2], jnp.int32)
    attention_mask = (jnp.arange(SEQ_LEN)[None, :] < lens[:, None]).astype(jnp.int32)

    fwd = jax.jit(distributed_gpt3_pretrain_forward)
    loss_caption, loss_contrastive = fwd(params, image, input_ids, attention_mask)
    jax.block_until_ready((loss_caption, loss_contrastive))
    print("KERNEL_OK")
</pallas_src>

<mosaic_0001>
module attributes {stable_mosaic.version = 11 : i64} {
  func.func @_attn_pool_kernel(%arg0: i32, %arg1: memref<2x8x32xf32, #tpu.memory_space<vmem>>, %arg2: memref<8x32xf32, #tpu.memory_space<vmem>>, %arg3: memref<1x32xf32, #tpu.memory_space<vmem>>, %arg4: memref<1x32xf32, #tpu.memory_space<vmem>>, %arg5: memref<1x32xf32, #tpu.memory_space<vmem>>, %arg6: memref<1x32xf32, #tpu.memory_space<vmem>>, %arg7: memref<32x32xbf16, #tpu.memory_space<vmem>>, %arg8: memref<1x32xf32, #tpu.memory_space<vmem>>, %arg9: memref<32x64xbf16, #tpu.memory_space<vmem>>, %arg10: memref<1x64xf32, #tpu.memory_space<vmem>>, %arg11: memref<4x8x32xbf16, #tpu.memory_space<vmem>>, %arg12: memref<1x32xf32, #tpu.memory_space<vmem>>, %arg13: memref<1x32xf32, #tpu.memory_space<vmem>>, %arg14: memref<1x32xf32, #tpu.memory_space<vmem>>, %arg15: memref<32x128xbf16, #tpu.memory_space<vmem>>, %arg16: memref<1x128xf32, #tpu.memory_space<vmem>>, %arg17: memref<128x32xbf16, #tpu.memory_space<vmem>>, %arg18: memref<1x32xf32, #tpu.memory_space<vmem>>, %arg19: memref<32x32xbf16, #tpu.memory_space<vmem>>, %arg20: memref<1x32xf32, #tpu.memory_space<vmem>>, %arg21: memref<2x8x32xf32, #tpu.memory_space<vmem>>) attributes {dimension_semantics = [#tpu.dimension_semantics<arbitrary>], iteration_bounds = array<i64: 1>, scalar_prefetch = 0 : i64, scratch_operands = 0 : i64, tpu.core_type = #tpu.core_type<tc>, window_params = [{transform_indices = @transform_0, window_bounds = array<i64: 2, 8, 32>}, {pipeline_mode = #tpu.pipeline_mode<synchronous>, transform_indices = @transform_1, window_bounds = array<i64: 8, 32>}, {pipeline_mode = #tpu.pipeline_mode<synchronous>, transform_indices = @transform_2, window_bounds = array<i64: 1, 32>}, {pipeline_mode = #tpu.pipeline_mode<synchronous>, transform_indices = @transform_3, window_bounds = array<i64: 1, 32>}, {pipeline_mode = #tpu.pipeline_mode<synchronous>, transform_indices = @transform_4, window_bounds = array<i64: 1, 32>}, {pipeline_mode = #tpu.pipeline_mode<synchronous>, transform_indices = @transform_5, window_bounds = array<i64: 1, 32>}, {pipeline_mode = #tpu.pipeline_mode<synchronous>, transform_indices = @transform_6, window_bounds = array<i64: 32, 32>}, {pipeline_mode = #tpu.pipeline_mode<synchronous>, transform_indices = @transform_7, window_bounds = array<i64: 1, 32>}, {pipeline_mode = #tpu.pipeline_mode<synchronous>, transform_indices = @transform_8, window_bounds = array<i64: 32, 64>}, {pipeline_mode = #tpu.pipeline_mode<synchronous>, transform_indices = @transform_9, window_bounds = array<i64: 1, 64>}, {pipeline_mode = #tpu.pipeline_mode<synchronous>, transform_indices = @transform_10, window_bounds = array<i64: 4, 8, 32>}, {pipeline_mode = #tpu.pipeline_mode<synchronous>, transform_indices = @transform_11, window_bounds = array<i64: 1, 32>}, {pipeline_mode = #tpu.pipeline_mode<synchronous>, transform_indices = @transform_12, window_bounds = array<i64: 1, 32>}, {pipeline_mode = #tpu.pipeline_mode<synchronous>, transform_indices = @transform_13, window_bounds = array<i64: 1, 32>}, {pipeline_mode = #tpu.pipeline_mode<synchronous>, transform_indices = @transform_14, window_bounds = array<i64: 32, 128>}, {pipeline_mode = #tpu.pipeline_mode<synchronous>, transform_indices = @transform_15, window_bounds = array<i64: 1, 128>}, {pipeline_mode = #tpu.pipeline_mode<synchronous>, transform_indices = @transform_16, window_bounds = array<i64: 128, 32>}, {pipeline_mode = #tpu.pipeline_mode<synchronous>, transform_indices = @transform_17, window_bounds = array<i64: 1, 32>}, {pipeline_mode = #tpu.pipeline_mode<synchronous>, transform_indices = @transform_18, window_bounds = array<i64: 32, 32>}, {pipeline_mode = #tpu.pipeline_mode<synchronous>, transform_indices = @transform_19, window_bounds = array<i64: 1, 32>}, {transform_indices = @transform_20, window_bounds = array<i64: 2, 8, 32>}]} {
    %c0 = arith.constant 0 : index
    %c0_0 = arith.constant 0 : index
    %0 = vector.load %arg2[%c0, %c0_0] : memref<8x32xf32, #tpu.memory_space<vmem>>, vector<8x32xf32>
    %1 = vector.shape_cast %0 : vector<8x32xf32> to vector<1x8x32xf32>
    %2 = vector.shape_cast %1 : vector<1x8x32xf32> to vector<1x8x32xf32>
    %3 = vector.broadcast %2 : vector<1x8x32xf32> to vector<2x8x32xf32>
    %4 = vector.shape_cast %3 : vector<2x8x32xf32> to vector<16x32xf32>
    %c0_1 = arith.constant 0 : index
    %c0_2 = arith.constant 0 : index
    %c0_3 = arith.constant 0 : index
    %5 = vector.load %arg1[%c0_1, %c0_2, %c0_3] : memref<2x8x32xf32, #tpu.memory_space<vmem>>, vector<2x8x32xf32>
    %6 = vector.shape_cast %5 : vector<2x8x32xf32> to vector<16x32xf32>
    %c0_4 = arith.constant 0 : index
    %c0_5 = arith.constant 0 : index
    %7 = vector.load %arg3[%c0_4, %c0_5] : memref<1x32xf32, #tpu.memory_space<vmem>>, vector<1x32xf32>
    %c0_6 = arith.constant 0 : index
    %c0_7 = arith.constant 0 : index
    %8 = vector.load %arg4[%c0_6, %c0_7] : memref<1x32xf32, #tpu.memory_space<vmem>>, vector<1x32xf32>
    %cst = arith.constant dense<0.000000e+00> : vector<16xf32>
    %9 = vector.multi_reduction <add>, %4, %cst [1] : vector<16x32xf32> to vector<16xf32>
    %10 = vector.shape_cast %9 : vector<16xf32> to vector<16x1xf32>
    %cst_8 = arith.constant 3.200000e+01 : f32
    %11 = vector.broadcast %cst_8 : f32 to vector<16x1xf32>
    %12 = arith.divf %10, %11 : vector<16x1xf32>
    %13 = vector.broadcast %12 : vector<16x1xf32> to vector<16x32xf32>
    %14 = arith.subf %4, %13 : vector<16x32xf32>
    %15 = arith.mulf %14, %14 : vector<16x32xf32>
    %cst_9 = arith.constant dense<0.000000e+00> : vector<16xf32>
    %16 = vector.multi_reduction <add>, %15, %cst_9 [1] : vector<16x32xf32> to vector<16xf32>
    %17 = vector.shape_cast %16 : vector<16xf32> to vector<16x1xf32>
    %cst_10 = arith.constant 3.200000e+01 : f32
    %18 = vector.broadcast %cst_10 : f32 to vector<16x1xf32>
    %19 = arith.divf %17, %18 : vector<16x1xf32>
    %20 = vector.broadcast %12 : vector<16x1xf32> to vector<16x32xf32>
    %21 = arith.subf %4, %20 : vector<16x32xf32>
    %cst_11 = arith.constant 9.99999997E-7 : f32
    %22 = vector.broadcast %cst_11 : f32 to vector<16x1xf32>
    %23 = arith.addf %19, %22 : vector<16x1xf32>
    %24 = math.rsqrt %23 : vector<16x1xf32>
    %25 = vector.broadcast %24 : vector<16x1xf32> to vector<16x32xf32>
    %26 = arith.mulf %21, %25 : vector<16x32xf32>
    %27 = vector.broadcast %7 : vector<1x32xf32> to vector<16x32xf32>
    %28 = arith.mulf %26, %27 : vector<16x32xf32>
    %29 = vector.broadcast %8 : vector<1x32xf32> to vector<16x32xf32>
    %30 = arith.addf %28, %29 : vector<16x32xf32>
    %c0_12 = arith.constant 0 : index
    %c0_13 = arith.constant 0 : index
    %31 = vector.load %arg5[%c0_12, %c0_13] : memref<1x32xf32, #tpu.memory_space<vmem>>, vector<1x32xf32>
    %c0_14 = arith.constant 0 : index
    %c0_15 = arith.constant 0 : index
    %32 = vector.load %arg6[%c0_14, %c0_15] : memref<1x32xf32, #tpu.memory_space<vmem>>, vector<1x32xf32>
    %cst_16 = arith.constant dense<0.000000e+00> : vector<16xf32>
    %33 = vector.multi_reduction <add>, %6, %cst_16 [1] : vector<16x32xf32> to vector<16xf32>
    %34 = vector.shape_cast %33 : vector<16xf32> to vector<16x1xf32>
    %cst_17 = arith.constant 3.200000e+01 : f32
    %35 = vector.broadcast %cst_17 : f32 to vector<16x1xf32>
    %36 = arith.divf %34, %35 : vector<16x1xf32>
    %37 = vector.broadcast %36 : vector<16x1xf32> to vector<16x32xf32>
    %38 = arith.subf %6, %37 : vector<16x32xf32>
    %39 = arith.mulf %38, %38 : vector<16x32xf32>
    %cst_18 = arith.constant dense<0.000000e+00> : vector<16xf32>
    %40 = vector.multi_reduction <add>, %39, %cst_18 [1] : vector<16x32xf32> to vector<16xf32>
    %41 = vector.shape_cast %40 : vector<16xf32> to vector<16x1xf32>
    %cst_19 = arith.constant 3.200000e+01 : f32
    %42 = vector.broadcast %cst_19 : f32 to vector<16x1xf32>
    %43 = arith.divf %41, %42 : vector<16x1xf32>
    %44 = vector.broadcast %36 : vector<16x1xf32> to vector<16x32xf32>
    %45 = arith.subf %6, %44 : vector<16x32xf32>
    %cst_20 = arith.constant 9.99999997E-7 : f32
    %46 = vector.broadcast %cst_20 : f32 to vector<16x1xf32>
    %47 = arith.addf %43, %46 : vector<16x1xf32>
    %48 = math.rsqrt %47 : vector<16x1xf32>
    %49 = vector.broadcast %48 : vector<16x1xf32> to vector<16x32xf32>
    %50 = arith.mulf %45, %49 : vector<16x32xf32>
    %51 = vector.broadcast %31 : vector<1x32xf32> to vector<16x32xf32>
    %52 = arith.mulf %50, %51 : vector<16x32xf32>
    %53 = vector.broadcast %32 : vector<1x32xf32> to vector<16x32xf32>
    %54 = arith.addf %52, %53 : vector<16x32xf32>
    %55 = arith.truncf %30 : vector<16x32xf32> to vector<16x32xbf16>
    %c0_21 = arith.constant 0 : index
    %c0_22 = arith.constant 0 : index
    %56 = vector.load %arg7[%c0_21, %c0_22] : memref<32x32xbf16, #tpu.memory_space<vmem>>, vector<32x32xbf16>
    %cst_23 = arith.constant dense<0.000000e+00> : vector<16x32xf32>
    %57 = tpu.matmul %55, %56, %cst_23 {dimension_numbers = #tpu.dot_dimension_numbers<[1], [0], [0], [1], [0, 0, 1, 1], [], []>} : vector<16x32xbf16>, vector<32x32xbf16>, vector<16x32xf32> -> vector<16x32xf32>
    %c0_24 = arith.constant 0 : index
    %c0_25 = arith.constant 0 : index
    %58 = vector.load %arg8[%c0_24, %c0_25] : memref<1x32xf32, #tpu.memory_space<vmem>>, vector<1x32xf32>
    %59 = vector.broadcast %58 : vector<1x32xf32> to vector<16x32xf32>
    %60 = arith.addf %57, %59 : vector<16x32xf32>
    %61 = arith.truncf %54 : vector<16x32xf32> to vector<16x32xbf16>
    %c0_26 = arith.constant 0 : index
    %c0_27 = arith.constant 0 : index
    %62 = vector.load %arg9[%c0_26, %c0_27] : memref<32x64xbf16, #tpu.memory_space<vmem>>, vector<32x64xbf16>
    %cst_28 = arith.constant dense<0.000000e+00> : vector<16x64xf32>
    %63 = tpu.matmul %61, %62, %cst_28 {dimension_numbers = #tpu.dot_dimension_numbers<[1], [0], [0], [1], [0, 0, 1, 1], [], []>} : vector<16x32xbf16>, vector<32x64xbf16>, vector<16x64xf32> -> vector<16x64xf32>
    %c0_29 = arith.constant 0 : index
    %c0_30 = arith.constant 0 : index
    %64 = vector.load %arg10[%c0_29, %c0_30] : memref<1x64xf32, #tpu.memory_space<vmem>>, vector<1x64xf32>
    %65 = vector.broadcast %64 : vector<1x64xf32> to vector<16x64xf32>
    %66 = arith.addf %63, %65 : vector<16x64xf32>
    %67 = vector.extract_strided_slice %66 {offsets = [0, 0], sizes = [16, 32], strides = [1, 1]} : vector<16x64xf32> to vector<16x32xf32>
    %68 = vector.extract_strided_slice %66 {offsets = [0, 32], sizes = [16, 32], strides = [1, 1]} : vector<16x64xf32> to vector<16x32xf32>
    %69 = tpu.iota {dimensions = array<i32: 0>} : vector<16x16xi32>
    %70 = tpu.iota {dimensions = array<i32: 1>} : vector<16x16xi32>
    %c0_i32 = arith.constant 0 : i32
    %71 = vector.broadcast %c0_i32 : i32 to vector<16x16xi32>
    %72 = arith.cmpi sge, %69, %71 : vector<16x16xi32>
    %c8_i32 = arith.constant 8 : i32
    %73 = vector.broadcast %c8_i32 : i32 to vector<16x16xi32>
    %74 = arith.cmpi slt, %69, %73 : vector<16x16xi32>
    %75 = arith.andi %72, %74 : vector<16x16xi1>
    %c0_i32_31 = arith.constant 0 : i32
    %76 = vector.broadcast %c0_i32_31 : i32 to vector<16x16xi32>
    %77 = arith.cmpi sge, %70, %76 : vector<16x16xi32>
    %78 = arith.andi %75, %77 : vector<16x16xi1>
    %c5_i32 = arith.constant 5 : i32
    %79 = vector.broadcast %c5_i32 : i32 to vector<16x16xi32>
    %80 = arith.cmpi slt, %70, %79 : vector<16x16xi32>
    %81 = arith.andi %78, %80 : vector<16x16xi1>
    %c8_i32_32 = arith.constant 8 : i32
    %82 = vector.broadcast %c8_i32_32 : i32 to vector<16x16xi32>
    %83 = arith.cmpi sge, %69, %82 : vector<16x16xi32>
    %c16_i32 = arith.constant 16 : i32
    %84 = vector.broadcast %c16_i32 : i32 to vector<16x16xi32>
    %85 = arith.cmpi slt, %69, %84 : vector<16x16xi32>
    %86 = arith.andi %83, %85 : vector<16x16xi1>
    %c8_i32_33 = arith.constant 8 : i32
    %87 = vector.broadcast %c8_i32_33 : i32 to vector<16x16xi32>
    %88 = arith.cmpi sge, %70, %87 : vector<16x16xi32>
    %89 = arith.andi %86, %88 : vector<16x16xi1>
    %c13_i32 = arith.constant 13 : i32
    %90 = vector.broadcast %c13_i32 : i32 to vector<16x16xi32>
    %91 = arith.cmpi slt, %70, %90 : vector<16x16xi32>
    %92 = arith.andi %89, %91 : vector<16x16xi1>
    %93 = arith.ori %81, %92 : vector<16x16xi1>
    %94 = vector.extract_strided_slice %60 {offsets = [0, 0], sizes = [16, 8], strides = [1, 1]} : vector<16x32xf32> to vector<16x8xf32>
    %95 = arith.truncf %94 : vector<16x8xf32> to vector<16x8xbf16>
    %96 = vector.extract_strided_slice %67 {offsets = [0, 0], sizes = [16, 8], strides = [1, 1]} : vector<16x32xf32> to vector<16x8xf32>
    %97 = arith.truncf %96 : vector<16x8xf32> to vector<16x8xbf16>
    %98 = vector.extract_strided_slice %68 {offsets = [0, 0], sizes = [16, 8], strides = [1, 1]} : vector<16x32xf32> to vector<16x8xf32>
    %99 = arith.truncf %98 : vector<16x8xf32> to vector<16x8xbf16>
    %cst_34 = arith.constant dense<0.000000e+00> : vector<16x16xf32>
    %100 = tpu.matmul %95, %97, %cst_34 {dimension_numbers = #tpu.dot_dimension_numbers<[1], [1], [0], [0], [0, 0, 1, 0], [], []>} : vector<16x8xbf16>, vector<16x8xbf16>, vector<16x16xf32> -> vector<16x16xf32>
    %cst_35 = arith.constant 0.353553385 : f32
    %101 = vector.broadcast %cst_35 : f32 to vector<16x16xf32>
    %102 = arith.mulf %100, %101 : vector<16x16xf32>
    %cst_36 = arith.constant -1.000000e+09 : f32
    %103 = vector.broadcast %cst_36 : f32 to vector<16x16xf32>
    %104 = arith.select %93, %102, %103 : vector<16x16xi1>, vector<16x16xf32>
    %cst_37 = arith.constant dense<0xFF800000> : vector<16xf32>
    %105 = vector.multi_reduction <maximumf>, %104, %cst_37 [1] : vector<16x16xf32> to vector<16xf32>
    %106 = vector.shape_cast %105 : vector<16xf32> to vector<16x1xf32>
    %107 = vector.broadcast %106 : vector<16x1xf32> to vector<16x16xf32>
    %108 = arith.subf %104, %107 : vector<16x16xf32>
    %109 = math.exp %108 : vector<16x16xf32>
    %cst_38 = arith.constant dense<0.000000e+00> : vector<16xf32>
    %110 = vector.multi_reduction <add>, %109, %cst_38 [1] : vector<16x16xf32> to vector<16xf32>
    %111 = vector.shape_cast %110 : vector<16xf32> to vector<16x1xf32>
    %112 = tpu.reciprocal %111 {approx = true} : vector<16x1xf32> -> vector<16x1xf32>
    %113 = vector.broadcast %112 : vector<16x1xf32> to vector<16x16xf32>
    %114 = arith.mulf %109, %113 : vector<16x16xf32>
    %115 = arith.truncf %114 : vector<16x16xf32> to vector<16x16xbf16>
    %cst_39 = arith.constant dense<0.000000e+00> : vector<16x8xf32>
    %116 = tpu.matmul %115, %99, %cst_39 {dimension_numbers = #tpu.dot_dimension_numbers<[1], [0], [0], [1], [0, 0, 1, 1], [], []>} : vector<16x16xbf16>, vector<16x8xbf16>, vector<16x8xf32> -> vector<16x8xf32>
    %117 = arith.truncf %116 : vector<16x8xf32> to vector<16x8xbf16>
    %c0_40 = arith.constant 0 : index
    %c0_41 = arith.constant 0 : index
    %c0_42 = arith.constant 0 : index
    %118 = vector.load %arg11[%c0_40, %c0_41, %c0_42] : memref<4x8x32xbf16, #tpu.memory_space<vmem>>, vector<1x8x32xbf16>
    %119 = vector.shape_cast %118 : vector<1x8x32xbf16> to vector<8x32xbf16>
    %cst_43 = arith.constant dense<0.000000e+00> : vector<16x32xf32>
    %120 = tpu.matmul %117, %119, %cst_43 {dimension_numbers = #tpu.dot_dimension_numbers<[1], [0], [0], [1], [0, 0, 1, 1], [], []>} : vector<16x8xbf16>, vector<8x32xbf16>, vector<16x32xf32> -> vector<16x32xf32>
    %121 = vector.extract_strided_slice %60 {offsets = [0, 8], sizes = [16, 8], strides = [1, 1]} : vector<16x32xf32> to vector<16x8xf32>
    %122 = arith.truncf %121 : vector<16x8xf32> to vector<16x8xbf16>
    %123 = vector.extract_strided_slice %67 {offsets = [0, 8], sizes = [16, 8], strides = [1, 1]} : vector<16x32xf32> to vector<16x8xf32>
    %124 = arith.truncf %123 : vector<16x8xf32> to vector<16x8xbf16>
    %125 = vector.extract_strided_slice %68 {offsets = [0, 8], sizes = [16, 8], strides = [1, 1]} : vector<16x32xf32> to vector<16x8xf32>
    %126 = arith.truncf %125 : vector<16x8xf32> to vector<16x8xbf16>
    %cst_44 = arith.constant dense<0.000000e+00> : vector<16x16xf32>
    %127 = tpu.matmul %122, %124, %cst_44 {dimension_numbers = #tpu.dot_dimension_numbers<[1], [1], [0], [0], [0, 0, 1, 0], [], []>} : vector<16x8xbf16>, vector<16x8xbf16>, vector<16x16xf32> -> vector<16x16xf32>
    %cst_45 = arith.constant 0.353553385 : f32
    %128 = vector.broadcast %cst_45 : f32 to vector<16x16xf32>
    %129 = arith.mulf %127, %128 : vector<16x16xf32>
    %cst_46 = arith.constant -1.000000e+09 : f32
    %130 = vector.broadcast %cst_46 : f32 to vector<16x16xf32>
    %131 = arith.select %93, %129, %130 : vector<16x16xi1>, vector<16x16xf32>
    %cst_47 = arith.constant dense<0xFF800000> : vector<16xf32>
    %132 = vector.multi_reduction <maximumf>, %131, %cst_47 [1] : vector<16x16xf32> to vector<16xf32>
    %133 = vector.shape_cast %132 : vector<16xf32> to vector<16x1xf32>
    %134 = vector.broadcast %133 : vector<16x1xf32> to vector<16x16xf32>
    %135 = arith.subf %131, %134 : vector<16x16xf32>
    %136 = math.exp %135 : vector<16x16xf32>
    %cst_48 = arith.constant dense<0.000000e+00> : vector<16xf32>
    %137 = vector.multi_reduction <add>, %136, %cst_48 [1] : vector<16x16xf32> to vector<16xf32>
    %138 = vector.shape_cast %137 : vector<16xf32> to vector<16x1xf32>
    %139 = tpu.reciprocal %138 {approx = true} : vector<16x1xf32> -> vector<16x1xf32>
    %140 = vector.broadcast %139 : vector<16x1xf32> to vector<16x16xf32>
    %141 = arith.mulf %136, %140 : vector<16x16xf32>
    %142 = arith.truncf %141 : vector<16x16xf32> to vector<16x16xbf16>
    %cst_49 = arith.constant dense<0.000000e+00> : vector<16x8xf32>
    %143 = tpu.matmul %142, %126, %cst_49 {dimension_numbers = #tpu.dot_dimension_numbers<[1], [0], [0], [1], [0, 0, 1, 1], [], []>} : vector<16x16xbf16>, vector<16x8xbf16>, vector<16x8xf32> -> vector<16x8xf32>
    %144 = arith.truncf %143 : vector<16x8xf32> to vector<16x8xbf16>
    %c1 = arith.constant 1 : index
    %c0_50 = arith.constant 0 : index
    %c0_51 = arith.constant 0 : index
    %145 = vector.load %arg11[%c1, %c0_50, %c0_51] : memref<4x8x32xbf16, #tpu.memory_space<vmem>>, vector<1x8x32xbf16>
    %146 = vector.shape_cast %145 : vector<1x8x32xbf16> to vector<8x32xbf16>
    %cst_52 = arith.constant dense<0.000000e+00> : vector<16x32xf32>
    %147 = tpu.matmul %144, %146, %cst_52 {dimension_numbers = #tpu.dot_dimension_numbers<[1], [0], [0], [1], [0, 0, 1, 1], [], []>} : vector<16x8xbf16>, vector<8x32xbf16>, vector<16x32xf32> -> vector<16x32xf32>
    %148 = arith.addf %120, %147 : vector<16x32xf32>
    %149 = vector.extract_strided_slice %60 {offsets = [0, 16], sizes = [16, 8], strides = [1, 1]} : vector<16x32xf32> to vector<16x8xf32>
    %150 = arith.truncf %149 : vector<16x8xf32> to vector<16x8xbf16>
    %151 = vector.extract_strided_slice %67 {offsets = [0, 16], sizes = [16, 8], strides = [1, 1]} : vector<16x32xf32> to vector<16x8xf32>
    %152 = arith.truncf %151 : vector<16x8xf32> to vector<16x8xbf16>
    %153 = vector.extract_strided_slice %68 {offsets = [0, 16], sizes = [16, 8], strides = [1, 1]} : vector<16x32xf32> to vector<16x8xf32>
    %154 = arith.truncf %153 : vector<16x8xf32> to vector<16x8xbf16>
    %cst_53 = arith.constant dense<0.000000e+00> : vector<16x16xf32>
    %155 = tpu.matmul %150, %152, %cst_53 {dimension_numbers = #tpu.dot_dimension_numbers<[1], [1], [0], [0], [0, 0, 1, 0], [], []>} : vector<16x8xbf16>, vector<16x8xbf16>, vector<16x16xf32> -> vector<16x16xf32>
    %cst_54 = arith.constant 0.353553385 : f32
    %156 = vector.broadcast %cst_54 : f32 to vector<16x16xf32>
    %157 = arith.mulf %155, %156 : vector<16x16xf32>
    %cst_55 = arith.constant -1.000000e+09 : f32
    %158 = vector.broadcast %cst_55 : f32 to vector<16x16xf32>
    %159 = arith.select %93, %157, %158 : vector<16x16xi1>, vector<16x16xf32>
    %cst_56 = arith.constant dense<0xFF800000> : vector<16xf32>
    %160 = vector.multi_reduction <maximumf>, %159, %cst_56 [1] : vector<16x16xf32> to vector<16xf32>
    %161 = vector.shape_cast %160 : vector<16xf32> to vector<16x1xf32>
    %162 = vector.broadcast %161 : vector<16x1xf32> to vector<16x16xf32>
    %163 = arith.subf %159, %162 : vector<16x16xf32>
    %164 = math.exp %163 : vector<16x16xf32>
    %cst_57 = arith.constant dense<0.000000e+00> : vector<16xf32>
    %165 = vector.multi_reduction <add>, %164, %cst_57 [1] : vector<16x16xf32> to vector<16xf32>
    %166 = vector.shape_cast %165 : vector<16xf32> to vector<16x1xf32>
    %167 = tpu.reciprocal %166 {approx = true} : vector<16x1xf32> -> vector<16x1xf32>
    %168 = vector.broadcast %167 : vector<16x1xf32> to vector<16x16xf32>
    %169 = arith.mulf %164, %168 : vector<16x16xf32>
    %170 = arith.truncf %169 : vector<16x16xf32> to vector<16x16xbf16>
    %cst_58 = arith.constant dense<0.000000e+00> : vector<16x8xf32>
    %171 = tpu.matmul %170, %154, %cst_58 {dimension_numbers = #tpu.dot_dimension_numbers<[1], [0], [0], [1], [0, 0, 1, 1], [], []>} : vector<16x16xbf16>, vector<16x8xbf16>, vector<16x8xf32> -> vector<16x8xf32>
    %172 = arith.truncf %171 : vector<16x8xf32> to vector<16x8xbf16>
    %c2 = arith.constant 2 : index
    %c0_59 = arith.constant 0 : index
    %c0_60 = arith.constant 0 : index
    %173 = vector.load %arg11[%c2, %c0_59, %c0_60] : memref<4x8x32xbf16, #tpu.memory_space<vmem>>, vector<1x8x32xbf16>
    %174 = vector.shape_cast %173 : vector<1x8x32xbf16> to vector<8x32xbf16>
    %cst_61 = arith.constant dense<0.000000e+00> : vector<16x32xf32>
    %175 = tpu.matmul %172, %174, %cst_61 {dimension_numbers = #tpu.dot_dimension_numbers<[1], [0], [0], [1], [0, 0, 1, 1], [], []>} : vector<16x8xbf16>, vector<8x32xbf16>, vector<16x32xf32> -> vector<16x32xf32>
    %176 = arith.addf %148, %175 : vector<16x32xf32>
    %177 = vector.extract_strided_slice %60 {offsets = [0, 24], sizes = [16, 8], strides = [1, 1]} : vector<16x32xf32> to vector<16x8xf32>
    %178 = arith.truncf %177 : vector<16x8xf32> to vector<16x8xbf16>
    %179 = vector.extract_strided_slice %67 {offsets = [0, 24], sizes = [16, 8], strides = [1, 1]} : vector<16x32xf32> to vector<16x8xf32>
    %180 = arith.truncf %179 : vector<16x8xf32> to vector<16x8xbf16>
    %181 = vector.extract_strided_slice %68 {offsets = [0, 24], sizes = [16, 8], strides = [1, 1]} : vector<16x32xf32> to vector<16x8xf32>
    %182 = arith.truncf %181 : vector<16x8xf32> to vector<16x8xbf16>
    %cst_62 = arith.constant dense<0.000000e+00> : vector<16x16xf32>
    %183 = tpu.matmul %178, %180, %cst_62 {dimension_numbers = #tpu.dot_dimension_numbers<[1], [1], [0], [0], [0, 0, 1, 0], [], []>} : vector<16x8xbf16>, vector<16x8xbf16>, vector<16x16xf32> -> vector<16x16xf32>
    %cst_63 = arith.constant 0.353553385 : f32
    %184 = vector.broadcast %cst_63 : f32 to vector<16x16xf32>
    %185 = arith.mulf %183, %184 : vector<16x16xf32>
    %cst_64 = arith.constant -1.000000e+09 : f32
    %186 = vector.broadcast %cst_64 : f32 to vector<16x16xf32>
    %187 = arith.select %93, %185, %186 : vector<16x16xi1>, vector<16x16xf32>
    %cst_65 = arith.constant dense<0xFF800000> : vector<16xf32>
    %188 = vector.multi_reduction <maximumf>, %187, %cst_65 [1] : vector<16x16xf32> to vector<16xf32>
    %189 = vector.shape_cast %188 : vector<16xf32> to vector<16x1xf32>
    %190 = vector.broadcast %189 : vector<16x1xf32> to vector<16x16xf32>
    %191 = arith.subf %187, %190 : vector<16x16xf32>
    %192 = math.exp %191 : vector<16x16xf32>
    %cst_66 = arith.constant dense<0.000000e+00> : vector<16xf32>
    %193 = vector.multi_reduction <add>, %192, %cst_66 [1] : vector<16x16xf32> to vector<16xf32>
    %194 = vector.shape_cast %193 : vector<16xf32> to vector<16x1xf32>
    %195 = tpu.reciprocal %194 {approx = true} : vector<16x1xf32> -> vector<16x1xf32>
    %196 = vector.broadcast %195 : vector<16x1xf32> to vector<16x16xf32>
    %197 = arith.mulf %192, %196 : vector<16x16xf32>
    %198 = arith.truncf %197 : vector<16x16xf32> to vector<16x16xbf16>
    %cst_67 = arith.constant dense<0.000000e+00> : vector<16x8xf32>
    %199 = tpu.matmul %198, %182, %cst_67 {dimension_numbers = #tpu.dot_dimension_numbers<[1], [0], [0], [1], [0, 0, 1, 1], [], []>} : vector<16x16xbf16>, vector<16x8xbf16>, vector<16x8xf32> -> vector<16x8xf32>
    %200 = arith.truncf %199 : vector<16x8xf32> to vector<16x8xbf16>
    %c3 = arith.constant 3 : index
    %c0_68 = arith.constant 0 : index
    %c0_69 = arith.constant 0 : index
    %201 = vector.load %arg11[%c3, %c0_68, %c0_69] : memref<4x8x32xbf16, #tpu.memory_space<vmem>>, vector<1x8x32xbf16>
    %202 = vector.shape_cast %201 : vector<1x8x32xbf16> to vector<8x32xbf16>
    %cst_70 = arith.constant dense<0.000000e+00> : vector<16x32xf32>
    %203 = tpu.matmul %200, %202, %cst_70 {dimension_numbers = #tpu.dot_dimension_numbers<[1], [0], [0], [1], [0, 0, 1, 1], [], []>} : vector<16x8xbf16>, vector<8x32xbf16>, vector<16x32xf32> -> vector<16x32xf32>
    %204 = arith.addf %176, %203 : vector<16x32xf32>
    %c0_71 = arith.constant 0 : index
    %c0_72 = arith.constant 0 : index
    %205 = vector.load %arg12[%c0_71, %c0_72] : memref<1x32xf32, #tpu.memory_space<vmem>>, vector<1x32xf32>
    %206 = vector.broadcast %205 : vector<1x32xf32> to vector<16x32xf32>
    %207 = arith.addf %204, %206 : vector<16x32xf32>
    %208 = arith.addf %4, %207 : vector<16x32xf32>
    %c0_73 = arith.constant 0 : index
    %c0_74 = arith.constant 0 : index
    %209 = vector.load %arg13[%c0_73, %c0_74] : memref<1x32xf32, #tpu.memory_space<vmem>>, vector<1x32xf32>
    %c0_75 = arith.constant 0 : index
    %c0_76 = arith.constant 0 : index
    %210 = vector.load %arg14[%c0_75, %c0_76] : memref<1x32xf32, #tpu.memory_space<vmem>>, vector<1x32xf32>
    %cst_77 = arith.constant dense<0.000000e+00> : vector<16xf32>
    %211 = vector.multi_reduction <add>, %208, %cst_77 [1] : vector<16x32xf32> to vector<16xf32>
    %212 = vector.shape_cast %211 : vector<16xf32> to vector<16x1xf32>
    %cst_78 = arith.constant 3.200000e+01 : f32
    %213 = vector.broadcast %cst_78 : f32 to vector<16x1xf32>
    %214 = arith.divf %212, %213 : vector<16x1xf32>
    %215 = vector.broadcast %214 : vector<16x1xf32> to vector<16x32xf32>
    %216 = arith.subf %208, %215 : vector<16x32xf32>
    %217 = arith.mulf %216, %216 : vector<16x32xf32>
    %cst_79 = arith.constant dense<0.000000e+00> : vector<16xf32>
    %218 = vector.multi_reduction <add>, %217, %cst_79 [1] : vector<16x32xf32> to vector<16xf32>
    %219 = vector.shape_cast %218 : vector<16xf32> to vector<16x1xf32>
    %cst_80 = arith.constant 3.200000e+01 : f32
    %220 = vector.broadcast %cst_80 : f32 to vector<16x1xf32>
    %221 = arith.divf %219, %220 : vector<16x1xf32>
    %222 = vector.broadcast %214 : vector<16x1xf32> to vector<16x32xf32>
    %223 = arith.subf %208, %222 : vector<16x32xf32>
    %cst_81 = arith.constant 9.99999997E-7 : f32
    %224 = vector.broadcast %cst_81 : f32 to vector<16x1xf32>
    %225 = arith.addf %221, %224 : vector<16x1xf32>
    %226 = math.rsqrt %225 : vector<16x1xf32>
    %227 = vector.broadcast %226 : vector<16x1xf32> to vector<16x32xf32>
    %228 = arith.mulf %223, %227 : vector<16x32xf32>
    %229 = vector.broadcast %209 : vector<1x32xf32> to vector<16x32xf32>
    %230 = arith.mulf %228, %229 : vector<16x32xf32>
    %231 = vector.broadcast %210 : vector<1x32xf32> to vector<16x32xf32>
    %232 = arith.addf %230, %231 : vector<16x32xf32>
    %233 = arith.truncf %232 : vector<16x32xf32> to vector<16x32xbf16>
    %c0_82 = arith.constant 0 : index
    %c0_83 = arith.constant 0 : index
    %234 = vector.load %arg15[%c0_82, %c0_83] : memref<32x128xbf16, #tpu.memory_space<vmem>>, vector<32x128xbf16>
    %cst_84 = arith.constant dense<0.000000e+00> : vector<16x128xf32>
    %235 = tpu.matmul %233, %234, %cst_84 {dimension_numbers = #tpu.dot_dimension_numbers<[1], [0], [0], [1], [0, 0, 1, 1], [], []>} : vector<16x32xbf16>, vector<32x128xbf16>, vector<16x128xf32> -> vector<16x128xf32>
    %c0_85 = arith.constant 0 : index
    %c0_86 = arith.constant 0 : index
    %236 = vector.load %arg16[%c0_85, %c0_86] : memref<1x128xf32, #tpu.memory_space<vmem>>, vector<1x128xf32>
    %237 = vector.broadcast %236 : vector<1x128xf32> to vector<16x128xf32>
    %238 = arith.addf %235, %237 : vector<16x128xf32>
    %239 = arith.mulf %238, %238 : vector<16x128xf32>
    %240 = arith.mulf %238, %239 : vector<16x128xf32>
    %cst_87 = arith.constant 4.471500e-02 : f32
    %241 = vector.broadcast %cst_87 : f32 to vector<16x128xf32>
    %242 = arith.mulf %241, %240 : vector<16x128xf32>
    %243 = arith.addf %238, %242 : vector<16x128xf32>
    %cst_88 = arith.constant 0.797884583 : f32
    %244 = vector.broadcast %cst_88 : f32 to vector<16x128xf32>
    %245 = arith.mulf %244, %243 : vector<16x128xf32>
    %246 = math.tanh %245 : vector<16x128xf32>
    %cst_89 = arith.constant 1.000000e+00 : f32
    %247 = vector.broadcast %cst_89 : f32 to vector<16x128xf32>
    %248 = arith.addf %247, %246 : vector<16x128xf32>
    %cst_90 = arith.constant 5.000000e-01 : f32
    %249 = vector.broadcast %cst_90 : f32 to vector<16x128xf32>
    %250 = arith.mulf %249, %248 : vector<16x128xf32>
    %251 = arith.mulf %238, %250 : vector<16x128xf32>
    %252 = arith.truncf %251 : vector<16x128xf32> to vector<16x128xbf16>
    %c0_91 = arith.constant 0 : index
    %c0_92 = arith.constant 0 : index
    %253 = vector.load %arg17[%c0_91, %c0_92] : memref<128x32xbf16, #tpu.memory_space<vmem>>, vector<128x32xbf16>
    %cst_93 = arith.constant dense<0.000000e+00> : vector<16x32xf32>
    %254 = tpu.matmul %252, %253, %cst_93 {dimension_numbers = #tpu.dot_dimension_numbers<[1], [0], [0], [1], [0, 0, 1, 1], [], []>} : vector<16x128xbf16>, vector<128x32xbf16>, vector<16x32xf32> -> vector<16x32xf32>
    %c0_94 = arith.constant 0 : index
    %c0_95 = arith.constant 0 : index
    %255 = vector.load %arg18[%c0_94, %c0_95] : memref<1x32xf32, #tpu.memory_space<vmem>>, vector<1x32xf32>
    %256 = vector.broadcast %255 : vector<1x32xf32> to vector<16x32xf32>
    %257 = arith.addf %254, %256 : vector<16x32xf32>
    %258 = arith.addf %208, %257 : vector<16x32xf32>
    %259 = arith.truncf %258 : vector<16x32xf32> to vector<16x32xbf16>
    %c0_96 = arith.constant 0 : index
    %c0_97 = arith.constant 0 : index
    %260 = vector.load %arg19[%c0_96, %c0_97] : memref<32x32xbf16, #tpu.memory_space<vmem>>, vector<32x32xbf16>
    %cst_98 = arith.constant dense<0.000000e+00> : vector<16x32xf32>
    %261 = tpu.matmul %259, %260, %cst_98 {dimension_numbers = #tpu.dot_dimension_numbers<[1], [0], [0], [1], [0, 0, 1, 1], [], []>} : vector<16x32xbf16>, vector<32x32xbf16>, vector<16x32xf32> -> vector<16x32xf32>
    %c0_99 = arith.constant 0 : index
    %c0_100 = arith.constant 0 : index
    %262 = vector.load %arg20[%c0_99, %c0_100] : memref<1x32xf32, #tpu.memory_space<vmem>>, vector<1x32xf32>
    %263 = vector.broadcast %262 : vector<1x32xf32> to vector<16x32xf32>
    %264 = arith.addf %261, %263 : vector<16x32xf32>
    %265 = vector.shape_cast %264 : vector<16x32xf32> to vector<2x8x32xf32>
    %c0_101 = arith.constant 0 : index
    %c0_102 = arith.constant 0 : index
    %c0_103 = arith.constant 0 : index
    %266 = vector.load %arg21[%c0_101, %c0_102, %c0_103] : memref<2x8x32xf32, #tpu.memory_space<vmem>>, vector<2x8x32xf32>
    tpu.vector_store %arg21[%c0_101, %c0_102, %c0_103], %265 {strides = array<i32>} : memref<2x8x32xf32, #tpu.memory_space<vmem>>, vector<2x8x32xf32>,
    return
  }
  func.func @transform_0(%arg0: i32) -> (i32, i32, i32) {
    %c0_i32 = arith.constant 0 : i32
    %c0_i32_0 = arith.constant 0 : i32
    %c0_i32_1 = arith.constant 0 : i32
    return %arg0, %c0_i32, %c0_i32_0 : i32, i32, i32
  }
  func.func @transform_1(%arg0: i32) -> (i32, i32) {
    %c0_i32 = arith.constant 0 : i32
    %c0_i32_0 = arith.constant 0 : i32
    %c0_i32_1 = arith.constant 0 : i32
    return %c0_i32, %c0_i32_0 : i32, i32
  }
  func.func @transform_2(%arg0: i32) -> (i32, i32) {
    %c0_i32 = arith.constant 0 : i32
    %c0_i32_0 = arith.constant 0 : i32
    %c0_i32_1 = arith.constant 0 : i32
    return %c0_i32, %c0_i32_0 : i32, i32
  }
  func.func @transform_3(%arg0: i32) -> (i32, i32) {
    %c0_i32 = arith.constant 0 : i32
    %c0_i32_0 = arith.constant 0 : i32
    %c0_i32_1 = arith.constant 0 : i32
    return %c0_i32, %c0_i32_0 : i32, i32
  }
  func.func @transform_4(%arg0: i32) -> (i32, i32) {
    %c0_i32 = arith.constant 0 : i32
    %c0_i32_0 = arith.constant 0 : i32
    %c0_i32_1 = arith.constant 0 : i32
    return %c0_i32, %c0_i32_0 : i32, i32
  }
  func.func @transform_5(%arg0: i32) -> (i32, i32) {
    %c0_i32 = arith.constant 0 : i32
    %c0_i32_0 = arith.constant 0 : i32
    %c0_i32_1 = arith.constant 0 : i32
    return %c0_i32, %c0_i32_0 : i32, i32
  }
  func.func @transform_6(%arg0: i32) -> (i32, i32) {
    %c0_i32 = arith.constant 0 : i32
    %c0_i32_0 = arith.constant 0 : i32
    %c0_i32_1 = arith.constant 0 : i32
    return %c0_i32, %c0_i32_0 : i32, i32
  }
  func.func @transform_7(%arg0: i32) -> (i32, i32) {
    %c0_i32 = arith.constant 0 : i32
    %c0_i32_0 = arith.constant 0 : i32
    %c0_i32_1 = arith.constant 0 : i32
    return %c0_i32, %c0_i32_0 : i32, i32
  }
  func.func @transform_8(%arg0: i32) -> (i32, i32) {
    %c0_i32 = arith.constant 0 : i32
    %c0_i32_0 = arith.constant 0 : i32
    %c0_i32_1 = arith.constant 0 : i32
    return %c0_i32, %c0_i32_0 : i32, i32
  }
  func.func @transform_9(%arg0: i32) -> (i32, i32) {
    %c0_i32 = arith.constant 0 : i32
    %c0_i32_0 = arith.constant 0 : i32
    %c0_i32_1 = arith.constant 0 : i32
    return %c0_i32, %c0_i32_0 : i32, i32
  }
  func.func @transform_10(%arg0: i32) -> (i32, i32, i32) {
    %c0_i32 = arith.constant 0 : i32
    %c0_i32_0 = arith.constant 0 : i32
    %c0_i32_1 = arith.constant 0 : i32
    %c0_i32_2 = arith.constant 0 : i32
    return %c0_i32, %c0_i32_0, %c0_i32_1 : i32, i32, i32
  }
  func.func @transform_11(%arg0: i32) -> (i32, i32) {
    %c0_i32 = arith.constant 0 : i32
    %c0_i32_0 = arith.constant 0 : i32
    %c0_i32_1 = arith.constant 0 : i32
    return %c0_i32, %c0_i32_0 : i32, i32
  }
  func.func @transform_12(%arg0: i32) -> (i32, i32) {
    %c0_i32 = arith.constant 0 : i32
    %c0_i32_0 = arith.constant 0 : i32
    %c0_i32_1 = arith.constant 0 : i32
    return %c0_i32, %c0_i32_0 : i32, i32
  }
  func.func @transform_13(%arg0: i32) -> (i32, i32) {
    %c0_i32 = arith.constant 0 : i32
    %c0_i32_0 = arith.constant 0 : i32
    %c0_i32_1 = arith.constant 0 : i32
    return %c0_i32, %c0_i32_0 : i32, i32
  }
  func.func @transform_14(%arg0: i32) -> (i32, i32) {
    %c0_i32 = arith.constant 0 : i32
    %c0_i32_0 = arith.constant 0 : i32
    %c0_i32_1 = arith.constant 0 : i32
    return %c0_i32, %c0_i32_0 : i32, i32
  }
  func.func @transform_15(%arg0: i32) -> (i32, i32) {
    %c0_i32 = arith.constant 0 : i32
    %c0_i32_0 = arith.constant 0 : i32
    %c0_i32_1 = arith.constant 0 : i32
    return %c0_i32, %c0_i32_0 : i32, i32
  }
  func.func @transform_16(%arg0: i32) -> (i32, i32) {
    %c0_i32 = arith.constant 0 : i32
    %c0_i32_0 = arith.constant 0 : i32
    %c0_i32_1 = arith.constant 0 : i32
    return %c0_i32, %c0_i32_0 : i32, i32
  }
  func.func @transform_17(%arg0: i32) -> (i32, i32) {
    %c0_i32 = arith.constant 0 : i32
    %c0_i32_0 = arith.constant 0 : i32
    %c0_i32_1 = arith.constant 0 : i32
    return %c0_i32, %c0_i32_0 : i32, i32
  }
  func.func @transform_18(%arg0: i32) -> (i32, i32) {
    %c0_i32 = arith.constant 0 : i32
    %c0_i32_0 = arith.constant 0 : i32
    %c0_i32_1 = arith.constant 0 : i32
    return %c0_i32, %c0_i32_0 : i32, i32
  }
  func.func @transform_19(%arg0: i32) -> (i32, i32) {
    %c0_i32 = arith.constant 0 : i32
    %c0_i32_0 = arith.constant 0 : i32
    %c0_i32_1 = arith.constant 0 : i32
    return %c0_i32, %c0_i32_0 : i32, i32
  }
  func.func @transform_20(%arg0: i32) -> (i32, i32, i32) {
    %c0_i32 = arith.constant 0 : i32
    %c0_i32_0 = arith.constant 0 : i32
    %c0_i32_1 = arith.constant 0 : i32
    return %arg0, %c0_i32, %c0_i32_0 : i32, i32, i32
  }
}

module attributes {stable_mosaic.version = 11 : i64} {
  func.func @_vit_block_kernel(%arg0: i32, %arg1: memref<2x8x32xf32, #tpu.memory_space<vmem>>, %arg2: memref<1x32xf32, #tpu.memory_space<vmem>>, %arg3: memref<1x32xf32, #tpu.memory_space<vmem>>, %arg4: memref<32x96xbf16, #tpu.memory_space<vmem>>, %arg5: memref<1x96xf32, #tpu.memory_space<vmem>>, %arg6: memref<4x8x32xbf16, #tpu.memory_space<vmem>>, %arg7: memref<1x32xf32, #tpu.memory_space<vmem>>, %arg8: memref<1x32xf32, #tpu.memory_space<vmem>>, %arg9: memref<1x32xf32, #tpu.memory_space<vmem>>, %arg10: memref<32x128xbf16, #tpu.memory_space<vmem>>, %arg11: memref<1x128xf32, #tpu.memory_space<vmem>>, %arg12: memref<128x32xbf16, #tpu.memory_space<vmem>>, %arg13: memref<1x32xf32, #tpu.memory_space<vmem>>, %arg14: memref<1x32xf32, #tpu.memory_space<vmem>>, %arg15: memref<1x32xf32, #tpu.memory_space<vmem>>, %arg16: memref<2x8x32xf32, #tpu.memory_space<vmem>>) attributes {dimension_semantics = [#tpu.dimension_semantics<arbitrary>], iteration_bounds = array<i64: 1>, scalar_prefetch = 0 : i64, scratch_operands = 0 : i64, tpu.core_type = #tpu.core_type<tc>, window_params = [{transform_indices = @transform_0, window_bounds = array<i64: 2, 8, 32>}, {pipeline_mode = #tpu.pipeline_mode<synchronous>, transform_indices = @transform_1, window_bounds = array<i64: 1, 32>}, {pipeline_mode = #tpu.pipeline_mode<synchronous>, transform_indices = @transform_2, window_bounds = array<i64: 1, 32>}, {pipeline_mode = #tpu.pipeline_mode<synchronous>, transform_indices = @transform_3, window_bounds = array<i64: 32, 96>}, {pipeline_mode = #tpu.pipeline_mode<synchronous>, transform_indices = @transform_4, window_bounds = array<i64: 1, 96>}, {pipeline_mode = #tpu.pipeline_mode<synchronous>, transform_indices = @transform_5, window_bounds = array<i64: 4, 8, 32>}, {pipeline_mode = #tpu.pipeline_mode<synchronous>, transform_indices = @transform_6, window_bounds = array<i64: 1, 32>}, {pipeline_mode = #tpu.pipeline_mode<synchronous>, transform_indices = @transform_7, window_bounds = array<i64: 1, 32>}, {pipeline_mode = #tpu.pipeline_mode<synchronous>, transform_indices = @transform_8, window_bounds = array<i64: 1, 32>}, {pipeline_mode = #tpu.pipeline_mode<synchronous>, transform_indices = @transform_9, window_bounds = array<i64: 32, 128>}, {pipeline_mode = #tpu.pipeline_mode<synchronous>, transform_indices = @transform_10, window_bounds = array<i64: 1, 128>}, {pipeline_mode = #tpu.pipeline_mode<synchronous>, transform_indices = @transform_11, window_bounds = array<i64: 128, 32>}, {pipeline_mode = #tpu.pipeline_mode<synchronous>, transform_indices = @transform_12, window_bounds = array<i64: 1, 32>}, {pipeline_mode = #tpu.pipeline_mode<synchronous>, transform_indices = @transform_13, window_bounds = array<i64: 1, 32>}, {pipeline_mode = #tpu.pipeline_mode<synchronous>, transform_indices = @transform_14, window_bounds = array<i64: 1, 32>}, {transform_indices = @transform_15, window_bounds = array<i64: 2, 8, 32>}]} {
    %c0 = arith.constant 0 : index
    %c0_0 = arith.constant 0 : index
    %c0_1 = arith.constant 0 : index
    %0 = vector.load %arg1[%c0, %c0_0, %c0_1] : memref<2x8x32xf32, #tpu.memory_space<vmem>>, vector<2x8x32xf32>
    %1 = vector.shape_cast %0 : vector<2x8x32xf32> to vector<16x32xf32>
    %2 = tpu.iota {dimensions = array<i32: 0>} : vector<16x16xi32>
    %3 = tpu.iota {dimensions = array<i32: 1>} : vector<16x16xi32>
    %c0_i32 = arith.constant 0 : i32
    %4 = vector.broadcast %c0_i32 : i32 to vector<16x16xi32>
    %5 = arith.cmpi sge, %2, %4 : vector<16x16xi32>
    %c8_i32 = arith.constant 8 : i32
    %6 = vector.broadcast %c8_i32 : i32 to vector<16x16xi32>
    %7 = arith.cmpi slt, %2, %6 : vector<16x16xi32>
    %8 = arith.andi %5, %7 : vector<16x16xi1>
    %c0_i32_2 = arith.constant 0 : i32
    %9 = vector.broadcast %c0_i32_2 : i32 to vector<16x16xi32>
    %10 = arith.cmpi sge, %3, %9 : vector<16x16xi32>
    %11 = arith.andi %8, %10 : vector<16x16xi1>
    %c5_i32 = arith.constant 5 : i32
    %12 = vector.broadcast %c5_i32 : i32 to vector<16x16xi32>
    %13 = arith.cmpi slt, %3, %12 : vector<16x16xi32>
    %14 = arith.andi %11, %13 : vector<16x16xi1>
    %c8_i32_3 = arith.constant 8 : i32
    %15 = vector.broadcast %c8_i32_3 : i32 to vector<16x16xi32>
    %16 = arith.cmpi sge, %2, %15 : vector<16x16xi32>
    %c16_i32 = arith.constant 16 : i32
    %17 = vector.broadcast %c16_i32 : i32 to vector<16x16xi32>
    %18 = arith.cmpi slt, %2, %17 : vector<16x16xi32>
    %19 = arith.andi %16, %18 : vector<16x16xi1>
    %c8_i32_4 = arith.constant 8 : i32
    %20 = vector.broadcast %c8_i32_4 : i32 to vector<16x16xi32>
    %21 = arith.cmpi sge, %3, %20 : vector<16x16xi32>
    %22 = arith.andi %19, %21 : vector<16x16xi1>
    %c13_i32 = arith.constant 13 : i32
    %23 = vector.broadcast %c13_i32 : i32 to vector<16x16xi32>
    %24 = arith.cmpi slt, %3, %23 : vector<16x16xi32>
    %25 = arith.andi %22, %24 : vector<16x16xi1>
    %26 = arith.ori %14, %25 : vector<16x16xi1>
    %c0_5 = arith.constant 0 : index
    %c0_6 = arith.constant 0 : index
    %27 = vector.load %arg2[%c0_5, %c0_6] : memref<1x32xf32, #tpu.memory_space<vmem>>, vector<1x32xf32>
    %c0_7 = arith.constant 0 : index
    %c0_8 = arith.constant 0 : index
    %28 = vector.load %arg3[%c0_7, %c0_8] : memref<1x32xf32, #tpu.memory_space<vmem>>, vector<1x32xf32>
    %cst = arith.constant dense<0.000000e+00> : vector<16xf32>
    %29 = vector.multi_reduction <add>, %1, %cst [1] : vector<16x32xf32> to vector<16xf32>
    %30 = vector.shape_cast %29 : vector<16xf32> to vector<16x1xf32>
    %cst_9 = arith.constant 3.200000e+01 : f32
    %31 = vector.broadcast %cst_9 : f32 to vector<16x1xf32>
    %32 = arith.divf %30, %31 : vector<16x1xf32>
    %33 = vector.broadcast %32 : vector<16x1xf32> to vector<16x32xf32>
    %34 = arith.subf %1, %33 : vector<16x32xf32>
    %35 = arith.mulf %34, %34 : vector<16x32xf32>
    %cst_10 = arith.constant dense<0.000000e+00> : vector<16xf32>
    %36 = vector.multi_reduction <add>, %35, %cst_10 [1] : vector<16x32xf32> to vector<16xf32>
    %37 = vector.shape_cast %36 : vector<16xf32> to vector<16x1xf32>
    %cst_11 = arith.constant 3.200000e+01 : f32
    %38 = vector.broadcast %cst_11 : f32 to vector<16x1xf32>
    %39 = arith.divf %37, %38 : vector<16x1xf32>
    %40 = vector.broadcast %32 : vector<16x1xf32> to vector<16x32xf32>
    %41 = arith.subf %1, %40 : vector<16x32xf32>
    %cst_12 = arith.constant 9.99999997E-7 : f32
    %42 = vector.broadcast %cst_12 : f32 to vector<16x1xf32>
    %43 = arith.addf %39, %42 : vector<16x1xf32>
    %44 = math.rsqrt %43 : vector<16x1xf32>
    %45 = vector.broadcast %44 : vector<16x1xf32> to vector<16x32xf32>
    %46 = arith.mulf %41, %45 : vector<16x32xf32>
    %47 = vector.broadcast %27 : vector<1x32xf32> to vector<16x32xf32>
    %48 = arith.mulf %46, %47 : vector<16x32xf32>
    %49 = vector.broadcast %28 : vector<1x32xf32> to vector<16x32xf32>
    %50 = arith.addf %48, %49 : vector<16x32xf32>
    %51 = arith.truncf %50 : vector<16x32xf32> to vector<16x32xbf16>
    %c0_13 = arith.constant 0 : index
    %c0_14 = arith.constant 0 : index
    %52 = vector.load %arg4[%c0_13, %c0_14] : memref<32x96xbf16, #tpu.memory_space<vmem>>, vector<32x96xbf16>
    %cst_15 = arith.constant dense<0.000000e+00> : vector<16x96xf32>
    %53 = tpu.matmul %51, %52, %cst_15 {dimension_numbers = #tpu.dot_dimension_numbers<[1], [0], [0], [1], [0, 0, 1, 1], [], []>} : vector<16x32xbf16>, vector<32x96xbf16>, vector<16x96xf32> -> vector<16x96xf32>
    %c0_16 = arith.constant 0 : index
    %c0_17 = arith.constant 0 : index
    %54 = vector.load %arg5[%c0_16, %c0_17] : memref<1x96xf32, #tpu.memory_space<vmem>>, vector<1x96xf32>
    %55 = vector.broadcast %54 : vector<1x96xf32> to vector<16x96xf32>
    %56 = arith.addf %53, %55 : vector<16x96xf32>
    %57 = vector.extract_strided_slice %56 {offsets = [0, 0], sizes = [16, 32], strides = [1, 1]} : vector<16x96xf32> to vector<16x32xf32>
    %58 = vector.extract_strided_slice %56 {offsets = [0, 32], sizes = [16, 32], strides = [1, 1]} : vector<16x96xf32> to vector<16x32xf32>
    %59 = vector.extract_strided_slice %56 {offsets = [0, 64], sizes = [16, 32], strides = [1, 1]} : vector<16x96xf32> to vector<16x32xf32>
    %60 = vector.extract_strided_slice %57 {offsets = [0, 0], sizes = [16, 8], strides = [1, 1]} : vector<16x32xf32> to vector<16x8xf32>
    %61 = arith.truncf %60 : vector<16x8xf32> to vector<16x8xbf16>
    %62 = vector.extract_strided_slice %58 {offsets = [0, 0], sizes = [16, 8], strides = [1, 1]} : vector<16x32xf32> to vector<16x8xf32>
    %63 = arith.truncf %62 : vector<16x8xf32> to vector<16x8xbf16>
    %64 = vector.extract_strided_slice %59 {offsets = [0, 0], sizes = [16, 8], strides = [1, 1]} : vector<16x32xf32> to vector<16x8xf32>
    %65 = arith.truncf %64 : vector<16x8xf32> to vector<16x8xbf16>
    %cst_18 = arith.constant dense<0.000000e+00> : vector<16x16xf32>
    %66 = tpu.matmul %61, %63, %cst_18 {dimension_numbers = #tpu.dot_dimension_numbers<[1], [1], [0], [0], [0, 0, 1, 0], [], []>} : vector<16x8xbf16>, vector<16x8xbf16>, vector<16x16xf32> -> vector<16x16xf32>
    %cst_19 = arith.constant 0.353553385 : f32
    %67 = vector.broadcast %cst_19 : f32 to vector<16x16xf32>
    %68 = arith.mulf %66, %67 : vector<16x16xf32>
    %cst_20 = arith.constant -1.000000e+09 : f32
    %69 = vector.broadcast %cst_20 : f32 to vector<16x16xf32>
    %70 = arith.select %26, %68, %69 : vector<16x16xi1>, vector<16x16xf32>
    %cst_21 = arith.constant dense<0xFF800000> : vector<16xf32>
    %71 = vector.multi_reduction <maximumf>, %70, %cst_21 [1] : vector<16x16xf32> to vector<16xf32>
    %72 = vector.shape_cast %71 : vector<16xf32> to vector<16x1xf32>
    %73 = vector.broadcast %72 : vector<16x1xf32> to vector<16x16xf32>
    %74 = arith.subf %70, %73 : vector<16x16xf32>
    %75 = math.exp %74 : vector<16x16xf32>
    %cst_22 = arith.constant dense<0.000000e+00> : vector<16xf32>
    %76 = vector.multi_reduction <add>, %75, %cst_22 [1] : vector<16x16xf32> to vector<16xf32>
    %77 = vector.shape_cast %76 : vector<16xf32> to vector<16x1xf32>
    %78 = tpu.reciprocal %77 {approx = true} : vector<16x1xf32> -> vector<16x1xf32>
    %79 = vector.broadcast %78 : vector<16x1xf32> to vector<16x16xf32>
    %80 = arith.mulf %75, %79 : vector<16x16xf32>
    %81 = arith.truncf %80 : vector<16x16xf32> to vector<16x16xbf16>
    %cst_23 = arith.constant dense<0.000000e+00> : vector<16x8xf32>
    %82 = tpu.matmul %81, %65, %cst_23 {dimension_numbers = #tpu.dot_dimension_numbers<[1], [0], [0], [1], [0, 0, 1, 1], [], []>} : vector<16x16xbf16>, vector<16x8xbf16>, vector<16x8xf32> -> vector<16x8xf32>
    %83 = arith.truncf %82 : vector<16x8xf32> to vector<16x8xbf16>
    %c0_24 = arith.constant 0 : index
    %c0_25 = arith.constant 0 : index
    %c0_26 = arith.constant 0 : index
    %84 = vector.load %arg6[%c0_24, %c0_25, %c0_26] : memref<4x8x32xbf16, #tpu.memory_space<vmem>>, vector<1x8x32xbf16>
    %85 = vector.shape_cast %84 : vector<1x8x32xbf16> to vector<8x32xbf16>
    %cst_27 = arith.constant dense<0.000000e+00> : vector<16x32xf32>
    %86 = tpu.matmul %83, %85, %cst_27 {dimension_numbers = #tpu.dot_dimension_numbers<[1], [0], [0], [1], [0, 0, 1, 1], [], []>} : vector<16x8xbf16>, vector<8x32xbf16>, vector<16x32xf32> -> vector<16x32xf32>
    %87 = vector.extract_strided_slice %57 {offsets = [0, 8], sizes = [16, 8], strides = [1, 1]} : vector<16x32xf32> to vector<16x8xf32>
    %88 = arith.truncf %87 : vector<16x8xf32> to vector<16x8xbf16>
    %89 = vector.extract_strided_slice %58 {offsets = [0, 8], sizes = [16, 8], strides = [1, 1]} : vector<16x32xf32> to vector<16x8xf32>
    %90 = arith.truncf %89 : vector<16x8xf32> to vector<16x8xbf16>
    %91 = vector.extract_strided_slice %59 {offsets = [0, 8], sizes = [16, 8], strides = [1, 1]} : vector<16x32xf32> to vector<16x8xf32>
    %92 = arith.truncf %91 : vector<16x8xf32> to vector<16x8xbf16>
    %cst_28 = arith.constant dense<0.000000e+00> : vector<16x16xf32>
    %93 = tpu.matmul %88, %90, %cst_28 {dimension_numbers = #tpu.dot_dimension_numbers<[1], [1], [0], [0], [0, 0, 1, 0], [], []>} : vector<16x8xbf16>, vector<16x8xbf16>, vector<16x16xf32> -> vector<16x16xf32>
    %cst_29 = arith.constant 0.353553385 : f32
    %94 = vector.broadcast %cst_29 : f32 to vector<16x16xf32>
    %95 = arith.mulf %93, %94 : vector<16x16xf32>
    %cst_30 = arith.constant -1.000000e+09 : f32
    %96 = vector.broadcast %cst_30 : f32 to vector<16x16xf32>
    %97 = arith.select %26, %95, %96 : vector<16x16xi1>, vector<16x16xf32>
    %cst_31 = arith.constant dense<0xFF800000> : vector<16xf32>
    %98 = vector.multi_reduction <maximumf>, %97, %cst_31 [1] : vector<16x16xf32> to vector<16xf32>
    %99 = vector.shape_cast %98 : vector<16xf32> to vector<16x1xf32>
    %100 = vector.broadcast %99 : vector<16x1xf32> to vector<16x16xf32>
    %101 = arith.subf %97, %100 : vector<16x16xf32>
    %102 = math.exp %101 : vector<16x16xf32>
    %cst_32 = arith.constant dense<0.000000e+00> : vector<16xf32>
    %103 = vector.multi_reduction <add>, %102, %cst_32 [1] : vector<16x16xf32> to vector<16xf32>
    %104 = vector.shape_cast %103 : vector<16xf32> to vector<16x1xf32>
    %105 = tpu.reciprocal %104 {approx = true} : vector<16x1xf32> -> vector<16x1xf32>
    %106 = vector.broadcast %105 : vector<16x1xf32> to vector<16x16xf32>
    %107 = arith.mulf %102, %106 : vector<16x16xf32>
    %108 = arith.truncf %107 : vector<16x16xf32> to vector<16x16xbf16>
    %cst_33 = arith.constant dense<0.000000e+00> : vector<16x8xf32>
    %109 = tpu.matmul %108, %92, %cst_33 {dimension_numbers = #tpu.dot_dimension_numbers<[1], [0], [0], [1], [0, 0, 1, 1], [], []>} : vector<16x16xbf16>, vector<16x8xbf16>, vector<16x8xf32> -> vector<16x8xf32>
    %110 = arith.truncf %109 : vector<16x8xf32> to vector<16x8xbf16>
    %c1 = arith.constant 1 : index
    %c0_34 = arith.constant 0 : index
    %c0_35 = arith.constant 0 : index
    %111 = vector.load %arg6[%c1, %c0_34, %c0_35] : memref<4x8x32xbf16, #tpu.memory_space<vmem>>, vector<1x8x32xbf16>
    %112 = vector.shape_cast %111 : vector<1x8x32xbf16> to vector<8x32xbf16>
    %cst_36 = arith.constant dense<0.000000e+00> : vector<16x32xf32>
    %113 = tpu.matmul %110, %112, %cst_36 {dimension_numbers = #tpu.dot_dimension_numbers<[1], [0], [0], [1], [0, 0, 1, 1], [], []>} : vector<16x8xbf16>, vector<8x32xbf16>, vector<16x32xf32> -> vector<16x32xf32>
    %114 = arith.addf %86, %113 : vector<16x32xf32>
    %115 = vector.extract_strided_slice %57 {offsets = [0, 16], sizes = [16, 8], strides = [1, 1]} : vector<16x32xf32> to vector<16x8xf32>
    %116 = arith.truncf %115 : vector<16x8xf32> to vector<16x8xbf16>
    %117 = vector.extract_strided_slice %58 {offsets = [0, 16], sizes = [16, 8], strides = [1, 1]} : vector<16x32xf32> to vector<16x8xf32>
    %118 = arith.truncf %117 : vector<16x8xf32> to vector<16x8xbf16>
    %119 = vector.extract_strided_slice %59 {offsets = [0, 16], sizes = [16, 8], strides = [1, 1]} : vector<16x32xf32> to vector<16x8xf32>
    %120 = arith.truncf %119 : vector<16x8xf32> to vector<16x8xbf16>
    %cst_37 = arith.constant dense<0.000000e+00> : vector<16x16xf32>
    %121 = tpu.matmul %116, %118, %cst_37 {dimension_numbers = #tpu.dot_dimension_numbers<[1], [1], [0], [0], [0, 0, 1, 0], [], []>} : vector<16x8xbf16>, vector<16x8xbf16>, vector<16x16xf32> -> vector<16x16xf32>
    %cst_38 = arith.constant 0.353553385 : f32
    %122 = vector.broadcast %cst_38 : f32 to vector<16x16xf32>
    %123 = arith.mulf %121, %122 : vector<16x16xf32>
    %cst_39 = arith.constant -1.000000e+09 : f32
    %124 = vector.broadcast %cst_39 : f32 to vector<16x16xf32>
    %125 = arith.select %26, %123, %124 : vector<16x16xi1>, vector<16x16xf32>
    %cst_40 = arith.constant dense<0xFF800000> : vector<16xf32>
    %126 = vector.multi_reduction <maximumf>, %125, %cst_40 [1] : vector<16x16xf32> to vector<16xf32>
    %127 = vector.shape_cast %126 : vector<16xf32> to vector<16x1xf32>
    %128 = vector.broadcast %127 : vector<16x1xf32> to vector<16x16xf32>
    %129 = arith.subf %125, %128 : vector<16x16xf32>
    %130 = math.exp %129 : vector<16x16xf32>
    %cst_41 = arith.constant dense<0.000000e+00> : vector<16xf32>
    %131 = vector.multi_reduction <add>, %130, %cst_41 [1] : vector<16x16xf32> to vector<16xf32>
    %132 = vector.shape_cast %131 : vector<16xf32> to vector<16x1xf32>
    %133 = tpu.reciprocal %132 {approx = true} : vector<16x1xf32> -> vector<16x1xf32>
    %134 = vector.broadcast %133 : vector<16x1xf32> to vector<16x16xf32>
    %135 = arith.mulf %130, %134 : vector<16x16xf32>
    %136 = arith.truncf %135 : vector<16x16xf32> to vector<16x16xbf16>
    %cst_42 = arith.constant dense<0.000000e+00> : vector<16x8xf32>
    %137 = tpu.matmul %136, %120, %cst_42 {dimension_numbers = #tpu.dot_dimension_numbers<[1], [0], [0], [1], [0, 0, 1, 1], [], []>} : vector<16x16xbf16>, vector<16x8xbf16>, vector<16x8xf32> -> vector<16x8xf32>
    %138 = arith.truncf %137 : vector<16x8xf32> to vector<16x8xbf16>
    %c2 = arith.constant 2 : index
    %c0_43 = arith.constant 0 : index
    %c0_44 = arith.constant 0 : index
    %139 = vector.load %arg6[%c2, %c0_43, %c0_44] : memref<4x8x32xbf16, #tpu.memory_space<vmem>>, vector<1x8x32xbf16>
    %140 = vector.shape_cast %139 : vector<1x8x32xbf16> to vector<8x32xbf16>
    %cst_45 = arith.constant dense<0.000000e+00> : vector<16x32xf32>
    %141 = tpu.matmul %138, %140, %cst_45 {dimension_numbers = #tpu.dot_dimension_numbers<[1], [0], [0], [1], [0, 0, 1, 1], [], []>} : vector<16x8xbf16>, vector<8x32xbf16>, vector<16x32xf32> -> vector<16x32xf32>
    %142 = arith.addf %114, %141 : vector<16x32xf32>
    %143 = vector.extract_strided_slice %57 {offsets = [0, 24], sizes = [16, 8], strides = [1, 1]} : vector<16x32xf32> to vector<16x8xf32>
    %144 = arith.truncf %143 : vector<16x8xf32> to vector<16x8xbf16>
    %145 = vector.extract_strided_slice %58 {offsets = [0, 24], sizes = [16, 8], strides = [1, 1]} : vector<16x32xf32> to vector<16x8xf32>
    %146 = arith.truncf %145 : vector<16x8xf32> to vector<16x8xbf16>
    %147 = vector.extract_strided_slice %59 {offsets = [0, 24], sizes = [16, 8], strides = [1, 1]} : vector<16x32xf32> to vector<16x8xf32>
    %148 = arith.truncf %147 : vector<16x8xf32> to vector<16x8xbf16>
    %cst_46 = arith.constant dense<0.000000e+00> : vector<16x16xf32>
    %149 = tpu.matmul %144, %146, %cst_46 {dimension_numbers = #tpu.dot_dimension_numbers<[1], [1], [0], [0], [0, 0, 1, 0], [], []>} : vector<16x8xbf16>, vector<16x8xbf16>, vector<16x16xf32> -> vector<16x16xf32>
    %cst_47 = arith.constant 0.353553385 : f32
    %150 = vector.broadcast %cst_47 : f32 to vector<16x16xf32>
    %151 = arith.mulf %149, %150 : vector<16x16xf32>
    %cst_48 = arith.constant -1.000000e+09 : f32
    %152 = vector.broadcast %cst_48 : f32 to vector<16x16xf32>
    %153 = arith.select %26, %151, %152 : vector<16x16xi1>, vector<16x16xf32>
    %cst_49 = arith.constant dense<0xFF800000> : vector<16xf32>
    %154 = vector.multi_reduction <maximumf>, %153, %cst_49 [1] : vector<16x16xf32> to vector<16xf32>
    %155 = vector.shape_cast %154 : vector<16xf32> to vector<16x1xf32>
    %156 = vector.broadcast %155 : vector<16x1xf32> to vector<16x16xf32>
    %157 = arith.subf %153, %156 : vector<16x16xf32>
    %158 = math.exp %157 : vector<16x16xf32>
    %cst_50 = arith.constant dense<0.000000e+00> : vector<16xf32>
    %159 = vector.multi_reduction <add>, %158, %cst_50 [1] : vector<16x16xf32> to vector<16xf32>
    %160 = vector.shape_cast %159 : vector<16xf32> to vector<16x1xf32>
    %161 = tpu.reciprocal %160 {approx = true} : vector<16x1xf32> -> vector<16x1xf32>
    %162 = vector.broadcast %161 : vector<16x1xf32> to vector<16x16xf32>
    %163 = arith.mulf %158, %162 : vector<16x16xf32>
    %164 = arith.truncf %163 : vector<16x16xf32> to vector<16x16xbf16>
    %cst_51 = arith.constant dense<0.000000e+00> : vector<16x8xf32>
    %165 = tpu.matmul %164, %148, %cst_51 {dimension_numbers = #tpu.dot_dimension_numbers<[1], [0], [0], [1], [0, 0, 1, 1], [], []>} : vector<16x16xbf16>, vector<16x8xbf16>, vector<16x8xf32> -> vector<16x8xf32>
    %166 = arith.truncf %165 : vector<16x8xf32> to vector<16x8xbf16>
    %c3 = arith.constant 3 : index
    %c0_52 = arith.constant 0 : index
    %c0_53 = arith.constant 0 : index
    %167 = vector.load %arg6[%c3, %c0_52, %c0_53] : memref<4x8x32xbf16, #tpu.memory_space<vmem>>, vector<1x8x32xbf16>
    %168 = vector.shape_cast %167 : vector<1x8x32xbf16> to vector<8x32xbf16>
    %cst_54 = arith.constant dense<0.000000e+00> : vector<16x32xf32>
    %169 = tpu.matmul %166, %168, %cst_54 {dimension_numbers = #tpu.dot_dimension_numbers<[1], [0], [0], [1], [0, 0, 1, 1], [], []>} : vector<16x8xbf16>, vector<8x32xbf16>, vector<16x32xf32> -> vector<16x32xf32>
    %170 = arith.addf %142, %169 : vector<16x32xf32>
    %c0_55 = arith.constant 0 : index
    %c0_56 = arith.constant 0 : index
    %171 = vector.load %arg7[%c0_55, %c0_56] : memref<1x32xf32, #tpu.memory_space<vmem>>, vector<1x32xf32>
    %172 = vector.broadcast %171 : vector<1x32xf32> to vector<16x32xf32>
    %173 = arith.addf %170, %172 : vector<16x32xf32>
    %174 = arith.addf %1, %173 : vector<16x32xf32>
    %c0_57 = arith.constant 0 : index
    %c0_58 = arith.constant 0 : index
    %175 = vector.load %arg8[%c0_57, %c0_58] : memref<1x32xf32, #tpu.memory_space<vmem>>, vector<1x32xf32>
    %c0_59 = arith.constant 0 : index
    %c0_60 = arith.constant 0 : index
    %176 = vector.load %arg9[%c0_59, %c0_60] : memref<1x32xf32, #tpu.memory_space<vmem>>, vector<1x32xf32>
    %cst_61 = arith.constant dense<0.000000e+00> : vector<16xf32>
    %177 = vector.multi_reduction <add>, %174, %cst_61 [1] : vector<16x32xf32> to vector<16xf32>
    %178 = vector.shape_cast %177 : vector<16xf32> to vector<16x1xf32>
    %cst_62 = arith.constant 3.200000e+01 : f32
    %179 = vector.broadcast %cst_62 : f32 to vector<16x1xf32>
    %180 = arith.divf %178, %179 : vector<16x1xf32>
    %181 = vector.broadcast %180 : vector<16x1xf32> to vector<16x32xf32>
    %182 = arith.subf %174, %181 : vector<16x32xf32>
    %183 = arith.mulf %182, %182 : vector<16x32xf32>
    %cst_63 = arith.constant dense<0.000000e+00> : vector<16xf32>
    %184 = vector.multi_reduction <add>, %183, %cst_63 [1] : vector<16x32xf32> to vector<16xf32>
    %185 = vector.shape_cast %184 : vector<16xf32> to vector<16x1xf32>
    %cst_64 = arith.constant 3.200000e+01 : f32
    %186 = vector.broadcast %cst_64 : f32 to vector<16x1xf32>
    %187 = arith.divf %185, %186 : vector<16x1xf32>
    %188 = vector.broadcast %180 : vector<16x1xf32> to vector<16x32xf32>
    %189 = arith.subf %174, %188 : vector<16x32xf32>
    %cst_65 = arith.constant 9.99999997E-7 : f32
    %190 = vector.broadcast %cst_65 : f32 to vector<16x1xf32>
    %191 = arith.addf %187, %190 : vector<16x1xf32>
    %192 = math.rsqrt %191 : vector<16x1xf32>
    %193 = vector.broadcast %192 : vector<16x1xf32> to vector<16x32xf32>
    %194 = arith.mulf %189, %193 : vector<16x32xf32>
    %195 = vector.broadcast %175 : vector<1x32xf32> to vector<16x32xf32>
    %196 = arith.mulf %194, %195 : vector<16x32xf32>
    %197 = vector.broadcast %176 : vector<1x32xf32> to vector<16x32xf32>
    %198 = arith.addf %196, %197 : vector<16x32xf32>
    %199 = arith.truncf %198 : vector<16x32xf32> to vector<16x32xbf16>
    %c0_66 = arith.constant 0 : index
    %c0_67 = arith.constant 0 : index
    %200 = vector.load %arg10[%c0_66, %c0_67] : memref<32x128xbf16, #tpu.memory_space<vmem>>, vector<32x128xbf16>
    %cst_68 = arith.constant dense<0.000000e+00> : vector<16x128xf32>
    %201 = tpu.matmul %199, %200, %cst_68 {dimension_numbers = #tpu.dot_dimension_numbers<[1], [0], [0], [1], [0, 0, 1, 1], [], []>} : vector<16x32xbf16>, vector<32x128xbf16>, vector<16x128xf32> -> vector<16x128xf32>
    %c0_69 = arith.constant 0 : index
    %c0_70 = arith.constant 0 : index
    %202 = vector.load %arg11[%c0_69, %c0_70] : memref<1x128xf32, #tpu.memory_space<vmem>>, vector<1x128xf32>
    %203 = vector.broadcast %202 : vector<1x128xf32> to vector<16x128xf32>
    %204 = arith.addf %201, %203 : vector<16x128xf32>
    %205 = arith.mulf %204, %204 : vector<16x128xf32>
    %206 = arith.mulf %204, %205 : vector<16x128xf32>
    %cst_71 = arith.constant 4.471500e-02 : f32
    %207 = vector.broadcast %cst_71 : f32 to vector<16x128xf32>
    %208 = arith.mulf %207, %206 : vector<16x128xf32>
    %209 = arith.addf %204, %208 : vector<16x128xf32>
    %cst_72 = arith.constant 0.797884583 : f32
    %210 = vector.broadcast %cst_72 : f32 to vector<16x128xf32>
    %211 = arith.mulf %210, %209 : vector<16x128xf32>
    %212 = math.tanh %211 : vector<16x128xf32>
    %cst_73 = arith.constant 1.000000e+00 : f32
    %213 = vector.broadcast %cst_73 : f32 to vector<16x128xf32>
    %214 = arith.addf %213, %212 : vector<16x128xf32>
    %cst_74 = arith.constant 5.000000e-01 : f32
    %215 = vector.broadcast %cst_74 : f32 to vector<16x128xf32>
    %216 = arith.mulf %215, %214 : vector<16x128xf32>
    %217 = arith.mulf %204, %216 : vector<16x128xf32>
    %218 = arith.truncf %217 : vector<16x128xf32> to vector<16x128xbf16>
    %c0_75 = arith.constant 0 : index
    %c0_76 = arith.constant 0 : index
    %219 = vector.load %arg12[%c0_75, %c0_76] : memref<128x32xbf16, #tpu.memory_space<vmem>>, vector<128x32xbf16>
    %cst_77 = arith.constant dense<0.000000e+00> : vector<16x32xf32>
    %220 = tpu.matmul %218, %219, %cst_77 {dimension_numbers = #tpu.dot_dimension_numbers<[1], [0], [0], [1], [0, 0, 1, 1], [], []>} : vector<16x128xbf16>, vector<128x32xbf16>, vector<16x32xf32> -> vector<16x32xf32>
    %c0_78 = arith.constant 0 : index
    %c0_79 = arith.constant 0 : index
    %221 = vector.load %arg13[%c0_78, %c0_79] : memref<1x32xf32, #tpu.memory_space<vmem>>, vector<1x32xf32>
    %222 = vector.broadcast %221 : vector<1x32xf32> to vector<16x32xf32>
    %223 = arith.addf %220, %222 : vector<16x32xf32>
    %224 = arith.addf %174, %223 : vector<16x32xf32>
    %c0_80 = arith.constant 0 : index
    %c0_81 = arith.constant 0 : index
    %225 = vector.load %arg14[%c0_80, %c0_81] : memref<1x32xf32, #tpu.memory_space<vmem>>, vector<1x32xf32>
    %c0_82 = arith.constant 0 : index
    %c0_83 = arith.constant 0 : index
    %226 = vector.load %arg15[%c0_82, %c0_83] : memref<1x32xf32, #tpu.memory_space<vmem>>, vector<1x32xf32>
    %cst_84 = arith.constant dense<0.000000e+00> : vector<16xf32>
    %227 = vector.multi_reduction <add>, %224, %cst_84 [1] : vector<16x32xf32> to vector<16xf32>
    %228 = vector.shape_cast %227 : vector<16xf32> to vector<16x1xf32>
    %cst_85 = arith.constant 3.200000e+01 : f32
    %229 = vector.broadcast %cst_85 : f32 to vector<16x1xf32>
    %230 = arith.divf %228, %229 : vector<16x1xf32>
    %231 = vector.broadcast %230 : vector<16x1xf32> to vector<16x32xf32>
    %232 = arith.subf %224, %231 : vector<16x32xf32>
    %233 = arith.mulf %232, %232 : vector<16x32xf32>
    %cst_86 = arith.constant dense<0.000000e+00> : vector<16xf32>
    %234 = vector.multi_reduction <add>, %233, %cst_86 [1] : vector<16x32xf32> to vector<16xf32>
    %235 = vector.shape_cast %234 : vector<16xf32> to vector<16x1xf32>
    %cst_87 = arith.constant 3.200000e+01 : f32
    %236 = vector.broadcast %cst_87 : f32 to vector<16x1xf32>
    %237 = arith.divf %235, %236 : vector<16x1xf32>
    %238 = vector.broadcast %230 : vector<16x1xf32> to vector<16x32xf32>
    %239 = arith.subf %224, %238 : vector<16x32xf32>
    %cst_88 = arith.constant 9.99999997E-7 : f32
    %240 = vector.broadcast %cst_88 : f32 to vector<16x1xf32>
    %241 = arith.addf %237, %240 : vector<16x1xf32>
    %242 = math.rsqrt %241 : vector<16x1xf32>
    %243 = vector.broadcast %242 : vector<16x1xf32> to vector<16x32xf32>
    %244 = arith.mulf %239, %243 : vector<16x32xf32>
    %245 = vector.broadcast %225 : vector<1x32xf32> to vector<16x32xf32>
    %246 = arith.mulf %244, %245 : vector<16x32xf32>
    %247 = vector.broadcast %226 : vector<1x32xf32> to vector<16x32xf32>
    %248 = arith.addf %246, %247 : vector<16x32xf32>
    %249 = vector.shape_cast %248 : vector<16x32xf32> to vector<2x8x32xf32>
    %c0_89 = arith.constant 0 : index
    %c0_90 = arith.constant 0 : index
    %c0_91 = arith.constant 0 : index
    %250 = vector.load %arg16[%c0_89, %c0_90, %c0_91] : memref<2x8x32xf32, #tpu.memory_space<vmem>>, vector<2x8x32xf32>
    tpu.vector_store %arg16[%c0_89, %c0_90, %c0_91], %249 {strides = array<i32>} : memref<2x8x32xf32, #tpu.memory_space<vmem>>, vector<2x8x32xf32>,
    return
  }
  func.func @transform_0(%arg0: i32) -> (i32, i32, i32) {
    %c0_i32 = arith.constant 0 : i32
    %c0_i32_0 = arith.constant 0 : i32
    %c0_i32_1 = arith.constant 0 : i32
    return %arg0, %c0_i32, %c0_i32_0 : i32, i32, i32
  }
  func.func @transform_1(%arg0: i32) -> (i32, i32) {
    %c0_i32 = arith.constant 0 : i32
    %c0_i32_0 = arith.constant 0 : i32
    %c0_i32_1 = arith.constant 0 : i32
    return %c0_i32, %c0_i32_0 : i32, i32
  }
  func.func @transform_2(%arg0: i32) -> (i32, i32) {
    %c0_i32 = arith.constant 0 : i32
    %c0_i32_0 = arith.constant 0 : i32
    %c0_i32_1 = arith.constant 0 : i32
    return %c0_i32, %c0_i32_0 : i32, i32
  }
  func.func @transform_3(%arg0: i32) -> (i32, i32) {
    %c0_i32 = arith.constant 0 : i32
    %c0_i32_0 = arith.constant 0 : i32
    %c0_i32_1 = arith.constant 0 : i32
    return %c0_i32, %c0_i32_0 : i32, i32
  }
  func.func @transform_4(%arg0: i32) -> (i32, i32) {
    %c0_i32 = arith.constant 0 : i32
    %c0_i32_0 = arith.constant 0 : i32
    %c0_i32_1 = arith.constant 0 : i32
    return %c0_i32, %c0_i32_0 : i32, i32
  }
  func.func @transform_5(%arg0: i32) -> (i32, i32, i32) {
    %c0_i32 = arith.constant 0 : i32
    %c0_i32_0 = arith.constant 0 : i32
    %c0_i32_1 = arith.constant 0 : i32
    %c0_i32_2 = arith.constant 0 : i32
    return %c0_i32, %c0_i32_0, %c0_i32_1 : i32, i32, i32
  }
  func.func @transform_6(%arg0: i32) -> (i32, i32) {
    %c0_i32 = arith.constant 0 : i32
    %c0_i32_0 = arith.constant 0 : i32
    %c0_i32_1 = arith.constant 0 : i32
    return %c0_i32, %c0_i32_0 : i32, i32
  }
  func.func @transform_7(%arg0: i32) -> (i32, i32) {
    %c0_i32 = arith.constant 0 : i32
    %c0_i32_0 = arith.constant 0 : i32
    %c0_i32_1 = arith.constant 0 : i32
    return %c0_i32, %c0_i32_0 : i32, i32
  }
  func.func @transform_8(%arg0: i32) -> (i32, i32) {
    %c0_i32 = arith.constant 0 : i32
    %c0_i32_0 = arith.constant 0 : i32
    %c0_i32_1 = arith.constant 0 : i32
    return %c0_i32, %c0_i32_0 : i32, i32
  }
  func.func @transform_9(%arg0: i32) -> (i32, i32) {
    %c0_i32 = arith.constant 0 : i32
    %c0_i32_0 = arith.constant 0 : i32
    %c0_i32_1 = arith.constant 0 : i32
    return %c0_i32, %c0_i32_0 : i32, i32
  }
  func.func @transform_10(%arg0: i32) -> (i32, i32) {
    %c0_i32 = arith.constant 0 : i32
    %c0_i32_0 = arith.constant 0 : i32
    %c0_i32_1 = arith.constant 0 : i32
    return %c0_i32, %c0_i32_0 : i32, i32
  }
  func.func @transform_11(%arg0: i32) -> (i32, i32) {
    %c0_i32 = arith.constant 0 : i32
    %c0_i32_0 = arith.constant 0 : i32
    %c0_i32_1 = arith.constant 0 : i32
    return %c0_i32, %c0_i32_0 : i32, i32
  }
  func.func @transform_12(%arg0: i32) -> (i32, i32) {
    %c0_i32 = arith.constant 0 : i32
    %c0_i32_0 = arith.constant 0 : i32
    %c0_i32_1 = arith.constant 0 : i32
    return %c0_i32, %c0_i32_0 : i32, i32
  }
  func.func @transform_13(%arg0: i32) -> (i32, i32) {
    %c0_i32 = arith.constant 0 : i32
    %c0_i32_0 = arith.constant 0 : i32
    %c0_i32_1 = arith.constant 0 : i32
    return %c0_i32, %c0_i32_0 : i32, i32
  }
  func.func @transform_14(%arg0: i32) -> (i32, i32) {
    %c0_i32 = arith.constant 0 : i32
    %c0_i32_0 = arith.constant 0 : i32
    %c0_i32_1 = arith.constant 0 : i32
    return %c0_i32, %c0_i32_0 : i32, i32
  }
  func.func @transform_15(%arg0: i32) -> (i32, i32, i32) {
    %c0_i32 = arith.constant 0 : i32
    %c0_i32_0 = arith.constant 0 : i32
    %c0_i32_1 = arith.constant 0 : i32
    return %arg0, %c0_i32, %c0_i32_0 : i32, i32, i32
  }
}

module attributes {stable_mosaic.version = 11 : i64} {
  func.func @_decoder_block_kernel(%arg0: i32, %arg1: memref<2x8x32xf32, #tpu.memory_space<vmem>>, %arg2: memref<2x8x32xf32, #tpu.memory_space<vmem>>, %arg3: memref<1x16x32xf32, #tpu.memory_space<vmem>>, %arg4: memref<1x32xf32, #tpu.memory_space<vmem>>, %arg5: memref<1x32xf32, #tpu.memory_space<vmem>>, %arg6: memref<32x96xbf16, #tpu.memory_space<vmem>>, %arg7: memref<1x96xf32, #tpu.memory_space<vmem>>, %arg8: memref<4x8x32xbf16, #tpu.memory_space<vmem>>, %arg9: memref<1x32xf32, #tpu.memory_space<vmem>>, %arg10: memref<1x32xf32, #tpu.memory_space<vmem>>, %arg11: memref<1x32xf32, #tpu.memory_space<vmem>>, %arg12: memref<32x128xbf16, #tpu.memory_space<vmem>>, %arg13: memref<1x128xf32, #tpu.memory_space<vmem>>, %arg14: memref<128x32xbf16, #tpu.memory_space<vmem>>, %arg15: memref<1x32xf32, #tpu.memory_space<vmem>>, %arg16: memref<2x16x32xf32, #tpu.memory_space<vmem>>) attributes {dimension_semantics = [#tpu.dimension_semantics<arbitrary>], iteration_bounds = array<i64: 1>, scalar_prefetch = 0 : i64, scratch_operands = 0 : i64, tpu.core_type = #tpu.core_type<tc>, window_params = [{transform_indices = @transform_0, window_bounds = array<i64: 2, 8, 32>}, {transform_indices = @transform_1, window_bounds = array<i64: 2, 8, 32>}, {pipeline_mode = #tpu.pipeline_mode<synchronous>, transform_indices = @transform_2, window_bounds = array<i64: 1, 16, 32>}, {pipeline_mode = #tpu.pipeline_mode<synchronous>, transform_indices = @transform_3, window_bounds = array<i64: 1, 32>}, {pipeline_mode = #tpu.pipeline_mode<synchronous>, transform_indices = @transform_4, window_bounds = array<i64: 1, 32>}, {pipeline_mode = #tpu.pipeline_mode<synchronous>, transform_indices = @transform_5, window_bounds = array<i64: 32, 96>}, {pipeline_mode = #tpu.pipeline_mode<synchronous>, transform_indices = @transform_6, window_bounds = array<i64: 1, 96>}, {pipeline_mode = #tpu.pipeline_mode<synchronous>, transform_indices = @transform_7, window_bounds = array<i64: 4, 8, 32>}, {pipeline_mode = #tpu.pipeline_mode<synchronous>, transform_indices = @transform_8, window_bounds = array<i64: 1, 32>}, {pipeline_mode = #tpu.pipeline_mode<synchronous>, transform_indices = @transform_9, window_bounds = array<i64: 1, 32>}, {pipeline_mode = #tpu.pipeline_mode<synchronous>, transform_indices = @transform_10, window_bounds = array<i64: 1, 32>}, {pipeline_mode = #tpu.pipeline_mode<synchronous>, transform_indices = @transform_11, window_bounds = array<i64: 32, 128>}, {pipeline_mode = #tpu.pipeline_mode<synchronous>, transform_indices = @transform_12, window_bounds = array<i64: 1, 128>}, {pipeline_mode = #tpu.pipeline_mode<synchronous>, transform_indices = @transform_13, window_bounds = array<i64: 128, 32>}, {pipeline_mode = #tpu.pipeline_mode<synchronous>, transform_indices = @transform_14, window_bounds = array<i64: 1, 32>}, {transform_indices = @transform_15, window_bounds = array<i64: 2, 16, 32>}]} {
    %c0 = arith.constant 0 : index
    %c0_0 = arith.constant 0 : index
    %c0_1 = arith.constant 0 : index
    %0 = vector.load %arg1[%c0, %c0_0, %c0_1] : memref<2x8x32xf32, #tpu.memory_space<vmem>>, vector<2x8x32xf32>
    %c0_2 = arith.constant 0 : index
    %c0_3 = arith.constant 0 : index
    %c0_4 = arith.constant 0 : index
    %1 = vector.load %arg2[%c0_2, %c0_3, %c0_4] : memref<2x8x32xf32, #tpu.memory_space<vmem>>, vector<2x8x32xf32>
    %2 = tpu.concatenate %0, %1 in 1 : vector<2x8x32xf32>, vector<2x8x32xf32> -> vector<2x16x32xf32>
    %c0_5 = arith.constant 0 : index
    %c0_6 = arith.constant 0 : index
    %c0_7 = arith.constant 0 : index
    %3 = vector.load %arg3[%c0_5, %c0_6, %c0_7] : memref<1x16x32xf32, #tpu.memory_space<vmem>>, vector<1x16x32xf32>
    %4 = vector.broadcast %3 : vector<1x16x32xf32> to vector<2x16x32xf32>
    %5 = arith.addf %2, %4 : vector<2x16x32xf32>
    %6 = vector.shape_cast %5 : vector<2x16x32xf32> to vector<32x32xf32>
    %7 = tpu.iota {dimensions = array<i32: 0>} : vector<32x32xi32>
    %8 = tpu.iota {dimensions = array<i32: 1>} : vector<32x32xi32>
    %c0_i32 = arith.constant 0 : i32
    %9 = vector.broadcast %c0_i32 : i32 to vector<32x32xi32>
    %10 = arith.cmpi sge, %7, %9 : vector<32x32xi32>
    %c16_i32 = arith.constant 16 : i32
    %11 = vector.broadcast %c16_i32 : i32 to vector<32x32xi32>
    %12 = arith.cmpi slt, %7, %11 : vector<32x32xi32>
    %13 = arith.andi %10, %12 : vector<32x32xi1>
    %c0_i32_8 = arith.constant 0 : i32
    %14 = vector.broadcast %c0_i32_8 : i32 to vector<32x32xi32>
    %15 = arith.cmpi sge, %8, %14 : vector<32x32xi32>
    %16 = arith.andi %13, %15 : vector<32x32xi1>
    %c16_i32_9 = arith.constant 16 : i32
    %17 = vector.broadcast %c16_i32_9 : i32 to vector<32x32xi32>
    %18 = arith.cmpi slt, %8, %17 : vector<32x32xi32>
    %19 = arith.andi %16, %18 : vector<32x32xi1>
    %c16_i32_10 = arith.constant 16 : i32
    %20 = vector.broadcast %c16_i32_10 : i32 to vector<32x32xi32>
    %21 = arith.cmpi sge, %7, %20 : vector<32x32xi32>
    %c32_i32 = arith.constant 32 : i32
    %22 = vector.broadcast %c32_i32 : i32 to vector<32x32xi32>
    %23 = arith.cmpi slt, %7, %22 : vector<32x32xi32>
    %24 = arith.andi %21, %23 : vector<32x32xi1>
    %c16_i32_11 = arith.constant 16 : i32
    %25 = vector.broadcast %c16_i32_11 : i32 to vector<32x32xi32>
    %26 = arith.cmpi sge, %8, %25 : vector<32x32xi32>
    %27 = arith.andi %24, %26 : vector<32x32xi1>
    %c32_i32_12 = arith.constant 32 : i32
    %28 = vector.broadcast %c32_i32_12 : i32 to vector<32x32xi32>
    %29 = arith.cmpi slt, %8, %28 : vector<32x32xi32>
    %30 = arith.andi %27, %29 : vector<32x32xi1>
    %31 = arith.ori %19, %30 : vector<32x32xi1>
    %32 = arith.cmpi sge, %7, %8 : vector<32x32xi32>
    %33 = arith.andi %31, %32 : vector<32x32xi1>
    %c0_13 = arith.constant 0 : index
    %c0_14 = arith.constant 0 : index
    %34 = vector.load %arg4[%c0_13, %c0_14] : memref<1x32xf32, #tpu.memory_space<vmem>>, vector<1x32xf32>
    %c0_15 = arith.constant 0 : index
    %c0_16 = arith.constant 0 : index
    %35 = vector.load %arg5[%c0_15, %c0_16] : memref<1x32xf32, #tpu.memory_space<vmem>>, vector<1x32xf32>
    %cst = arith.constant dense<0.000000e+00> : vector<32xf32>
    %36 = vector.multi_reduction <add>, %6, %cst [1] : vector<32x32xf32> to vector<32xf32>
    %37 = vector.shape_cast %36 : vector<32xf32> to vector<32x1xf32>
    %cst_17 = arith.constant 3.200000e+01 : f32
    %38 = vector.broadcast %cst_17 : f32 to vector<32x1xf32>
    %39 = arith.divf %37, %38 : vector<32x1xf32>
    %40 = vector.broadcast %39 : vector<32x1xf32> to vector<32x32xf32>
    %41 = arith.subf %6, %40 : vector<32x32xf32>
    %42 = arith.mulf %41, %41 : vector<32x32xf32>
    %cst_18 = arith.constant dense<0.000000e+00> : vector<32xf32>
    %43 = vector.multi_reduction <add>, %42, %cst_18 [1] : vector<32x32xf32> to vector<32xf32>
    %44 = vector.shape_cast %43 : vector<32xf32> to vector<32x1xf32>
    %cst_19 = arith.constant 3.200000e+01 : f32
    %45 = vector.broadcast %cst_19 : f32 to vector<32x1xf32>
    %46 = arith.divf %44, %45 : vector<32x1xf32>
    %47 = vector.broadcast %39 : vector<32x1xf32> to vector<32x32xf32>
    %48 = arith.subf %6, %47 : vector<32x32xf32>
    %cst_20 = arith.constant 9.99999997E-7 : f32
    %49 = vector.broadcast %cst_20 : f32 to vector<32x1xf32>
    %50 = arith.addf %46, %49 : vector<32x1xf32>
    %51 = math.rsqrt %50 : vector<32x1xf32>
    %52 = vector.broadcast %51 : vector<32x1xf32> to vector<32x32xf32>
    %53 = arith.mulf %48, %52 : vector<32x32xf32>
    %54 = vector.broadcast %34 : vector<1x32xf32> to vector<32x32xf32>
    %55 = arith.mulf %53, %54 : vector<32x32xf32>
    %56 = vector.broadcast %35 : vector<1x32xf32> to vector<32x32xf32>
    %57 = arith.addf %55, %56 : vector<32x32xf32>
    %58 = arith.truncf %57 : vector<32x32xf32> to vector<32x32xbf16>
    %c0_21 = arith.constant 0 : index
    %c0_22 = arith.constant 0 : index
    %59 = vector.load %arg6[%c0_21, %c0_22] : memref<32x96xbf16, #tpu.memory_space<vmem>>, vector<32x96xbf16>
    %cst_23 = arith.constant dense<0.000000e+00> : vector<32x96xf32>
    %60 = tpu.matmul %58, %59, %cst_23 {dimension_numbers = #tpu.dot_dimension_numbers<[1], [0], [0], [1], [0, 0, 1, 1], [], []>} : vector<32x32xbf16>, vector<32x96xbf16>, vector<32x96xf32> -> vector<32x96xf32>
    %c0_24 = arith.constant 0 : index
    %c0_25 = arith.constant 0 : index
    %61 = vector.load %arg7[%c0_24, %c0_25] : memref<1x96xf32, #tpu.memory_space<vmem>>, vector<1x96xf32>
    %62 = vector.broadcast %61 : vector<1x96xf32> to vector<32x96xf32>
    %63 = arith.addf %60, %62 : vector<32x96xf32>
    %64 = vector.extract_strided_slice %63 {offsets = [0, 0], sizes = [32, 32], strides = [1, 1]} : vector<32x96xf32> to vector<32x32xf32>
    %65 = vector.extract_strided_slice %63 {offsets = [0, 32], sizes = [32, 32], strides = [1, 1]} : vector<32x96xf32> to vector<32x32xf32>
    %66 = vector.extract_strided_slice %63 {offsets = [0, 64], sizes = [32, 32], strides = [1, 1]} : vector<32x96xf32> to vector<32x32xf32>
    %67 = vector.extract_strided_slice %64 {offsets = [0, 0], sizes = [32, 8], strides = [1, 1]} : vector<32x32xf32> to vector<32x8xf32>
    %68 = arith.truncf %67 : vector<32x8xf32> to vector<32x8xbf16>
    %69 = vector.extract_strided_slice %65 {offsets = [0, 0], sizes = [32, 8], strides = [1, 1]} : vector<32x32xf32> to vector<32x8xf32>
    %70 = arith.truncf %69 : vector<32x8xf32> to vector<32x8xbf16>
    %71 = vector.extract_strided_slice %66 {offsets = [0, 0], sizes = [32, 8], strides = [1, 1]} : vector<32x32xf32> to vector<32x8xf32>
    %72 = arith.truncf %71 : vector<32x8xf32> to vector<32x8xbf16>
    %cst_26 = arith.constant dense<0.000000e+00> : vector<32x32xf32>
    %73 = tpu.matmul %68, %70, %cst_26 {dimension_numbers = #tpu.dot_dimension_numbers<[1], [1], [0], [0], [0, 0, 1, 0], [], []>} : vector<32x8xbf16>, vector<32x8xbf16>, vector<32x32xf32> -> vector<32x32xf32>
    %cst_27 = arith.constant 0.353553385 : f32
    %74 = vector.broadcast %cst_27 : f32 to vector<32x32xf32>
    %75 = arith.mulf %73, %74 : vector<32x32xf32>
    %cst_28 = arith.constant -1.000000e+09 : f32
    %76 = vector.broadcast %cst_28 : f32 to vector<32x32xf32>
    %77 = arith.select %33, %75, %76 : vector<32x32xi1>, vector<32x32xf32>
    %cst_29 = arith.constant dense<0xFF800000> : vector<32xf32>
    %78 = vector.multi_reduction <maximumf>, %77, %cst_29 [1] : vector<32x32xf32> to vector<32xf32>
    %79 = vector.shape_cast %78 : vector<32xf32> to vector<32x1xf32>
    %80 = vector.broadcast %79 : vector<32x1xf32> to vector<32x32xf32>
    %81 = arith.subf %77, %80 : vector<32x32xf32>
    %82 = math.exp %81 : vector<32x32xf32>
    %cst_30 = arith.constant dense<0.000000e+00> : vector<32xf32>
    %83 = vector.multi_reduction <add>, %82, %cst_30 [1] : vector<32x32xf32> to vector<32xf32>
    %84 = vector.shape_cast %83 : vector<32xf32> to vector<32x1xf32>
    %85 = tpu.reciprocal %84 {approx = true} : vector<32x1xf32> -> vector<32x1xf32>
    %86 = vector.broadcast %85 : vector<32x1xf32> to vector<32x32xf32>
    %87 = arith.mulf %82, %86 : vector<32x32xf32>
    %88 = arith.truncf %87 : vector<32x32xf32> to vector<32x32xbf16>
    %cst_31 = arith.constant dense<0.000000e+00> : vector<32x8xf32>
    %89 = tpu.matmul %88, %72, %cst_31 {dimension_numbers = #tpu.dot_dimension_numbers<[1], [0], [0], [1], [0, 0, 1, 1], [], []>} : vector<32x32xbf16>, vector<32x8xbf16>, vector<32x8xf32> -> vector<32x8xf32>
    %90 = arith.truncf %89 : vector<32x8xf32> to vector<32x8xbf16>
    %c0_32 = arith.constant 0 : index
    %c0_33 = arith.constant 0 : index
    %c0_34 = arith.constant 0 : index
    %91 = vector.load %arg8[%c0_32, %c0_33, %c0_34] : memref<4x8x32xbf16, #tpu.memory_space<vmem>>, vector<1x8x32xbf16>
    %92 = vector.shape_cast %91 : vector<1x8x32xbf16> to vector<8x32xbf16>
    %cst_35 = arith.constant dense<0.000000e+00> : vector<32x32xf32>
    %93 = tpu.matmul %90, %92, %cst_35 {dimension_numbers = #tpu.dot_dimension_numbers<[1], [0], [0], [1], [0, 0, 1, 1], [], []>} : vector<32x8xbf16>, vector<8x32xbf16>, vector<32x32xf32> -> vector<32x32xf32>
    %94 = vector.extract_strided_slice %64 {offsets = [0, 8], sizes = [32, 8], strides = [1, 1]} : vector<32x32xf32> to vector<32x8xf32>
    %95 = arith.truncf %94 : vector<32x8xf32> to vector<32x8xbf16>
    %96 = vector.extract_strided_slice %65 {offsets = [0, 8], sizes = [32, 8], strides = [1, 1]} : vector<32x32xf32> to vector<32x8xf32>
    %97 = arith.truncf %96 : vector<32x8xf32> to vector<32x8xbf16>
    %98 = vector.extract_strided_slice %66 {offsets = [0, 8], sizes = [32, 8], strides = [1, 1]} : vector<32x32xf32> to vector<32x8xf32>
    %99 = arith.truncf %98 : vector<32x8xf32> to vector<32x8xbf16>
    %cst_36 = arith.constant dense<0.000000e+00> : vector<32x32xf32>
    %100 = tpu.matmul %95, %97, %cst_36 {dimension_numbers = #tpu.dot_dimension_numbers<[1], [1], [0], [0], [0, 0, 1, 0], [], []>} : vector<32x8xbf16>, vector<32x8xbf16>, vector<32x32xf32> -> vector<32x32xf32>
    %cst_37 = arith.constant 0.353553385 : f32
    %101 = vector.broadcast %cst_37 : f32 to vector<32x32xf32>
    %102 = arith.mulf %100, %101 : vector<32x32xf32>
    %cst_38 = arith.constant -1.000000e+09 : f32
    %103 = vector.broadcast %cst_38 : f32 to vector<32x32xf32>
    %104 = arith.select %33, %102, %103 : vector<32x32xi1>, vector<32x32xf32>
    %cst_39 = arith.constant dense<0xFF800000> : vector<32xf32>
    %105 = vector.multi_reduction <maximumf>, %104, %cst_39 [1] : vector<32x32xf32> to vector<32xf32>
    %106 = vector.shape_cast %105 : vector<32xf32> to vector<32x1xf32>
    %107 = vector.broadcast %106 : vector<32x1xf32> to vector<32x32xf32>
    %108 = arith.subf %104, %107 : vector<32x32xf32>
    %109 = math.exp %108 : vector<32x32xf32>
    %cst_40 = arith.constant dense<0.000000e+00> : vector<32xf32>
    %110 = vector.multi_reduction <add>, %109, %cst_40 [1] : vector<32x32xf32> to vector<32xf32>
    %111 = vector.shape_cast %110 : vector<32xf32> to vector<32x1xf32>
    %112 = tpu.reciprocal %111 {approx = true} : vector<32x1xf32> -> vector<32x1xf32>
    %113 = vector.broadcast %112 : vector<32x1xf32> to vector<32x32xf32>
    %114 = arith.mulf %109, %113 : vector<32x32xf32>
    %115 = arith.truncf %114 : vector<32x32xf32> to vector<32x32xbf16>
    %cst_41 = arith.constant dense<0.000000e+00> : vector<32x8xf32>
    %116 = tpu.matmul %115, %99, %cst_41 {dimension_numbers = #tpu.dot_dimension_numbers<[1], [0], [0], [1], [0, 0, 1, 1], [], []>} : vector<32x32xbf16>, vector<32x8xbf16>, vector<32x8xf32> -> vector<32x8xf32>
    %117 = arith.truncf %116 : vector<32x8xf32> to vector<32x8xbf16>
    %c1 = arith.constant 1 : index
    %c0_42 = arith.constant 0 : index
    %c0_43 = arith.constant 0 : index
    %118 = vector.load %arg8[%c1, %c0_42, %c0_43] : memref<4x8x32xbf16, #tpu.memory_space<vmem>>, vector<1x8x32xbf16>
    %119 = vector.shape_cast %118 : vector<1x8x32xbf16> to vector<8x32xbf16>
    %cst_44 = arith.constant dense<0.000000e+00> : vector<32x32xf32>
    %120 = tpu.matmul %117, %119, %cst_44 {dimension_numbers = #tpu.dot_dimension_numbers<[1], [0], [0], [1], [0, 0, 1, 1], [], []>} : vector<32x8xbf16>, vector<8x32xbf16>, vector<32x32xf32> -> vector<32x32xf32>
    %121 = arith.addf %93, %120 : vector<32x32xf32>
    %122 = vector.extract_strided_slice %64 {offsets = [0, 16], sizes = [32, 8], strides = [1, 1]} : vector<32x32xf32> to vector<32x8xf32>
    %123 = arith.truncf %122 : vector<32x8xf32> to vector<32x8xbf16>
    %124 = vector.extract_strided_slice %65 {offsets = [0, 16], sizes = [32, 8], strides = [1, 1]} : vector<32x32xf32> to vector<32x8xf32>
    %125 = arith.truncf %124 : vector<32x8xf32> to vector<32x8xbf16>
    %126 = vector.extract_strided_slice %66 {offsets = [0, 16], sizes = [32, 8], strides = [1, 1]} : vector<32x32xf32> to vector<32x8xf32>
    %127 = arith.truncf %126 : vector<32x8xf32> to vector<32x8xbf16>
    %cst_45 = arith.constant dense<0.000000e+00> : vector<32x32xf32>
    %128 = tpu.matmul %123, %125, %cst_45 {dimension_numbers = #tpu.dot_dimension_numbers<[1], [1], [0], [0], [0, 0, 1, 0], [], []>} : vector<32x8xbf16>, vector<32x8xbf16>, vector<32x32xf32> -> vector<32x32xf32>
    %cst_46 = arith.constant 0.353553385 : f32
    %129 = vector.broadcast %cst_46 : f32 to vector<32x32xf32>
    %130 = arith.mulf %128, %129 : vector<32x32xf32>
    %cst_47 = arith.constant -1.000000e+09 : f32
    %131 = vector.broadcast %cst_47 : f32 to vector<32x32xf32>
    %132 = arith.select %33, %130, %131 : vector<32x32xi1>, vector<32x32xf32>
    %cst_48 = arith.constant dense<0xFF800000> : vector<32xf32>
    %133 = vector.multi_reduction <maximumf>, %132, %cst_48 [1] : vector<32x32xf32> to vector<32xf32>
    %134 = vector.shape_cast %133 : vector<32xf32> to vector<32x1xf32>
    %135 = vector.broadcast %134 : vector<32x1xf32> to vector<32x32xf32>
    %136 = arith.subf %132, %135 : vector<32x32xf32>
    %137 = math.exp %136 : vector<32x32xf32>
    %cst_49 = arith.constant dense<0.000000e+00> : vector<32xf32>
    %138 = vector.multi_reduction <add>, %137, %cst_49 [1] : vector<32x32xf32> to vector<32xf32>
    %139 = vector.shape_cast %138 : vector<32xf32> to vector<32x1xf32>
    %140 = tpu.reciprocal %139 {approx = true} : vector<32x1xf32> -> vector<32x1xf32>
    %141 = vector.broadcast %140 : vector<32x1xf32> to vector<32x32xf32>
    %142 = arith.mulf %137, %141 : vector<32x32xf32>
    %143 = arith.truncf %142 : vector<32x32xf32> to vector<32x32xbf16>
    %cst_50 = arith.constant dense<0.000000e+00> : vector<32x8xf32>
    %144 = tpu.matmul %143, %127, %cst_50 {dimension_numbers = #tpu.dot_dimension_numbers<[1], [0], [0], [1], [0, 0, 1, 1], [], []>} : vector<32x32xbf16>, vector<32x8xbf16>, vector<32x8xf32> -> vector<32x8xf32>
    %145 = arith.truncf %144 : vector<32x8xf32> to vector<32x8xbf16>
    %c2 = arith.constant 2 : index
    %c0_51 = arith.constant 0 : index
    %c0_52 = arith.constant 0 : index
    %146 = vector.load %arg8[%c2, %c0_51, %c0_52] : memref<4x8x32xbf16, #tpu.memory_space<vmem>>, vector<1x8x32xbf16>
    %147 = vector.shape_cast %146 : vector<1x8x32xbf16> to vector<8x32xbf16>
    %cst_53 = arith.constant dense<0.000000e+00> : vector<32x32xf32>
    %148 = tpu.matmul %145, %147, %cst_53 {dimension_numbers = #tpu.dot_dimension_numbers<[1], [0], [0], [1], [0, 0, 1, 1], [], []>} : vector<32x8xbf16>, vector<8x32xbf16>, vector<32x32xf32> -> vector<32x32xf32>
    %149 = arith.addf %121, %148 : vector<32x32xf32>
    %150 = vector.extract_strided_slice %64 {offsets = [0, 24], sizes = [32, 8], strides = [1, 1]} : vector<32x32xf32> to vector<32x8xf32>
    %151 = arith.truncf %150 : vector<32x8xf32> to vector<32x8xbf16>
    %152 = vector.extract_strided_slice %65 {offsets = [0, 24], sizes = [32, 8], strides = [1, 1]} : vector<32x32xf32> to vector<32x8xf32>
    %153 = arith.truncf %152 : vector<32x8xf32> to vector<32x8xbf16>
    %154 = vector.extract_strided_slice %66 {offsets = [0, 24], sizes = [32, 8], strides = [1, 1]} : vector<32x32xf32> to vector<32x8xf32>
    %155 = arith.truncf %154 : vector<32x8xf32> to vector<32x8xbf16>
    %cst_54 = arith.constant dense<0.000000e+00> : vector<32x32xf32>
    %156 = tpu.matmul %151, %153, %cst_54 {dimension_numbers = #tpu.dot_dimension_numbers<[1], [1], [0], [0], [0, 0, 1, 0], [], []>} : vector<32x8xbf16>, vector<32x8xbf16>, vector<32x32xf32> -> vector<32x32xf32>
    %cst_55 = arith.constant 0.353553385 : f32
    %157 = vector.broadcast %cst_55 : f32 to vector<32x32xf32>
    %158 = arith.mulf %156, %157 : vector<32x32xf32>
    %cst_56 = arith.constant -1.000000e+09 : f32
    %159 = vector.broadcast %cst_56 : f32 to vector<32x32xf32>
    %160 = arith.select %33, %158, %159 : vector<32x32xi1>, vector<32x32xf32>
    %cst_57 = arith.constant dense<0xFF800000> : vector<32xf32>
    %161 = vector.multi_reduction <maximumf>, %160, %cst_57 [1] : vector<32x32xf32> to vector<32xf32>
    %162 = vector.shape_cast %161 : vector<32xf32> to vector<32x1xf32>
    %163 = vector.broadcast %162 : vector<32x1xf32> to vector<32x32xf32>
    %164 = arith.subf %160, %163 : vector<32x32xf32>
    %165 = math.exp %164 : vector<32x32xf32>
    %cst_58 = arith.constant dense<0.000000e+00> : vector<32xf32>
    %166 = vector.multi_reduction <add>, %165, %cst_58 [1] : vector<32x32xf32> to vector<32xf32>
    %167 = vector.shape_cast %166 : vector<32xf32> to vector<32x1xf32>
    %168 = tpu.reciprocal %167 {approx = true} : vector<32x1xf32> -> vector<32x1xf32>
    %169 = vector.broadcast %168 : vector<32x1xf32> to vector<32x32xf32>
    %170 = arith.mulf %165, %169 : vector<32x32xf32>
    %171 = arith.truncf %170 : vector<32x32xf32> to vector<32x32xbf16>
    %cst_59 = arith.constant dense<0.000000e+00> : vector<32x8xf32>
    %172 = tpu.matmul %171, %155, %cst_59 {dimension_numbers = #tpu.dot_dimension_numbers<[1], [0], [0], [1], [0, 0, 1, 1], [], []>} : vector<32x32xbf16>, vector<32x8xbf16>, vector<32x8xf32> -> vector<32x8xf32>
    %173 = arith.truncf %172 : vector<32x8xf32> to vector<32x8xbf16>
    %c3 = arith.constant 3 : index
    %c0_60 = arith.constant 0 : index
    %c0_61 = arith.constant 0 : index
    %174 = vector.load %arg8[%c3, %c0_60, %c0_61] : memref<4x8x32xbf16, #tpu.memory_space<vmem>>, vector<1x8x32xbf16>
    %175 = vector.shape_cast %174 : vector<1x8x32xbf16> to vector<8x32xbf16>
    %cst_62 = arith.constant dense<0.000000e+00> : vector<32x32xf32>
    %176 = tpu.matmul %173, %175, %cst_62 {dimension_numbers = #tpu.dot_dimension_numbers<[1], [0], [0], [1], [0, 0, 1, 1], [], []>} : vector<32x8xbf16>, vector<8x32xbf16>, vector<32x32xf32> -> vector<32x32xf32>
    %177 = arith.addf %149, %176 : vector<32x32xf32>
    %c0_63 = arith.constant 0 : index
    %c0_64 = arith.constant 0 : index
    %178 = vector.load %arg9[%c0_63, %c0_64] : memref<1x32xf32, #tpu.memory_space<vmem>>, vector<1x32xf32>
    %179 = vector.broadcast %178 : vector<1x32xf32> to vector<32x32xf32>
    %180 = arith.addf %177, %179 : vector<32x32xf32>
    %181 = arith.addf %6, %180 : vector<32x32xf32>
    %c0_65 = arith.constant 0 : index
    %c0_66 = arith.constant 0 : index
    %182 = vector.load %arg10[%c0_65, %c0_66] : memref<1x32xf32, #tpu.memory_space<vmem>>, vector<1x32xf32>
    %c0_67 = arith.constant 0 : index
    %c0_68 = arith.constant 0 : index
    %183 = vector.load %arg11[%c0_67, %c0_68] : memref<1x32xf32, #tpu.memory_space<vmem>>, vector<1x32xf32>
    %cst_69 = arith.constant dense<0.000000e+00> : vector<32xf32>
    %184 = vector.multi_reduction <add>, %181, %cst_69 [1] : vector<32x32xf32> to vector<32xf32>
    %185 = vector.shape_cast %184 : vector<32xf32> to vector<32x1xf32>
    %cst_70 = arith.constant 3.200000e+01 : f32
    %186 = vector.broadcast %cst_70 : f32 to vector<32x1xf32>
    %187 = arith.divf %185, %186 : vector<32x1xf32>
    %188 = vector.broadcast %187 : vector<32x1xf32> to vector<32x32xf32>
    %189 = arith.subf %181, %188 : vector<32x32xf32>
    %190 = arith.mulf %189, %189 : vector<32x32xf32>
    %cst_71 = arith.constant dense<0.000000e+00> : vector<32xf32>
    %191 = vector.multi_reduction <add>, %190, %cst_71 [1] : vector<32x32xf32> to vector<32xf32>
    %192 = vector.shape_cast %191 : vector<32xf32> to vector<32x1xf32>
    %cst_72 = arith.constant 3.200000e+01 : f32
    %193 = vector.broadcast %cst_72 : f32 to vector<32x1xf32>
    %194 = arith.divf %192, %193 : vector<32x1xf32>
    %195 = vector.broadcast %187 : vector<32x1xf32> to vector<32x32xf32>
    %196 = arith.subf %181, %195 : vector<32x32xf32>
    %cst_73 = arith.constant 9.99999997E-7 : f32
    %197 = vector.broadcast %cst_73 : f32 to vector<32x1xf32>
    %198 = arith.addf %194, %197 : vector<32x1xf32>
    %199 = math.rsqrt %198 : vector<32x1xf32>
    %200 = vector.broadcast %199 : vector<32x1xf32> to vector<32x32xf32>
    %201 = arith.mulf %196, %200 : vector<32x32xf32>
    %202 = vector.broadcast %182 : vector<1x32xf32> to vector<32x32xf32>
    %203 = arith.mulf %201, %202 : vector<32x32xf32>
    %204 = vector.broadcast %183 : vector<1x32xf32> to vector<32x32xf32>
    %205 = arith.addf %203, %204 : vector<32x32xf32>
    %206 = arith.truncf %205 : vector<32x32xf32> to vector<32x32xbf16>
    %c0_74 = arith.constant 0 : index
    %c0_75 = arith.constant 0 : index
    %207 = vector.load %arg12[%c0_74, %c0_75] : memref<32x128xbf16, #tpu.memory_space<vmem>>, vector<32x128xbf16>
    %cst_76 = arith.constant dense<0.000000e+00> : vector<32x128xf32>
    %208 = tpu.matmul %206, %207, %cst_76 {dimension_numbers = #tpu.dot_dimension_numbers<[1], [0], [0], [1], [0, 0, 1, 1], [], []>} : vector<32x32xbf16>, vector<32x128xbf16>, vector<32x128xf32> -> vector<32x128xf32>
    %c0_77 = arith.constant 0 : index
    %c0_78 = arith.constant 0 : index
    %209 = vector.load %arg13[%c0_77, %c0_78] : memref<1x128xf32, #tpu.memory_space<vmem>>, vector<1x128xf32>
    %210 = vector.broadcast %209 : vector<1x128xf32> to vector<32x128xf32>
    %211 = arith.addf %208, %210 : vector<32x128xf32>
    %212 = arith.mulf %211, %211 : vector<32x128xf32>
    %213 = arith.mulf %211, %212 : vector<32x128xf32>
    %cst_79 = arith.constant 4.471500e-02 : f32
    %214 = vector.broadcast %cst_79 : f32 to vector<32x128xf32>
    %215 = arith.mulf %214, %213 : vector<32x128xf32>
    %216 = arith.addf %211, %215 : vector<32x128xf32>
    %cst_80 = arith.constant 0.797884583 : f32
    %217 = vector.broadcast %cst_80 : f32 to vector<32x128xf32>
    %218 = arith.mulf %217, %216 : vector<32x128xf32>
    %219 = math.tanh %218 : vector<32x128xf32>
    %cst_81 = arith.constant 1.000000e+00 : f32
    %220 = vector.broadcast %cst_81 : f32 to vector<32x128xf32>
    %221 = arith.addf %220, %219 : vector<32x128xf32>
    %cst_82 = arith.constant 5.000000e-01 : f32
    %222 = vector.broadcast %cst_82 : f32 to vector<32x128xf32>
    %223 = arith.mulf %222, %221 : vector<32x128xf32>
    %224 = arith.mulf %211, %223 : vector<32x128xf32>
    %225 = arith.truncf %224 : vector<32x128xf32> to vector<32x128xbf16>
    %c0_83 = arith.constant 0 : index
    %c0_84 = arith.constant 0 : index
    %226 = vector.load %arg14[%c0_83, %c0_84] : memref<128x32xbf16, #tpu.memory_space<vmem>>, vector<128x32xbf16>
    %cst_85 = arith.constant dense<0.000000e+00> : vector<32x32xf32>
    %227 = tpu.matmul %225, %226, %cst_85 {dimension_numbers = #tpu.dot_dimension_numbers<[1], [0], [0], [1], [0, 0, 1, 1], [], []>} : vector<32x128xbf16>, vector<128x32xbf16>, vector<32x32xf32> -> vector<32x32xf32>
    %c0_86 = arith.constant 0 : index
    %c0_87 = arith.constant 0 : index
    %228 = vector.load %arg15[%c0_86, %c0_87] : memref<1x32xf32, #tpu.memory_space<vmem>>, vector<1x32xf32>
    %229 = vector.broadcast %228 : vector<1x32xf32> to vector<32x32xf32>
    %230 = arith.addf %227, %229 : vector<32x32xf32>
    %231 = arith.addf %181, %230 : vector<32x32xf32>
    %232 = vector.shape_cast %231 : vector<32x32xf32> to vector<2x16x32xf32>
    %c0_88 = arith.constant 0 : index
    %c0_89 = arith.constant 0 : index
    %c0_90 = arith.constant 0 : index
    %233 = vector.load %arg16[%c0_88, %c0_89, %c0_90] : memref<2x16x32xf32, #tpu.memory_space<vmem>>, vector<2x16x32xf32>
    tpu.vector_store %arg16[%c0_88, %c0_89, %c0_90], %232 {strides = array<i32>} : memref<2x16x32xf32, #tpu.memory_space<vmem>>, vector<2x16x32xf32>,
    return
  }
  func.func @transform_0(%arg0: i32) -> (i32, i32, i32) {
    %c0_i32 = arith.constant 0 : i32
    %c0_i32_0 = arith.constant 0 : i32
    %c0_i32_1 = arith.constant 0 : i32
    return %arg0, %c0_i32, %c0_i32_0 : i32, i32, i32
  }
  func.func @transform_1(%arg0: i32) -> (i32, i32, i32) {
    %c0_i32 = arith.constant 0 : i32
    %c0_i32_0 = arith.constant 0 : i32
    %c0_i32_1 = arith.constant 0 : i32
    return %arg0, %c0_i32, %c0_i32_0 : i32, i32, i32
  }
  func.func @transform_2(%arg0: i32) -> (i32, i32, i32) {
    %c0_i32 = arith.constant 0 : i32
    %c0_i32_0 = arith.constant 0 : i32
    %c0_i32_1 = arith.constant 0 : i32
    %c0_i32_2 = arith.constant 0 : i32
    return %c0_i32, %c0_i32_0, %c0_i32_1 : i32, i32, i32
  }
  func.func @transform_3(%arg0: i32) -> (i32, i32) {
    %c0_i32 = arith.constant 0 : i32
    %c0_i32_0 = arith.constant 0 : i32
    %c0_i32_1 = arith.constant 0 : i32
    return %c0_i32, %c0_i32_0 : i32, i32
  }
  func.func @transform_4(%arg0: i32) -> (i32, i32) {
    %c0_i32 = arith.constant 0 : i32
    %c0_i32_0 = arith.constant 0 : i32
    %c0_i32_1 = arith.constant 0 : i32
    return %c0_i32, %c0_i32_0 : i32, i32
  }
  func.func @transform_5(%arg0: i32) -> (i32, i32) {
    %c0_i32 = arith.constant 0 : i32
    %c0_i32_0 = arith.constant 0 : i32
    %c0_i32_1 = arith.constant 0 : i32
    return %c0_i32, %c0_i32_0 : i32, i32
  }
  func.func @transform_6(%arg0: i32) -> (i32, i32) {
    %c0_i32 = arith.constant 0 : i32
    %c0_i32_0 = arith.constant 0 : i32
    %c0_i32_1 = arith.constant 0 : i32
    return %c0_i32, %c0_i32_0 : i32, i32
  }
  func.func @transform_7(%arg0: i32) -> (i32, i32, i32) {
    %c0_i32 = arith.constant 0 : i32
    %c0_i32_0 = arith.constant 0 : i32
    %c0_i32_1 = arith.constant 0 : i32
    %c0_i32_2 = arith.constant 0 : i32
    return %c0_i32, %c0_i32_0, %c0_i32_1 : i32, i32, i32
  }
  func.func @transform_8(%arg0: i32) -> (i32, i32) {
    %c0_i32 = arith.constant 0 : i32
    %c0_i32_0 = arith.constant 0 : i32
    %c0_i32_1 = arith.constant 0 : i32
    return %c0_i32, %c0_i32_0 : i32, i32
  }
  func.func @transform_9(%arg0: i32) -> (i32, i32) {
    %c0_i32 = arith.constant 0 : i32
    %c0_i32_0 = arith.constant 0 : i32
    %c0_i32_1 = arith.constant 0 : i32
    return %c0_i32, %c0_i32_0 : i32, i32
  }
  func.func @transform_10(%arg0: i32) -> (i32, i32) {
    %c0_i32 = arith.constant 0 : i32
    %c0_i32_0 = arith.constant 0 : i32
    %c0_i32_1 = arith.constant 0 : i32
    return %c0_i32, %c0_i32_0 : i32, i32
  }
  func.func @transform_11(%arg0: i32) -> (i32, i32) {
    %c0_i32 = arith.constant 0 : i32
    %c0_i32_0 = arith.constant 0 : i32
    %c0_i32_1 = arith.constant 0 : i32
    return %c0_i32, %c0_i32_0 : i32, i32
  }
  func.func @transform_12(%arg0: i32) -> (i32, i32) {
    %c0_i32 = arith.constant 0 : i32
    %c0_i32_0 = arith.constant 0 : i32
    %c0_i32_1 = arith.constant 0 : i32
    return %c0_i32, %c0_i32_0 : i32, i32
  }
  func.func @transform_13(%arg0: i32) -> (i32, i32) {
    %c0_i32 = arith.constant 0 : i32
    %c0_i32_0 = arith.constant 0 : i32
    %c0_i32_1 = arith.constant 0 : i32
    return %c0_i32, %c0_i32_0 : i32, i32
  }
  func.func @transform_14(%arg0: i32) -> (i32, i32) {
    %c0_i32 = arith.constant 0 : i32
    %c0_i32_0 = arith.constant 0 : i32
    %c0_i32_1 = arith.constant 0 : i32
    return %c0_i32, %c0_i32_0 : i32, i32
  }
  func.func @transform_15(%arg0: i32) -> (i32, i32, i32) {
    %c0_i32 = arith.constant 0 : i32
    %c0_i32_0 = arith.constant 0 : i32
    %c0_i32_1 = arith.constant 0 : i32
    return %arg0, %c0_i32, %c0_i32_0 : i32, i32, i32
  }
}

module attributes {stable_mosaic.version = 11 : i64} {
  func.func @_lmhead_ce_kernel(%arg0: i32, %arg1: memref<32x32xf32, #tpu.memory_space<vmem>>, %arg2: memref<1x32xf32, #tpu.memory_space<vmem>>, %arg3: memref<1x32xf32, #tpu.memory_space<vmem>>, %arg4: memref<64x32xbf16, #tpu.memory_space<vmem>>, %arg5: memref<32x1xi32, #tpu.memory_space<vmem>>, %arg6: memref<32x1xf32, #tpu.memory_space<vmem>>, %arg7: memref<1x1xf32, #tpu.memory_space<smem>>, %arg8: memref<32x32xf32, #tpu.memory_space<vmem>>, %arg9: memref<32x1xf32, #tpu.memory_space<vmem>>, %arg10: memref<32x1xf32, #tpu.memory_space<vmem>>, %arg11: memref<32x1xf32, #tpu.memory_space<vmem>>) attributes {dimension_semantics = [#tpu.dimension_semantics<arbitrary>], iteration_bounds = array<i64: 2>, scalar_prefetch = 0 : i64, scratch_operands = 4 : i64, tpu.core_type = #tpu.core_type<tc>, window_params = [{pipeline_mode = #tpu.pipeline_mode<synchronous>, transform_indices = @transform_0, window_bounds = array<i64: 32, 32>}, {pipeline_mode = #tpu.pipeline_mode<synchronous>, transform_indices = @transform_1, window_bounds = array<i64: 1, 32>}, {pipeline_mode = #tpu.pipeline_mode<synchronous>, transform_indices = @transform_2, window_bounds = array<i64: 1, 32>}, {transform_indices = @transform_3, window_bounds = array<i64: 64, 32>}, {pipeline_mode = #tpu.pipeline_mode<synchronous>, transform_indices = @transform_4, window_bounds = array<i64: 32, 1>}, {pipeline_mode = #tpu.pipeline_mode<synchronous>, transform_indices = @transform_5, window_bounds = array<i64: 32, 1>}, {transform_indices = @transform_6, window_bounds = array<i64: 1, 1>}]} {
    %c0_i32 = arith.constant 0 : i32
    %0 = arith.cmpi eq, %arg0, %c0_i32 : i32
    %1 = arith.extui %0 : i1 to i32
    %c0_i32_0 = arith.constant 0 : i32
    %2 = arith.cmpi ne, %1, %c0_i32_0 : i32
    scf.if %2 {
      %c0_23 = arith.constant 0 : index
      %c0_24 = arith.constant 0 : index
      %40 = vector.load %arg1[%c0_23, %c0_24] : memref<32x32xf32, #tpu.memory_space<vmem>>, vector<32x32xf32>
      %c0_25 = arith.constant 0 : index
      %c0_26 = arith.constant 0 : index
      %41 = vector.load %arg2[%c0_25, %c0_26] : memref<1x32xf32, #tpu.memory_space<vmem>>, vector<1x32xf32>
      %c0_27 = arith.constant 0 : index
      %c0_28 = arith.constant 0 : index
      %42 = vector.load %arg3[%c0_27, %c0_28] : memref<1x32xf32, #tpu.memory_space<vmem>>, vector<1x32xf32>
      %cst_29 = arith.constant dense<0.000000e+00> : vector<32xf32>
      %43 = vector.multi_reduction <add>, %40, %cst_29 [1] : vector<32x32xf32> to vector<32xf32>
      %44 = vector.shape_cast %43 : vector<32xf32> to vector<32x1xf32>
      %cst_30 = arith.constant 3.200000e+01 : f32
      %45 = vector.broadcast %cst_30 : f32 to vector<32x1xf32>
      %46 = arith.divf %44, %45 : vector<32x1xf32>
      %47 = vector.broadcast %46 : vector<32x1xf32> to vector<32x32xf32>
      %48 = arith.subf %40, %47 : vector<32x32xf32>
      %49 = arith.mulf %48, %48 : vector<32x32xf32>
      %cst_31 = arith.constant dense<0.000000e+00> : vector<32xf32>
      %50 = vector.multi_reduction <add>, %49, %cst_31 [1] : vector<32x32xf32> to vector<32xf32>
      %51 = vector.shape_cast %50 : vector<32xf32> to vector<32x1xf32>
      %cst_32 = arith.constant 3.200000e+01 : f32
      %52 = vector.broadcast %cst_32 : f32 to vector<32x1xf32>
      %53 = arith.divf %51, %52 : vector<32x1xf32>
      %54 = vector.broadcast %46 : vector<32x1xf32> to vector<32x32xf32>
      %55 = arith.subf %40, %54 : vector<32x32xf32>
      %cst_33 = arith.constant 9.99999997E-7 : f32
      %56 = vector.broadcast %cst_33 : f32 to vector<32x1xf32>
      %57 = arith.addf %53, %56 : vector<32x1xf32>
      %58 = math.rsqrt %57 : vector<32x1xf32>
      %59 = vector.broadcast %58 : vector<32x1xf32> to vector<32x32xf32>
      %60 = arith.mulf %55, %59 : vector<32x32xf32>
      %61 = vector.broadcast %41 : vector<1x32xf32> to vector<32x32xf32>
      %62 = arith.mulf %60, %61 : vector<32x32xf32>
      %63 = vector.broadcast %42 : vector<1x32xf32> to vector<32x32xf32>
      %64 = arith.addf %62, %63 : vector<32x32xf32>
      %c0_34 = arith.constant 0 : index
      %c0_35 = arith.constant 0 : index
      %65 = vector.load %arg8[%c0_34, %c0_35] : memref<32x32xf32, #tpu.memory_space<vmem>>, vector<32x32xf32>
      tpu.vector_store %arg8[%c0_34, %c0_35], %64 {strides = array<i32>} : memref<32x32xf32, #tpu.memory_space<vmem>>, vector<32x32xf32>,
      %cst_36 = arith.constant -1.000000e+30 : f32
      %66 = vector.broadcast %cst_36 : f32 to vector<32x1xf32>
      %c0_37 = arith.constant 0 : index
      %c0_38 = arith.constant 0 : index
      %67 = vector.load %arg9[%c0_37, %c0_38] : memref<32x1xf32, #tpu.memory_space<vmem>>, vector<32x1xf32>
      tpu.vector_store %arg9[%c0_37, %c0_38], %66 {strides = array<i32>} : memref<32x1xf32, #tpu.memory_space<vmem>>, vector<32x1xf32>,
      %cst_39 = arith.constant 0.000000e+00 : f32
      %68 = vector.broadcast %cst_39 : f32 to vector<32x1xf32>
      %c0_40 = arith.constant 0 : index
      %c0_41 = arith.constant 0 : index
      %69 = vector.load %arg10[%c0_40, %c0_41] : memref<32x1xf32, #tpu.memory_space<vmem>>, vector<32x1xf32>
      tpu.vector_store %arg10[%c0_40, %c0_41], %68 {strides = array<i32>} : memref<32x1xf32, #tpu.memory_space<vmem>>, vector<32x1xf32>,
      %cst_42 = arith.constant 0.000000e+00 : f32
      %70 = vector.broadcast %cst_42 : f32 to vector<32x1xf32>
      %c0_43 = arith.constant 0 : index
      %c0_44 = arith.constant 0 : index
      %71 = vector.load %arg11[%c0_43, %c0_44] : memref<32x1xf32, #tpu.memory_space<vmem>>, vector<32x1xf32>
      tpu.vector_store %arg11[%c0_43, %c0_44], %70 {strides = array<i32>} : memref<32x1xf32, #tpu.memory_space<vmem>>, vector<32x1xf32>,
    } else {
    }
    %c0 = arith.constant 0 : index
    %c0_1 = arith.constant 0 : index
    %3 = vector.load %arg8[%c0, %c0_1] : memref<32x32xf32, #tpu.memory_space<vmem>>, vector<32x32xf32>
    %4 = arith.truncf %3 : vector<32x32xf32> to vector<32x32xbf16>
    %c0_2 = arith.constant 0 : index
    %c0_3 = arith.constant 0 : index
    %5 = vector.load %arg4[%c0_2, %c0_3] : memref<64x32xbf16, #tpu.memory_space<vmem>>, vector<64x32xbf16>
    %cst = arith.constant dense<0.000000e+00> : vector<32x64xf32>
    %6 = tpu.matmul %4, %5, %cst {dimension_numbers = #tpu.dot_dimension_numbers<[1], [1], [0], [0], [0, 0, 1, 0], [], []>} : vector<32x32xbf16>, vector<64x32xbf16>, vector<32x64xf32> -> vector<32x64xf32>
    %c0_4 = arith.constant 0 : index
    %c0_5 = arith.constant 0 : index
    %7 = vector.load %arg9[%c0_4, %c0_5] : memref<32x1xf32, #tpu.memory_space<vmem>>, vector<32x1xf32>
    %cst_6 = arith.constant dense<0xFF800000> : vector<32xf32>
    %8 = vector.multi_reduction <maximumf>, %6, %cst_6 [1] : vector<32x64xf32> to vector<32xf32>
    %9 = vector.shape_cast %8 : vector<32xf32> to vector<32x1xf32>
    %10 = arith.maximumf %7, %9 : vector<32x1xf32>
    %c0_7 = arith.constant 0 : index
    %c0_8 = arith.constant 0 : index
    %11 = vector.load %arg10[%c0_7, %c0_8] : memref<32x1xf32, #tpu.memory_space<vmem>>, vector<32x1xf32>
    %12 = arith.subf %7, %10 : vector<32x1xf32>
    %13 = math.exp %12 : vector<32x1xf32>
    %14 = arith.mulf %11, %13 : vector<32x1xf32>
    %15 = vector.broadcast %10 : vector<32x1xf32> to vector<32x64xf32>
    %16 = arith.subf %6, %15 : vector<32x64xf32>
    %17 = math.exp %16 : vector<32x64xf32>
    %cst_9 = arith.constant dense<0.000000e+00> : vector<32xf32>
    %18 = vector.multi_reduction <add>, %17, %cst_9 [1] : vector<32x64xf32> to vector<32xf32>
    %19 = vector.shape_cast %18 : vector<32xf32> to vector<32x1xf32>
    %20 = arith.addf %14, %19 : vector<32x1xf32>
    %c0_10 = arith.constant 0 : index
    %c0_11 = arith.constant 0 : index
    %21 = vector.load %arg10[%c0_10, %c0_11] : memref<32x1xf32, #tpu.memory_space<vmem>>, vector<32x1xf32>
    tpu.vector_store %arg10[%c0_10, %c0_11], %20 {strides = array<i32>} : memref<32x1xf32, #tpu.memory_space<vmem>>, vector<32x1xf32>,
    %c0_12 = arith.constant 0 : index
    %c0_13 = arith.constant 0 : index
    %22 = vector.load %arg9[%c0_12, %c0_13] : memref<32x1xf32, #tpu.memory_space<vmem>>, vector<32x1xf32>
    tpu.vector_store %arg9[%c0_12, %c0_13], %10 {strides = array<i32>} : memref<32x1xf32, #tpu.memory_space<vmem>>, vector<32x1xf32>,
    %c64_i32 = arith.constant 64 : i32
    %23 = arith.muli %arg0, %c64_i32 : i32
    %24 = tpu.iota {dimensions = array<i32: 1>} : vector<32x64xi32>
    %25 = vector.broadcast %23 : i32 to vector<32x64xi32>
    %26 = arith.addi %25, %24 : vector<32x64xi32>
    %c0_14 = arith.constant 0 : index
    %c0_15 = arith.constant 0 : index
    %27 = vector.load %arg11[%c0_14, %c0_15] : memref<32x1xf32, #tpu.memory_space<vmem>>, vector<32x1xf32>
    %c0_16 = arith.constant 0 : index
    %c0_17 = arith.constant 0 : index
    %28 = vector.load %arg5[%c0_16, %c0_17] : memref<32x1xi32, #tpu.memory_space<vmem>>, vector<32x1xi32>
    %29 = vector.broadcast %28 : vector<32x1xi32> to vector<32x64xi32>
    %30 = arith.cmpi eq, %26, %29 : vector<32x64xi32>
    %cst_18 = arith.constant 0.000000e+00 : f32
    %31 = vector.broadcast %cst_18 : f32 to vector<32x64xf32>
    %32 = arith.select %30, %6, %31 : vector<32x64xi1>, vector<32x64xf32>
    %cst_19 = arith.constant dense<0.000000e+00> : vector<32xf32>
    %33 = vector.multi_reduction <add>, %32, %cst_19 [1] : vector<32x64xf32> to vector<32xf32>
    %34 = vector.shape_cast %33 : vector<32xf32> to vector<32x1xf32>
    %35 = arith.addf %27, %34 : vector<32x1xf32>
    %c0_20 = arith.constant 0 : index
    %c0_21 = arith.constant 0 : index
    %36 = vector.load %arg11[%c0_20, %c0_21] : memref<32x1xf32, #tpu.memory_space<vmem>>, vector<32x1xf32>
    tpu.vector_store %arg11[%c0_20, %c0_21], %35 {strides = array<i32>} : memref<32x1xf32, #tpu.memory_space<vmem>>, vector<32x1xf32>,
    %c1_i32 = arith.constant 1 : i32
    %37 = arith.cmpi eq, %arg0, %c1_i32 : i32
    %38 = arith.extui %37 : i1 to i32
    %c0_i32_22 = arith.constant 0 : i32
    %39 = arith.cmpi ne, %38, %c0_i32_22 : i32
    scf.if %39 {
      %c0_23 = arith.constant 0 : index
      %c0_24 = arith.constant 0 : index
      %40 = vector.load %arg9[%c0_23, %c0_24] : memref<32x1xf32, #tpu.memory_space<vmem>>, vector<32x1xf32>
      %c0_25 = arith.constant 0 : index
      %c0_26 = arith.constant 0 : index
      %41 = vector.load %arg10[%c0_25, %c0_26] : memref<32x1xf32, #tpu.memory_space<vmem>>, vector<32x1xf32>
      %42 = math.log %41 : vector<32x1xf32>
      %43 = arith.addf %40, %42 : vector<32x1xf32>
      %c0_27 = arith.constant 0 : index
      %c0_28 = arith.constant 0 : index
      %44 = vector.load %arg11[%c0_27, %c0_28] : memref<32x1xf32, #tpu.memory_space<vmem>>, vector<32x1xf32>
      %45 = arith.subf %43, %44 : vector<32x1xf32>
      %c0_29 = arith.constant 0 : index
      %c0_30 = arith.constant 0 : index
      %46 = vector.load %arg6[%c0_29, %c0_30] : memref<32x1xf32, #tpu.memory_space<vmem>>, vector<32x1xf32>
      %47 = arith.mulf %45, %46 : vector<32x1xf32>
      %48 = vector.shape_cast %47 : vector<32x1xf32> to vector<1x32x1xf32>
      %cst_31 = arith.constant dense<0.000000e+00> : vector<1xf32>
      %49 = vector.multi_reduction <add>, %48, %cst_31 [1, 2] : vector<1x32x1xf32> to vector<1xf32>
      %50 = vector.shape_cast %49 : vector<1xf32> to vector<1x1x1xf32>
      %51 = vector.extract %50[0, 0, 0] : f32 from vector<1x1x1xf32>
      %52 = vector.shape_cast %46 : vector<32x1xf32> to vector<1x32x1xf32>
      %cst_32 = arith.constant dense<0.000000e+00> : vector<1xf32>
      %53 = vector.multi_reduction <add>, %52, %cst_32 [1, 2] : vector<1x32x1xf32> to vector<1xf32>
      %54 = vector.shape_cast %53 : vector<1xf32> to vector<1x1x1xf32>
      %55 = vector.extract %54[0, 0, 0] : f32 from vector<1x1x1xf32>
      %cst_33 = arith.constant 1.000000e+00 : f32
      %56 = arith.maximumf %55, %cst_33 : f32
      %57 = arith.divf %51, %56 : f32
      %c0_34 = arith.constant 0 : index
      %c0_35 = arith.constant 0 : index
      %58 = memref.load %arg7[%c0_34, %c0_35] : memref<1x1xf32, #tpu.memory_space<smem>>
      memref.store %57, %arg7[%c0_34, %c0_35] : memref<1x1xf32, #tpu.memory_space<smem>>
    } else {
    }
    return
  }
  func.func @transform_0(%arg0: i32) -> (i32, i32) {
    %c0_i32 = arith.constant 0 : i32
    %c0_i32_0 = arith.constant 0 : i32
    %c0_i32_1 = arith.constant 0 : i32
    return %c0_i32, %c0_i32_0 : i32, i32
  }
  func.func @transform_1(%arg0: i32) -> (i32, i32) {
    %c0_i32 = arith.constant 0 : i32
    %c0_i32_0 = arith.constant 0 : i32
    %c0_i32_1 = arith.constant 0 : i32
    return %c0_i32, %c0_i32_0 : i32, i32
  }
  func.func @transform_2(%arg0: i32) -> (i32, i32) {
    %c0_i32 = arith.constant 0 : i32
    %c0_i32_0 = arith.constant 0 : i32
    %c0_i32_1 = arith.constant 0 : i32
    return %c0_i32, %c0_i32_0 : i32, i32
  }
  func.func @transform_3(%arg0: i32) -> (i32, i32) {
    %c0_i32 = arith.constant 0 : i32
    %c0_i32_0 = arith.constant 0 : i32
    return %arg0, %c0_i32 : i32, i32
  }
  func.func @transform_4(%arg0: i32) -> (i32, i32) {
    %c0_i32 = arith.constant 0 : i32
    %c0_i32_0 = arith.constant 0 : i32
    %c0_i32_1 = arith.constant 0 : i32
    return %c0_i32, %c0_i32_0 : i32, i32
  }
  func.func @transform_5(%arg0: i32) -> (i32, i32) {
    %c0_i32 = arith.constant 0 : i32
    %c0_i32_0 = arith.constant 0 : i32
    %c0_i32_1 = arith.constant 0 : i32
    return %c0_i32, %c0_i32_0 : i32, i32
  }
  func.func @transform_6(%arg0: i32) -> (i32, i32) {
    %c0_i32 = arith.constant 0 : i32
    %c0_i32_0 = arith.constant 0 : i32
    %c0_i32_1 = arith.constant 0 : i32
    return %c0_i32, %c0_i32_0 : i32, i32
  }
}

</mosaic_0001>

<bundles_post_ra>
// kernel: distributed_gpt3_pretrain_forward.4
= control target key start
LH: loop header
LB: loop body
LE: loop exit
PB: predicated region body
PF: predicated region fallthrough
CT: control target
= control target key end

     0   :  { %vm86_vm0 = vcmask 261120   ;;  %v1469_v15 = vmov 0.0   ;;  %vm1470_vm1 = vmmov 0   ;;  %s1473_s30 = smov 120   ;;  %vm202_vm2 = vcmask 64512   ;;  %s1475_s16 = smov 80   ;;  %s1823_s0 = inlined_call_operand.vmem [shape: f32[2,8,32], index: 0, kind: input, shape index: {}]   ;;  %s1824_s3 = inlined_call_operand.vmem [shape: bf16[32,96], index: 3, kind: input, shape index: {}]   ;;  %s1825_s1 = inlined_call_operand.vmem [shape: f32[1,32], index: 1, kind: input, shape index: {}]   ;;  %s1826_s2 = inlined_call_operand.vmem [shape: f32[1,32], index: 2, kind: input, shape index: {}]   ;;  %s1827_s4 = inlined_call_operand.vmem [shape: f32[1,96], index: 4, kind: input, shape index: {}]   ;;  %s1828_s5 = inlined_call_operand.vmem [shape: bf16[4,8,32], index: 5, kind: input, shape index: {}]   ;;  %s1829_s6 = inlined_call_operand.vmem [shape: f32[1,32], index: 6, kind: input, shape index: {}]   ;;  %s1830_s9 = inlined_call_operand.vmem [shape: bf16[32,128], index: 9, kind: input, shape index: {}]   ;;  %s1831_s7 = inlined_call_operand.vmem [shape: f32[1,32], index: 7, kind: input, shape index: {}]   ;;  %s1832_s8 = inlined_call_operand.vmem [shape: f32[1,32], index: 8, kind: input, shape index: {}]   ;;  %s1833_s11 = inlined_call_operand.vmem [shape: bf16[128,32], index: 11, kind: input, shape index: {}]   ;;  %s1834_s10 = inlined_call_operand.vmem [shape: f32[1,128], index: 10, kind: input, shape index: {}]   ;;  %s1835_s12 = inlined_call_operand.vmem [shape: f32[1,32], index: 12, kind: input, shape index: {}]   ;;  %s1836_s13 = inlined_call_operand.vmem [shape: f32[1,32], index: 13, kind: input, shape index: {}]   ;;  %s1837_s14 = inlined_call_operand.vmem [shape: f32[1,32], index: 14, kind: input, shape index: {}]   ;;  %s1838_s15 = inlined_call_operand.vmem [shape: f32[2,8,32], index: 15, kind: output, shape index: {}]  }
   0x1   :  { %v1565_v0 = vld [vmem:[%s1823_s0] sm:$0xff]  ;;  %v1570_v1 = vld [vmem:[%s1823_s0 + $0x8] sm:$0xff]  ;;  %1288 = vmatprep.subr.bf16.mxu1 %v1469_v15  ;;  %1314 = vmatprep.subr.bf16.mxu0 %v1469_v15  ;;  %v56_v44 = vlaneseq  ;;  %vm254_vm6 = vcmask 130048   ;;  %s1476_s17 = smov 112   ;;  %s1477_s18 = smov 56   ;;  %vm458_vm8 = vcmask 1043456  }
   0x2   :  { %v87_v2 = vsel %vm86_vm0, %v1565_v0, 0.0  ;;  %v90_v3 = vsel %vm86_vm0, %v1570_v1, 0.0  ;;  %v1409_v14 = vld [vmem:[%s1824_s3] sm:$0xff]   ;;  %v1410_v16 = vld [vmem:[%s1824_s3 + $0x8] sm:$0xff]   ;;  %1292 = vmatprep.mubr.msk.bf16.mxu1 %vm1470_vm1, %v1469_v15  ;;  %1316 = vmatprep.mubr.msk.bf16.mxu0 %vm1470_vm1, %v1469_v15  ;;  %s1478_s22 = smov 48   ;;  %s1479_s23 = smov 104  }
   0x3   :  { %88 = vadd.xlane.f32.xlu0 %v87_v2  ;;  %1289 = vmatpush3.bf16.msra.mxu1 %v1409_v14  ;;  %v1210_v25 = vld [vmem:[%s1825_s1] ss:$0 sm:$0xff]  ;;  %s1471_s1 = smov 96   ;;  %v1617_v45 = vand.u32 127, %v56_v44  ;;  %s1480_s24 = smov 72  }
   0x4   :  { %1290 = vmatprep.subr.bf16.mxu1 %v1469_v15  ;;  %v1211_v29 = vld [vmem:[%s1826_s2] ss:$0 sm:$0xff]  ;;  %s1472_s2 = smov 88   ;;  %s1481_s26 = smov 40   ;;  %v1229_v50 = vld [vmem:[%s1828_s5 + $0xc] sm:$0xf] }
   0x5   :  { %v1212_v34 = vld [vmem:[%s1827_s4] ss:$0 sm:$0xff]  ;;  %vm76_vm3 = vcmp.ge.s32.totalorder %v1617_v45, 8  ;;  %vm79_vm4 = vcmp.lt.s32.totalorder %v1617_v45, 13  ;;  %vm67_vm5 = vcmp.lt.s32.totalorder %v1617_v45, 5  ;;  %s1474_s4 = smov 64  }
   0x6   :  { %vm1622_vm7 = vmand %vm76_vm3, %vm79_vm4 }
   0x7   :  { %91 = vadd.xlane.f32.xlu0 %v90_v3  ;;  %1291 = vmatpush3.bf16.msra.mxu1 %v1410_v16 }
   0x8   :  { %1296 = vmatprep.subr.bf16.mxu1 %v1469_v15 }
  0x90   :  { %v89_v4 = vpop.xlane.xlu0 %88 }
  0x91   :  { %v94_v5 = vmul.f32 0.03125, %v89_v4 }
  0x93   :  { %v96_v6 = vsub.f32 %v1565_v0, %v94_v5 }
  0x94   :  { %v92_v7 = vpop.xlane.xlu0 %91 }
  0x95   :  { %v95_v8 = vmul.f32 0.03125, %v92_v7  ;;  %v98_v9 = vmul.f32 %v96_v6, %v96_v6 }
  0x97   :  { %v97_v10 = vsub.f32 %v1570_v1, %v95_v8  ;;  %v100_v11 = vsel %vm86_vm0, %v98_v9, 0.0 }
  0x98   :  { %101 = vadd.xlane.f32.xlu1 %v100_v11 }
  0x99   :  { %v99_v12 = vmul.f32 %v97_v10, %v97_v10 }
  0x9b   :  { %v103_v13 = vsel %vm86_vm0, %v99_v12, 0.0 }
  0x9c   :  { %104 = vadd.xlane.f32.xlu1 %v103_v13 }
 0x125   :  { %v102_v17 = vpop.xlane.xlu1 %101 }
 0x126   :  { %v106_v18 = vmul.f32 0.03125, %v102_v17 }
 0x128   :  { %v108_v19 = vadd.f32 1e-06, %v106_v18 }
 0x129   :  { %v105_v20 = vpop.xlane.xlu1 %104 }
 0x12a   :  { %1421 = vrsqrt.f32 %v108_v19  ;;  %v107_v21 = vmul.f32 0.03125, %v105_v20 }
 0x12c   :  { %v109_v22 = vadd.f32 1e-06, %v107_v21 }
 0x12e   :  { %1423 = vrsqrt.f32 %v109_v22 }
 0x134   :  { %v1422_v23 = vpop.eup %1421 }
 0x135   :  { %v112_v24 = vmul.f32 %v1422_v23, %v96_v6 }
 0x137   :  { %v120_v28 = vmul.f32 %v1210_v25, %v112_v24 }
 0x138   :  { %v1424_v26 = vpop.eup %1423 }
 0x139   :  { %v113_v27 = vmul.f32 %v1424_v26, %v97_v10  ;;  %v128_v31 = vadd.f32 %v1211_v29, %v120_v28 }
 0x13b   :  { %v121_v30 = vmul.f32 %v1210_v25, %v113_v27 }
 0x13d   :  { %v129_v32 = vadd.f32 %v1211_v29, %v121_v30 }
 0x13f   :  { %v130_v33 = vpack.c.bf16 %v129_v32, %v128_v31 }
 0x141   :  { %1293 = vmatmul.mubr.msk.bf16.vlgmr.msra.gmra.mrb[0].mxu1 %vm86_vm0, %v130_v33 }
 0x142   :  { %1298 = vmatprep.mubr.msk.bf16.mxu1 %vm1470_vm1, %v1469_v15 }
 0x214   :  { %v191_v35 = vpop.f32.mrb[0].mxu1 }
 0x215   :  { %v1294_v36 = vpop.f32.mrb[1].mxu1  ;;  %v192_v38 = vadd.f32 %v1212_v34, %v191_v35 }
 0x216   :  { %v194_v37 = vpop.f32.mrb[2].mxu1 }
 0x217   :  { %v195_v39 = vadd.f32 %v1212_v34, %v194_v37  ;;  %v1295_v40 = vpop.f32.mrb[3].mxu1 }
 0x219   :  { %v1606_v41 = vpack.c.bf16 %v195_v39, %v192_v38 }
 0x21b   :  { %200 = vrot.lane.b32.xlu0 %v1606_v41, %s1471_s1 }
 0x21f   :  { %329 = vrot.lane.b32.xlu0 %v1606_v41, %s1472_s2 }
 0x223   :  { %327 = vrot.lane.b32.xlu0 %v1606_v41, %s1473_s30 }
 0x28d   :  { %v201_v42 = vpop.permute.xlu0 %200 }
 0x28e   :  { %v207_v43 = vsel %vm202_vm2, %v201_v42, 0 }
 0x28f   :  { %1297 = vmatpush3.bf16.xpose.msra.mxu1 %v207_v43  ;;  %v1220_v43 = vld [vmem:[%s1828_s5 + $0x4] sm:$0xf] }
 0x290   :  { %1302 = vmatprep.subr.bf16.mxu1 %v1469_v15  ;;  %v460_v44 = vsel %vm458_vm8, %v1220_v43, 0 }
 0x291   :  { %v330_v12 = vpop.permute.xlu0 %329 }
 0x292   :  { %v335_v14 = vsel %vm202_vm2, %v330_v12, 0 }
 0x295   :  { %v328_v16 = vpop.permute.xlu0 %327 }
 0x296   :  { %1299 = vmatmul.mubr.msk.bf16.vlgmr.msra.gmra.mrb[4].mxu1 %vm202_vm2, %v1606_v41 }
 0x297   :  { %1304 = vmatprep.mubr.msk.bf16.mxu1 %vm1470_vm1, %v1469_v15 }
 0x369   :  { %v243_v46 = vpop.f32.mrb[4].mxu1 }
 0x36a   :  { %v250_v47 = vmul.f32 0.35355338, %v243_v46  ;;  %v1300_v48 = vpop.f32.mrb[5].mxu1 }
 0x36b   :  { %v246_v49 = vpop.f32.mrb[6].mxu1 }
 0x36c   :  { %v251_v51 = vmul.f32 0.35355338, %v246_v49  ;;  %v1301_v52 = vpop.f32.mrb[7].mxu1  ;;  %v252_v53 = vsel %vm67_vm5, %v250_v47, -1e+09 }
 0x36d   :  { %v255_v54 = vsel %vm254_vm6, %v252_v53, -inf  ;;  %v326_v52 = vld [vmem:[%s1828_s5] sm:$0xf] }
 0x36e   :  { %256 = vmax.xlane.f32.xlu1 %v255_v54  ;;  %v253_v55 = vsel %vm1622_vm7, %v251_v51, -1e+09 }
 0x36f   :  { %v258_v56 = vsel %vm254_vm6, %v253_v55, -inf }
 0x372   :  { %259 = vmax.xlane.f32.xlu1 %v258_v56  ;;  %v507_v56 = vsel %vm458_vm8, %v326_v52, 0 }
 0x3fb   :  { %v257_v57 = vpop.xlane.xlu1 %256 }
 0x3fc   :  { %v261_v58 = vsub.f32 %v252_v53, %v257_v57 }
 0x3fe   :  { %v263_v59 = vmul.f32 1.442695, %v261_v58 }
 0x3ff   :  { %v260_v60 = vpop.xlane.xlu1 %259 }
 0x400   :  { %1425 = vpow2.f32 %v263_v59  ;;  %v262_v61 = vsub.f32 %v253_v55, %v260_v60 }
 0x402   :  { %v265_v62 = vmul.f32 1.442695, %v262_v61 }
 0x404   :  { %1427 = vpow2.f32 %v265_v62 }
 0x40a   :  { %v1426_v63 = vpop.eup %1425 }
 0x40b   :  { %v267_v2 = vsel %vm254_vm6, %v1426_v63, 0.0 }
 0x40c   :  { %268 = vadd.xlane.f32.xlu1 %v267_v2 }
 0x40e   :  { %v1428_v3 = vpop.eup %1427 }
 0x40f   :  { %v270_v4 = vsel %vm254_vm6, %v1428_v3, 0.0 }
 0x410   :  { %271 = vadd.xlane.f32.xlu1 %v270_v4 }
 0x421   :  { %278 = vrot.lane.b32.xlu1 %v1606_v41, %s1474_s4 }
 0x499   :  { %v269_v5 = vpop.xlane.xlu1 %268 }
 0x49a   :  { %1429 = vrcp.f32 %v269_v5 }
 0x49d   :  { %v272_v6 = vpop.xlane.xlu1 %271 }
 0x49e   :  { %1431 = vrcp.f32 %v272_v6 }
 0x4a1   :  { %v279_v7 = vpop.permute.xlu1 %278 }
 0x4a2   :  { %1303 = vmatpush3.bf16.msra.mxu1 %v279_v7 }
 0x4a3   :  { %1308 = vmatprep.subr.bf16.mxu1 %v1469_v15 }
 0x4a4   :  { %v1430_v8 = vpop.eup %1429 }
 0x4a5   :  { %v275_v10 = vmul.f32 %v1430_v8, %v1426_v63 }
 0x4a8   :  { %v1432_v9 = vpop.eup %1431 }
 0x4a9   :  { %v276_v11 = vmul.f32 %v1432_v9, %v1428_v3 }
 0x4ab   :  { %v277_v13 = vpack.c.bf16 %v276_v11, %v275_v10 }
 0x4ad   :  { %1305 = vmatmul.mubr.msk.bf16.vlgmr.msra.gmra.mrb[8].mxu1 %vm254_vm6, %v277_v13 }
 0x4ae   :  { %1309 = vmatpush3.bf16.xpose.msra.mxu1 %v335_v14  ;;  %1310 = vmatprep.mubr.msk.bf16.mxu1 %vm1470_vm1, %v1469_v15 }
 0x4af   :  { %1320 = vmatprep.subr.bf16.mxu1 %v1469_v15 }
 0x4b5   :  { %1311 = vmatmul.mubr.msk.bf16.vlgmr.msra.gmra.mrb[12].mxu1 %vm202_vm2, %v328_v16 }
 0x4b6   :  { %1322 = vmatprep.mubr.msk.bf16.mxu1 %vm1470_vm1, %v1469_v15  ;;  %1321 = vmatpush3.bf16.msra.mxu1 %v460_v44 }
 0x4b7   :  { %1332 = vmatprep.subr.bf16.mxu1 %v1469_v15 }
 0x580   :  { %v318_v17 = vpop.f32.mrb[8].mxu1 }
 0x581   :  { %v1306_v18 = vpop.f32.mrb[9].mxu1 }
 0x582   :  { %v321_v19 = vpop.f32.mrb[10].mxu1 }
 0x583   :  { %v325_v20 = vpack.c.bf16 %v321_v19, %v318_v17  ;;  %v1307_v21 = vpop.f32.mrb[11].mxu1 }
 0x588   :  { %v371_v22 = vpop.f32.mrb[12].mxu1 }
 0x589   :  { %v378_v23 = vmul.f32 0.35355338, %v371_v22  ;;  %v1312_v24 = vpop.f32.mrb[13].mxu1 }
 0x58a   :  { %v374_v25 = vpop.f32.mrb[14].mxu1 }
 0x58b   :  { %v379_v26 = vmul.f32 0.35355338, %v374_v25  ;;  %v1313_v27 = vpop.f32.mrb[15].mxu1  ;;  %v380_v28 = vsel %vm67_vm5, %v378_v23, -1e+09 }
 0x58c   :  { %v382_v29 = vsel %vm254_vm6, %v380_v28, -inf }
 0x58d   :  { %383 = vmax.xlane.f32.xlu0 %v382_v29  ;;  %v381_v30 = vsel %vm1622_vm7, %v379_v26, -1e+09 }
 0x58e   :  { %v385_v31 = vsel %vm254_vm6, %v381_v30, -inf }
 0x58f   :  { %386 = vmax.xlane.f32.xlu1 %v385_v31 }
 0x5a0   :  { %552 = vrot.lane.b32.xlu1 %v1606_v41, %s1475_s16 }
 0x5a4   :  { %550 = vrot.lane.b32.xlu1 %v1606_v41, %s1476_s17 }
 0x61a   :  { %v384_v32 = vpop.xlane.xlu0 %383 }
 0x61b   :  { %v388_v33 = vsub.f32 %v380_v28, %v384_v32 }
 0x61c   :  { %v387_v34 = vpop.xlane.xlu1 %386 }
 0x61d   :  { %v390_v35 = vmul.f32 1.442695, %v388_v33  ;;  %v389_v36 = vsub.f32 %v381_v30, %v387_v34 }
 0x61f   :  { %1433 = vpow2.f32 %v390_v35  ;;  %v392_v37 = vmul.f32 1.442695, %v389_v36 }
 0x620   :  { %v553_v59 = vpop.permute.xlu1 %552 }
 0x621   :  { %1435 = vpow2.f32 %v392_v37  ;;  %v558_v63 = vsel %vm202_vm2, %v553_v59, 0 }
 0x624   :  { %v551_v6 = vpop.permute.xlu1 %550 }
 0x629   :  { %v1434_v38 = vpop.eup %1433 }
 0x62a   :  { %v394_v39 = vsel %vm254_vm6, %v1434_v38, 0.0 }
 0x62b   :  { %v1436_v40 = vpop.eup %1435  ;;  %395 = vadd.xlane.f32.xlu0 %v394_v39 }
 0x62c   :  { %v397_v42 = vsel %vm254_vm6, %v1436_v40, 0.0 }
 0x62f   :  { %398 = vadd.xlane.f32.xlu0 %v397_v42 }
 0x645   :  { %405 = vrot.lane.b32.xlu0 %v1606_v41, %s1477_s18 }
 0x6b8   :  { %v396_v46 = vpop.xlane.xlu0 %395 }
 0x6b9   :  { %1437 = vrcp.f32 %v396_v46 }
 0x6bc   :  { %v399_v47 = vpop.xlane.xlu0 %398 }
 0x6bd   :  { %1439 = vrcp.f32 %v399_v47  ;;  %v1225_v47 = vld [vmem:[%s1828_s5 + $0x8] sm:$0xf] }
 0x6c0   :  { %v406_v48 = vpop.permute.xlu0 %405 }
 0x6c1   :  { %1315 = vmatpush3.bf16.msra.mxu0 %v406_v48  ;;  %v682_v48 = vsel %vm458_vm8, %v1225_v47, 0 }
 0x6c2   :  { %1326 = vmatprep.subr.bf16.mxu0 %v1469_v15 }
 0x6c3   :  { %v1438_v49 = vpop.eup %1437 }
 0x6c4   :  { %v402_v53 = vmul.f32 %v1438_v49, %v1434_v38 }
 0x6c7   :  { %v1440_v51 = vpop.eup %1439 }
 0x6c8   :  { %v403_v54 = vmul.f32 %v1440_v51, %v1436_v40 }
 0x6ca   :  { %v404_v55 = vpack.c.bf16 %v403_v54, %v402_v53 }
 0x6cc   :  { %1317 = vmatmul.mubr.msk.bf16.vlgmr.msra.gmra.mrb[0].mxu0 %vm254_vm6, %v404_v55 }
 0x6cd   :  { %1327 = vmatpush3.bf16.msra.mxu0 %v507_v56  ;;  %1328 = vmatprep.mubr.msk.bf16.mxu0 %vm1470_vm1, %v1469_v15 }
 0x6ce   :  { %1338 = vmatprep.subr.bf16.mxu0 %v1469_v15 }
 0x6d4   :  { %1329 = vmatmul.mubr.msk.bf16.vlgmr.msra.gmra.mrb[4].mxu0 %vm202_vm2, %v325_v20 }
 0x6d5   :  { %1340 = vmatprep.mubr.msk.bf16.mxu0 %vm1470_vm1, %v1469_v15 }
 0x79f   :  { %v445_v57 = vpop.f32.mrb[0].mxu0 }
 0x7a0   :  { %v1318_v58 = vpop.f32.mrb[1].mxu0 }
 0x7a1   :  { %v448_v60 = vpop.f32.mrb[2].mxu0 }
 0x7a2   :  { %v452_v61 = vpack.c.bf16 %v448_v60, %v445_v57  ;;  %v1319_v62 = vpop.f32.mrb[3].mxu0 }
 0x7a4   :  { %1323 = vmatmul.mubr.msk.bf16.vlgmr.msra.gmra.mrb[16].mxu1 %vm202_vm2, %v452_v61 }
 0x7a5   :  { %1333 = vmatpush3.bf16.xpose.msra.mxu1 %v558_v63  ;;  %1334 = vmatprep.mubr.msk.bf16.mxu1 %vm1470_vm1, %v1469_v15 }
 0x7a6   :  { %1344 = vmatprep.subr.bf16.mxu1 %v1469_v15 }
 0x7a7   :  { %v543_v2 = vpop.f32.mrb[4].mxu0 }
 0x7a8   :  { %v1330_v3 = vpop.f32.mrb[5].mxu0 }
 0x7a9   :  { %v546_v4 = vpop.f32.mrb[6].mxu0 }
 0x7aa   :  { %v1331_v5 = vpop.f32.mrb[7].mxu0 }
 0x7ac   :  { %1335 = vmatmul.mubr.msk.bf16.vlgmr.msra.gmra.mrb[20].mxu1 %vm202_vm2, %v551_v6 }
 0x7ad   :  { %1346 = vmatprep.mubr.msk.bf16.mxu1 %vm1470_vm1, %v1469_v15  ;;  %1345 = vmatpush3.bf16.msra.mxu1 %v682_v48 }
 0x7ae   :  { %1356 = vmatprep.subr.bf16.mxu1 %v1469_v15 }
 0x877   :  { %v496_v7 = vpop.f32.mrb[16].mxu1 }
 0x878   :  { %v1680_v8 = vadd.f32 %v543_v2, %v496_v7  ;;  %v1324_v9 = vpop.f32.mrb[17].mxu1 }
 0x879   :  { %v499_v10 = vpop.f32.mrb[18].mxu1 }
 0x87a   :  { %v1682_v11 = vadd.f32 %v546_v4, %v499_v10  ;;  %v1325_v12 = vpop.f32.mrb[19].mxu1 }
 0x87f   :  { %v594_v13 = vpop.f32.mrb[20].mxu1 }
 0x880   :  { %v601_v14 = vmul.f32 0.35355338, %v594_v13  ;;  %v1336_v16 = vpop.f32.mrb[21].mxu1 }
 0x881   :  { %v597_v17 = vpop.f32.mrb[22].mxu1 }
 0x882   :  { %v602_v18 = vmul.f32 0.35355338, %v597_v17  ;;  %v1337_v19 = vpop.f32.mrb[23].mxu1  ;;  %v603_v20 = vsel %vm67_vm5, %v601_v14, -1e+09  ;;  %v859_v14 = vsel %vm458_vm8, %v1229_v50, 0 }
 0x883   :  { %v605_v21 = vsel %vm254_vm6, %v603_v20, -inf  ;;  %v1413_v50 = vld [vmem:[%s1833_s11] sm:$0xff]  }
 0x884   :  { %606 = vmax.xlane.f32.xlu1 %v605_v21  ;;  %v604_v22 = vsel %vm1622_vm7, %v602_v18, -1e+09 }
 0x885   :  { %v608_v23 = vsel %vm254_vm6, %v604_v22, -inf }
 0x886   :  { %609 = vmax.xlane.f32.xlu0 %v608_v23 }
 0x895   :  { %628 = vrot.lane.b32.xlu1 %v1606_v41, %s1478_s22 }
 0x899   :  { %727 = vrot.lane.b32.xlu1 %v1606_v41, %s1479_s23 }
 0x911   :  { %v607_v24 = vpop.xlane.xlu1 %606 }
 0x912   :  { %v611_v25 = vsub.f32 %v603_v20, %v607_v24 }
 0x913   :  { %v610_v26 = vpop.xlane.xlu0 %609 }
 0x914   :  { %v613_v27 = vmul.f32 1.442695, %v611_v25  ;;  %v612_v28 = vsub.f32 %v604_v22, %v610_v26 }
 0x915   :  { %v629_v29 = vpop.permute.xlu1 %628 }
 0x916   :  { %1441 = vpow2.f32 %v613_v27  ;;  %v615_v30 = vmul.f32 1.442695, %v612_v28  ;;  %1339 = vmatpush3.bf16.msra.mxu0 %v629_v29 }
 0x917   :  { %1350 = vmatprep.subr.bf16.mxu0 %v1469_v15 }
 0x918   :  { %1443 = vpow2.f32 %v615_v30 }
 0x919   :  { %v728_v46 = vpop.permute.xlu1 %727 }
 0x920   :  { %v1442_v31 = vpop.eup %1441 }
 0x921   :  { %v617_v32 = vsel %vm254_vm6, %v1442_v31, 0.0 }
 0x922   :  { %v1444_v33 = vpop.eup %1443  ;;  %618 = vadd.xlane.f32.xlu0 %v617_v32 }
 0x923   :  { %v620_v34 = vsel %vm254_vm6, %v1444_v33, 0.0 }
 0x926   :  { %621 = vadd.xlane.f32.xlu0 %v620_v34 }
 0x93c   :  { %729 = vrot.lane.b32.xlu0 %v1606_v41, %s1480_s24 }
 0x9af   :  { %v619_v35 = vpop.xlane.xlu0 %618 }
 0x9b0   :  { %1445 = vrcp.f32 %v619_v35 }
 0x9b3   :  { %v622_v36 = vpop.xlane.xlu0 %621 }
 0x9b4   :  { %1447 = vrcp.f32 %v622_v36 }
 0x9b7   :  { %v730_v42 = vpop.permute.xlu0 %729 }
 0x9b8   :  { %v735_v44 = vsel %vm202_vm2, %v730_v42, 0 }
 0x9ba   :  { %v1446_v37 = vpop.eup %1445 }
 0x9bb   :  { %v625_v39 = vmul.f32 %v1446_v37, %v1442_v31 }
 0x9be   :  { %v1448_v38 = vpop.eup %1447 }
 0x9bf   :  { %v626_v40 = vmul.f32 %v1448_v38, %v1444_v33  ;;  %v1231_v33 = vld [vmem:[%s1829_s6] ss:$0 sm:$0xff] }
 0x9c1   :  { %v627_v43 = vpack.c.bf16 %v626_v40, %v625_v39 }
 0x9c3   :  { %1341 = vmatmul.mubr.msk.bf16.vlgmr.msra.gmra.mrb[8].mxu0 %vm254_vm6, %v627_v43 }
 0x9c4   :  { %1351 = vmatpush3.bf16.xpose.msra.mxu0 %v735_v44  ;;  %1352 = vmatprep.mubr.msk.bf16.mxu0 %vm1470_vm1, %v1469_v15 }
 0x9c5   :  { %1362 = vmatprep.subr.bf16.mxu0 %v1469_v15 }
 0x9cb   :  { %1353 = vmatmul.mubr.msk.bf16.vlgmr.msra.gmra.mrb[12].mxu0 %vm202_vm2, %v728_v46 }
 0x9cc   :  { %1364 = vmatprep.mubr.msk.bf16.mxu0 %vm1470_vm1, %v1469_v15  ;;  %1363 = vmatpush3.bf16.msra.mxu0 %v859_v14  ;;  %v1414_v14 = vld [vmem:[%s1833_s11 + $0x8] sm:$0xff]  }
 0x9cd   :  { %1376 = vmatprep.subr.bf16.mxu0 %v1469_v15 }
 0xa96   :  { %v668_v49 = vpop.f32.mrb[8].mxu0 }
 0xa97   :  { %v1342_v51 = vpop.f32.mrb[9].mxu0 }
 0xa98   :  { %v671_v52 = vpop.f32.mrb[10].mxu0 }
 0xa99   :  { %v675_v53 = vpack.c.bf16 %v671_v52, %v668_v49  ;;  %v1343_v54 = vpop.f32.mrb[11].mxu0 }
 0xa9b   :  { %1347 = vmatmul.mubr.msk.bf16.vlgmr.msra.gmra.mrb[24].mxu1 %vm202_vm2, %v675_v53 }
 0xa9c   :  { %1358 = vmatprep.mubr.msk.bf16.mxu1 %vm1470_vm1, %v1469_v15 }
 0xa9e   :  { %v771_v55 = vpop.f32.mrb[12].mxu0 }
 0xa9f   :  { %v778_v56 = vmul.f32 0.35355338, %v771_v55  ;;  %v1354_v57 = vpop.f32.mrb[13].mxu0 }
 0xaa0   :  { %v774_v58 = vpop.f32.mrb[14].mxu0  ;;  %v1412_v57 = vld [vmem:[%s1830_s9 + $0x8] sm:$0xff]  }
 0xaa1   :  { %v779_v59 = vmul.f32 0.35355338, %v774_v58  ;;  %v1355_v60 = vpop.f32.mrb[15].mxu0  ;;  %v780_v61 = vsel %vm67_vm5, %v778_v56, -1e+09  ;;  %v1411_v56 = vld [vmem:[%s1830_s9] sm:$0xff]  }
 0xaa2   :  { %v782_v62 = vsel %vm254_vm6, %v780_v61, -inf }
 0xaa3   :  { %783 = vmax.xlane.f32.xlu1 %v782_v62  ;;  %v781_v63 = vsel %vm1622_vm7, %v779_v59, -1e+09 }
 0xaa4   :  { %v785_v2 = vsel %vm254_vm6, %v781_v63, -inf }
 0xaa5   :  { %786 = vmax.xlane.f32.xlu0 %v785_v2 }
 0xb30   :  { %v784_v3 = vpop.xlane.xlu1 %783 }
 0xb31   :  { %v788_v4 = vsub.f32 %v780_v61, %v784_v3 }
 0xb32   :  { %v787_v5 = vpop.xlane.xlu0 %786 }
 0xb33   :  { %v790_v6 = vmul.f32 1.442695, %v788_v4  ;;  %v789_v7 = vsub.f32 %v781_v63, %v787_v5  ;;  %v1232_v4 = vld [vmem:[%s1831_s7] ss:$0 sm:$0xff] }
 0xb35   :  { %1449 = vpow2.f32 %v790_v6  ;;  %v792_v9 = vmul.f32 1.442695, %v789_v7 }
 0xb37   :  { %1451 = vpow2.f32 %v792_v9  ;;  %v1233_v9 = vld [vmem:[%s1832_s8] ss:$0 sm:$0xff] }
 0xb3f   :  { %v1450_v10 = vpop.eup %1449 }
 0xb40   :  { %v794_v45 = vsel %vm254_vm6, %v1450_v10, 0.0 }
 0xb41   :  { %v1452_v12 = vpop.eup %1451  ;;  %795 = vadd.xlane.f32.xlu0 %v794_v45 }
 0xb42   :  { %v797_v13 = vsel %vm254_vm6, %v1452_v12, 0.0 }
 0xb43   :  { %798 = vadd.xlane.f32.xlu1 %v797_v13 }
 0xb57   :  { %805 = vrot.lane.b32.xlu0 %v1606_v41, %s1481_s26 }
 0xb6e   :  { %v718_v16 = vpop.f32.mrb[24].mxu1 }
 0xb6f   :  { %v725_v17 = vadd.f32 %v718_v16, %v1680_v8  ;;  %v1348_v18 = vpop.f32.mrb[25].mxu1  ;;  %v1415_v16 = vld [vmem:[%s1833_s11 + $0x10] sm:$0xff]  }
 0xb70   :  { %v721_v19 = vpop.f32.mrb[26].mxu1  ;;  %v1417_v18 = vld [vmem:[%s1833_s11 + $0x20] sm:$0xff]  }
 0xb71   :  { %v726_v20 = vadd.f32 %v721_v19, %v1682_v11  ;;  %v1349_v21 = vpop.f32.mrb[27].mxu1  ;;  %v1418_v19 = vld [vmem:[%s1833_s11 + $0x28] sm:$0xff]  }
 0xb72   :  { %v1420_v21 = vld [vmem:[%s1833_s11 + $0x38] sm:$0xff]  }
 0xbce   :  { %v796_v22 = vpop.xlane.xlu0 %795 }
 0xbcf   :  { %1453 = vrcp.f32 %v796_v22  ;;  %v1234_v22 = vld [vmem:[%s1834_s10] ss:$0 sm:$0xff] }
 0xbd0   :  { %v799_v41 = vpop.xlane.xlu1 %798 }
 0xbd1   :  { %1455 = vrcp.f32 %v799_v41 }
 0xbd2   :  { %v806_v23 = vpop.permute.xlu0 %805 }
 0xbd3   :  { %1357 = vmatpush3.bf16.msra.mxu1 %v806_v23 }
 0xbd4   :  { %1368 = vmatprep.subr.bf16.mxu1 %v1469_v15 }
 0xbd9   :  { %v1454_v24 = vpop.eup %1453 }
 0xbda   :  { %v802_v26 = vmul.f32 %v1454_v24, %v1450_v10 }
 0xbdb   :  { %v1456_v25 = vpop.eup %1455 }
 0xbdc   :  { %v803_v27 = vmul.f32 %v1456_v25, %v1452_v12 }
 0xbde   :  { %v804_v28 = vpack.c.bf16 %v803_v27, %v802_v26 }
 0xbe0   :  { %1359 = vmatmul.mubr.msk.bf16.vlgmr.msra.gmra.mrb[28].mxu1 %vm254_vm6, %v804_v28 }
 0xbe1   :  { %1372 = vmatprep.mubr.msk.bf16.mxu1 %vm1470_vm1, %v1469_v15  ;;  %1369 = vmatpush3.bf16.msra.mxu1 %v1411_v56 }
 0xbe2   :  { %1370 = vmatprep.subr.bf16.mxu1 %v1469_v15 }
 0xbe5   :  { %1371 = vmatpush3.bf16.msra.mxu1 %v1412_v57 }
 0xcb3   :  { %v845_v8 = vpop.f32.mrb[28].mxu1 }
 0xcb4   :  { %v1360_v11 = vpop.f32.mrb[29].mxu1 }
 0xcb5   :  { %v848_v29 = vpop.f32.mrb[30].mxu1 }
 0xcb6   :  { %v852_v30 = vpack.c.bf16 %v848_v29, %v845_v8  ;;  %v1361_v31 = vpop.f32.mrb[31].mxu1 }
 0xcb8   :  { %1365 = vmatmul.mubr.msk.bf16.vlgmr.msra.gmra.mrb[16].mxu0 %vm202_vm2, %v852_v30 }
 0xcb9   :  { %1392 = vmatprep.mubr.msk.bf16.mxu0 %vm1470_vm1, %v1469_v15  ;;  %1377 = vmatpush3.bf16.msra.mxu0 %v1413_v50  ;;  %v1248_v50 = vld [vmem:[%s1837_s14] ss:$0 sm:$0xff] }
 0xcba   :  { %1378 = vmatprep.subr.bf16.mxu0 %v1469_v15 }
 0xcbd   :  { %1379 = vmatpush3.bf16.msra.mxu0 %v1414_v14 }
 0xcbe   :  { %1380 = vmatprep.subr.bf16.mxu0 %v1469_v15 }
 0xcc1   :  { %1381 = vmatpush3.bf16.msra.mxu0 %v1415_v16 }
 0xcc2   :  { %1382 = vmatprep.subr.bf16.mxu0 %v1469_v15 }
 0xd8b   :  { %v895_v32 = vpop.f32.mrb[16].mxu0 }
 0xd8c   :  { %v902_v34 = vadd.f32 %v895_v32, %v725_v17  ;;  %v1366_v35 = vpop.f32.mrb[17].mxu0  ;;  %v1416_v17 = vld [vmem:[%s1833_s11 + $0x18] sm:$0xff]  }
 0xd8d   :  { %v898_v36 = vpop.f32.mrb[18].mxu0  ;;  %1383 = vmatpush3.bf16.msra.mxu0 %v1416_v17 }
 0xd8e   :  { %v911_v37 = vadd.f32 %v1231_v33, %v902_v34  ;;  %v903_v38 = vadd.f32 %v898_v36, %v726_v20  ;;  %v1367_v39 = vpop.f32.mrb[19].mxu0  ;;  %1384 = vmatprep.subr.bf16.mxu0 %v1469_v15  ;;  %v1419_v20 = vld [vmem:[%s1833_s11 + $0x30] sm:$0xff]  }
 0xd90   :  { %v1739_v40 = vadd.f32 %v911_v37, %v1565_v0  ;;  %v912_v42 = vadd.f32 %v1231_v33, %v903_v38 }
 0xd91   :  { %1385 = vmatpush3.bf16.msra.mxu0 %v1417_v18 }
 0xd92   :  { %v1742_v43 = vadd.f32 %v912_v42, %v1570_v1  ;;  %v917_v44 = vsel %vm86_vm0, %v1739_v40, 0.0  ;;  %1386 = vmatprep.subr.bf16.mxu0 %v1469_v15 }
 0xd93   :  { %918 = vadd.xlane.f32.xlu1 %v917_v44 }
 0xd94   :  { %v920_v46 = vsel %vm86_vm0, %v1742_v43, 0.0 }
 0xd95   :  { %1387 = vmatpush3.bf16.msra.mxu0 %v1418_v19 }
 0xd96   :  { %1388 = vmatprep.subr.bf16.mxu0 %v1469_v15 }
 0xd97   :  { %921 = vadd.xlane.f32.xlu1 %v920_v46 }
 0xd99   :  { %1389 = vmatpush3.bf16.msra.mxu0 %v1419_v20 }
 0xd9a   :  { %1390 = vmatprep.subr.bf16.mxu0 %v1469_v15 }
 0xd9d   :  { %1391 = vmatpush3.bf16.msra.mxu0 %v1420_v21 }
 0xe20   :  { %v919_v47 = vpop.xlane.xlu1 %918 }
 0xe21   :  { %v923_v48 = vmul.f32 0.03125, %v919_v47 }
 0xe23   :  { %v925_v49 = vsub.f32 %v1739_v40, %v923_v48  ;;  %v1238_v48 = vld [vmem:[%s1835_s12] ss:$0 sm:$0xff] }
 0xe24   :  { %v922_v51 = vpop.xlane.xlu1 %921 }
 0xe25   :  { %v924_v52 = vmul.f32 0.03125, %v922_v51  ;;  %v927_v0 = vmul.f32 %v925_v49, %v925_v49 }
 0xe27   :  { %v926_v53 = vsub.f32 %v1742_v43, %v924_v52  ;;  %v929_v1 = vsel %vm86_vm0, %v927_v0, 0.0 }
 0xe28   :  { %930 = vadd.xlane.f32.xlu1 %v929_v1 }
 0xe29   :  { %v928_v54 = vmul.f32 %v926_v53, %v926_v53 }
 0xe2b   :  { %v932_v55 = vsel %vm86_vm0, %v928_v54, 0.0 }
 0xe2c   :  { %933 = vadd.xlane.f32.xlu1 %v932_v55 }
 0xeb5   :  { %v931_v58 = vpop.xlane.xlu1 %930 }
 0xeb6   :  { %v935_v59 = vmul.f32 0.03125, %v931_v58 }
 0xeb8   :  { %v937_v60 = vadd.f32 1e-06, %v935_v59 }
 0xeb9   :  { %v934_v61 = vpop.xlane.xlu1 %933 }
 0xeba   :  { %1457 = vrsqrt.f32 %v937_v60  ;;  %v936_v62 = vmul.f32 0.03125, %v934_v61 }
 0xebc   :  { %v938_v63 = vadd.f32 1e-06, %v936_v62 }
 0xebe   :  { %1459 = vrsqrt.f32 %v938_v63 }
 0xec4   :  { %v1458_v2 = vpop.eup %1457 }
 0xec5   :  { %v941_v3 = vmul.f32 %v1458_v2, %v925_v49 }
 0xec7   :  { %v949_v6 = vmul.f32 %v1232_v4, %v941_v3 }
 0xec8   :  { %v1460_v5 = vpop.eup %1459 }
 0xec9   :  { %v942_v7 = vmul.f32 %v1460_v5, %v926_v53  ;;  %v957_v45 = vadd.f32 %v1233_v9, %v949_v6 }
 0xecb   :  { %v950_v10 = vmul.f32 %v1232_v4, %v942_v7 }
 0xecd   :  { %v958_v12 = vadd.f32 %v1233_v9, %v950_v10 }
 0xecf   :  { %v959_v13 = vpack.c.bf16 %v958_v12, %v957_v45  ;;  %v1247_v12 = vld [vmem:[%s1836_s13] ss:$0 sm:$0xff] }
 0xed1   :  { %1373 = vmatmul.mubr.msk.bf16.vlgmr.msra.gmra.mrb[32].mxu1 %vm86_vm0, %v959_v13 }
 0xfa4   :  { %v1020_v41 = vpop.f32.mrb[32].mxu1 }
 0xfa5   :  { %v1021_v23 = vadd.f32 %v1234_v22, %v1020_v41  ;;  %v1374_v24 = vpop.f32.mrb[33].mxu1 }
 0xfa6   :  { %v1023_v25 = vpop.f32.mrb[34].mxu1 }
 0xfa7   :  { %v1027_v26 = vmul.f32 %v1021_v23, %v1021_v23  ;;  %v1024_v27 = vadd.f32 %v1234_v22, %v1023_v25  ;;  %v1375_v28 = vpop.f32.mrb[35].mxu1 }
 0xfa9   :  { %v1029_v8 = vmul.f32 %v1027_v26, %v1021_v23  ;;  %v1028_v11 = vmul.f32 %v1024_v27, %v1024_v27 }
 0xfab   :  { %v1031_v29 = vmul.f32 0.044715, %v1029_v8  ;;  %v1030_v15 = vmul.f32 %v1028_v11, %v1024_v27 }
 0xfad   :  { %v1033_v30 = vadd.f32 %v1031_v29, %v1021_v23  ;;  %v1032_v31 = vmul.f32 0.044715, %v1030_v15 }
 0xfaf   :  { %v1035_v32 = vmul.f32 0.7978846, %v1033_v30  ;;  %v1034_v33 = vadd.f32 %v1032_v31, %v1024_v27 }
 0xfb1   :  { %1461 = vtanh.f32 %v1035_v32  ;;  %v1036_v34 = vmul.f32 0.7978846, %v1034_v33 }
 0xfb3   :  { %1463 = vtanh.f32 %v1036_v34 }
 0xfbb   :  { %v1462_v35 = vpop.eup %1461 }
 0xfbc   :  { %v1039_v36 = vadd.f32 1.0, %v1462_v35 }
 0xfbd   :  { %v1464_v37 = vpop.eup %1463 }
 0xfbe   :  { %v1041_v38 = vmul.f32 0.5, %v1039_v36  ;;  %v1040_v39 = vadd.f32 1.0, %v1464_v37 }
 0xfc0   :  { %v1042_v42 = vmul.f32 0.5, %v1040_v39  ;;  %v1043_v44 = vmul.f32 %v1041_v38, %v1021_v23 }
 0xfc2   :  { %v1044_v46 = vmul.f32 %v1042_v42, %v1024_v27 }
 0xfc4   :  { %v1045_v47 = vpack.c.bf16 %v1044_v46, %v1043_v44 }
 0xfc6   :  { %1393 = vmatmul.mubr.bf16.vlgmr.msra.gmra.mrb[20].mxu0 %v1045_v47 }
0x1099   :  { %v1151_v49 = vpop.f32.mrb[20].mxu0 }
0x109a   :  { %v1152_v51 = vadd.f32 %v1238_v48, %v1151_v49  ;;  %v1394_v52 = vpop.f32.mrb[21].mxu0 }
0x109b   :  { %v1154_v0 = vpop.f32.mrb[22].mxu0 }
0x109c   :  { %v1155_v53 = vadd.f32 %v1238_v48, %v1154_v0  ;;  %v1395_v1 = vpop.f32.mrb[23].mxu0  ;;  %v1158_v54 = vadd.f32 %v1152_v51, %v1739_v40 }
0x109e   :  { %v1162_v55 = vsel %vm86_vm0, %v1158_v54, 0.0  ;;  %v1159_v56 = vadd.f32 %v1155_v53, %v1742_v43 }
0x109f   :  { %1163 = vadd.xlane.f32.xlu1 %v1162_v55 }
0x10a0   :  { %v1165_v57 = vsel %vm86_vm0, %v1159_v56, 0.0 }
0x10a3   :  { %1166 = vadd.xlane.f32.xlu1 %v1165_v57 }
0x112c   :  { %v1164_v58 = vpop.xlane.xlu1 %1163 }
0x112d   :  { %v1168_v59 = vmul.f32 0.03125, %v1164_v58 }
0x112f   :  { %v1170_v60 = vsub.f32 %v1158_v54, %v1168_v59 }
0x1130   :  { %v1167_v61 = vpop.xlane.xlu1 %1166 }
0x1131   :  { %v1169_v62 = vmul.f32 0.03125, %v1167_v61  ;;  %v1172_v63 = vmul.f32 %v1170_v60, %v1170_v60 }
0x1133   :  { %v1171_v2 = vsub.f32 %v1159_v56, %v1169_v62  ;;  %v1174_v3 = vsel %vm86_vm0, %v1172_v63, 0.0 }
0x1134   :  { %1175 = vadd.xlane.f32.xlu0 %v1174_v3 }
0x1135   :  { %v1173_v4 = vmul.f32 %v1171_v2, %v1171_v2 }
0x1137   :  { %v1177_v40 = vsel %vm86_vm0, %v1173_v4, 0.0 }
0x1138   :  { %1178 = vadd.xlane.f32.xlu1 %v1177_v40 }
0x11c1   :  { %v1176_v5 = vpop.xlane.xlu0 %1175 }
0x11c2   :  { %v1180_v43 = vmul.f32 0.03125, %v1176_v5 }
0x11c4   :  { %v1182_v6 = vadd.f32 1e-06, %v1180_v43 }
0x11c5   :  { %v1179_v7 = vpop.xlane.xlu1 %1178 }
0x11c6   :  { %1465 = vrsqrt.f32 %v1182_v6  ;;  %v1181_v9 = vmul.f32 0.03125, %v1179_v7 }
0x11c8   :  { %v1183_v10 = vadd.f32 1e-06, %v1181_v9 }
0x11ca   :  { %1467 = vrsqrt.f32 %v1183_v10 }
0x11d0   :  { %v1466_v45 = vpop.eup %1465 }
0x11d1   :  { %v1186_v13 = vmul.f32 %v1466_v45, %v1170_v60 }
0x11d3   :  { %v1194_v14 = vmul.f32 %v1247_v12, %v1186_v13 }
0x11d4   :  { %v1468_v16 = vpop.eup %1467 }
0x11d5   :  { %v1202_v17 = vadd.f32 %v1248_v50, %v1194_v14  ;;  %v1187_v18 = vmul.f32 %v1468_v16, %v1171_v2 }
0x11d7   :  { %1204 = vst.msk [vmem:[%s1838_s15] sm:$0xff] %vm86_vm0, %v1202_v17  ;;  %v1195_v19 = vmul.f32 %v1247_v12, %v1187_v18 }
0x11d9   :  { %v1203_v20 = vadd.f32 %v1248_v50, %v1195_v19 }
0x11db   :  { %1205 = vst.msk [vmem:[%s1838_s15 + $0x8] sm:$0xff] %vm86_vm0, %v1203_v20 }

// kernel: distributed_gpt3_pretrain_forward.5
= control target key start
LH: loop header
LB: loop body
LE: loop exit
PB: predicated region body
PF: predicated region fallthrough
CT: control target
= control target key end

     0   :  { %vm71_vm0 = vcmask 261120   ;;  %v1634_v22 = vmov 0.0   ;;  %vm1635_vm1 = vmmov 0   ;;  %s1636_s29 = smov 120   ;;  %vm313_vm2 = vcmask 64512   ;;  %s1639_s21 = smov 112   ;;  %s2036_s1 = inlined_call_operand.vmem [shape: f32[8,32], index: 1, kind: input, shape index: {}]   ;;  %s2037_s0 = inlined_call_operand.vmem [shape: f32[2,8,32], index: 0, kind: input, shape index: {}]   ;;  %s2038_s6 = inlined_call_operand.vmem [shape: bf16[32,32], index: 6, kind: input, shape index: {}]   ;;  %s2039_s8 = inlined_call_operand.vmem [shape: bf16[32,64], index: 8, kind: input, shape index: {}]   ;;  %s2040_s2 = inlined_call_operand.vmem [shape: f32[1,32], index: 2, kind: input, shape index: {}]   ;;  %s2041_s3 = inlined_call_operand.vmem [shape: f32[1,32], index: 3, kind: input, shape index: {}]   ;;  %s2042_s4 = inlined_call_operand.vmem [shape: f32[1,32], index: 4, kind: input, shape index: {}]   ;;  %s2043_s5 = inlined_call_operand.vmem [shape: f32[1,32], index: 5, kind: input, shape index: {}]   ;;  %s2044_s7 = inlined_call_operand.vmem [shape: f32[1,32], index: 7, kind: input, shape index: {}]   ;;  %s2045_s9 = inlined_call_operand.vmem [shape: f32[1,64], index: 9, kind: input, shape index: {}]   ;;  %s2046_s10 = inlined_call_operand.vmem [shape: bf16[4,8,32], index: 10, kind: input, shape index: {}]   ;;  %s2047_s11 = inlined_call_operand.vmem [shape: f32[1,32], index: 11, kind: input, shape index: {}]   ;;  %s2048_s14 = inlined_call_operand.vmem [shape: bf16[32,128], index: 14, kind: input, shape index: {}]   ;;  %s2049_s12 = inlined_call_operand.vmem [shape: f32[1,32], index: 12, kind: input, shape index: {}]   ;;  %s2050_s13 = inlined_call_operand.vmem [shape: f32[1,32], index: 13, kind: input, shape index: {}]   ;;  %s2051_s16 = inlined_call_operand.vmem [shape: bf16[128,32], index: 16, kind: input, shape index: {}]   ;;  %s2052_s15 = inlined_call_operand.vmem [shape: f32[1,128], index: 15, kind: input, shape index: {}]   ;;  %s2053_s18 = inlined_call_operand.vmem [shape: bf16[32,32], index: 18, kind: input, shape index: {}]   ;;  %s2054_s17 = inlined_call_operand.vmem [shape: f32[1,32], index: 17, kind: input, shape index: {}]   ;;  %s2055_s19 = inlined_call_operand.vmem [shape: f32[1,32], index: 19, kind: input, shape index: {}]   ;;  %s2056_s20 = inlined_call_operand.vmem [shape: f32[2,8,32], index: 20, kind: output, shape index: {}]  }
   0x1   :  { %2060 = sst [smem:[#allocation2_spill]] %s2036_s1  ;;  %1439 = vmatprep.subr.bf16.mxu0 %v1634_v22  ;;  %1461 = vmatprep.subr.bf16.mxu1 %v1634_v22  ;;  %v1348_v36 = vld [vmem:[%s2041_s3] ss:$0 sm:$0xff]  ;;  %vm365_vm6 = vcmask 130048   ;;  %vm571_vm8 = vcmask 1043456   ;;  %s1642_s27 = smov 72  }
   0x2   :  { %2061 = sst [smem:[#allocation3_spill]] %s2037_s0  ;;  %s2065_s23 = sld [smem:[#allocation2_spill]]  ;;  %1443 = vmatprep.mubr.msk.bf16.mxu0 %vm1635_vm1, %v1634_v22  ;;  %1463 = vmatprep.mubr.msk.bf16.mxu1 %vm1635_vm1, %v1634_v22  ;;  %v1349_v39 = vld [vmem:[%s2042_s4] ss:$0 sm:$0xff] }
   0x3   :  { %2062 = sst [smem:[#allocation4_spill]] %s2038_s6  ;;  %s2066_s25 = sld [smem:[#allocation3_spill]]  ;;  %v1350_v48 = vld [vmem:[%s2043_s5] ss:$0 sm:$0xff] }
   0x4   :  { %2063 = sst [smem:[#allocation5_spill]] %s2039_s8  ;;  %v1351_v53 = vld [vmem:[%s2044_s7] ss:$0 sm:$0xff]  ;;  %s1637_s7 = smov 88  }
   0x5   :  { %2064 = sst [smem:[#allocation6_spill]] %s2040_s2  ;;  %s2067_s2 = sld [smem:[#allocation4_spill]]  ;;  %v1355_v61 = vld [vmem:[%s2045_s9] ss:$0 sm:$0xff] }
   0x6   :  { %s2068_s0 = sld [smem:[#allocation6_spill]]  ;;  %s2069_s26 = sld [smem:[#allocation5_spill]] }
   0x7   :  { %s1638_s9 = smov 96   ;;  %s1640_s6 = smov 104  }
   0x8   :  { %v1751_v0 = vld [vmem:[%s2065_s23] sm:$0xff] }
   0x9   :  { %v68_v1 = vld [vmem:[%s2066_s25 + $0x8] sm:$0xff]  ;;  %v67_v2 = vld [vmem:[%s2066_s25] sm:$0xff]  ;;  %v72_v3 = vsel %vm71_vm0, %v1751_v0, 0.0  ;;  %s1641_s25 = smov 80  }
   0xa   :  { %v105_v4 = vsel %vm71_vm0, %v68_v1, 0.0  ;;  %73 = vadd.xlane.f32.xlu0 %v72_v3  ;;  %v102_v5 = vsel %vm71_vm0, %v67_v2, 0.0 }
   0xb   :  { %106 = vadd.xlane.f32.xlu1 %v105_v4  ;;  %v1572_v21 = vld [vmem:[%s2067_s2] sm:$0xff]   ;;  %v1573_v23 = vld [vmem:[%s2067_s2 + $0x8] sm:$0xff]  }
   0xc   :  { %1440 = vmatpush3.bf16.msra.mxu0 %v1572_v21  ;;  %v1347_v34 = vld [vmem:[%s2068_s0] ss:$0 sm:$0xff]  ;;  %v1575_v49 = vld [vmem:[%s2069_s26 + $0x8] sm:$0xff]  }
   0xd   :  { %1441 = vmatprep.subr.bf16.mxu0 %v1634_v22  ;;  %v1574_v44 = vld [vmem:[%s2069_s26] sm:$0xff]  }
   0xe   :  { %103 = vadd.xlane.f32.xlu0 %v102_v5 }
  0x10   :  { %1442 = vmatpush3.bf16.msra.mxu0 %v1573_v23 }
  0x11   :  { %1447 = vmatprep.subr.bf16.mxu0 %v1634_v22 }
  0x97   :  { %v74_v6 = vpop.xlane.xlu0 %73 }
  0x98   :  { %v107_v7 = vpop.xlane.xlu1 %106  ;;  %v76_v8 = vmul.f32 0.03125, %v74_v6 }
  0x99   :  { %v109_v9 = vmul.f32 0.03125, %v107_v7 }
  0x9a   :  { %v77_v10 = vsub.f32 %v1751_v0, %v76_v8 }
  0x9b   :  { %v111_v11 = vsub.f32 %v68_v1, %v109_v9  ;;  %v104_v12 = vpop.xlane.xlu0 %103 }
  0x9c   :  { %v108_v13 = vmul.f32 0.03125, %v104_v12  ;;  %v78_v14 = vmul.f32 %v77_v10, %v77_v10 }
  0x9d   :  { %v113_v15 = vmul.f32 %v111_v11, %v111_v11 }
  0x9e   :  { %v110_v16 = vsub.f32 %v67_v2, %v108_v13  ;;  %v79_v17 = vsel %vm71_vm0, %v78_v14, 0.0 }
  0x9f   :  { %80 = vadd.xlane.f32.xlu1 %v79_v17  ;;  %v117_v18 = vsel %vm71_vm0, %v113_v15, 0.0 }
  0xa0   :  { %v112_v19 = vmul.f32 %v110_v16, %v110_v16 }
  0xa2   :  { %v114_v20 = vsel %vm71_vm0, %v112_v19, 0.0 }
  0xa3   :  { %118 = vadd.xlane.f32.xlu1 %v117_v18  ;;  %115 = vadd.xlane.f32.xlu0 %v114_v20 }
 0x12c   :  { %v81_v24 = vpop.xlane.xlu1 %80 }
 0x12d   :  { %v82_v25 = vmul.f32 0.03125, %v81_v24 }
 0x12f   :  { %v83_v26 = vadd.f32 1e-06, %v82_v25 }
 0x130   :  { %v119_v27 = vpop.xlane.xlu1 %118  ;;  %v116_v28 = vpop.xlane.xlu0 %115 }
 0x131   :  { %1588 = vrsqrt.f32 %v83_v26  ;;  %v121_v29 = vmul.f32 0.03125, %v119_v27  ;;  %v120_v30 = vmul.f32 0.03125, %v116_v28 }
 0x133   :  { %v123_v31 = vadd.f32 1e-06, %v121_v29  ;;  %v122_v32 = vadd.f32 1e-06, %v120_v30 }
 0x135   :  { %1590 = vrsqrt.f32 %v123_v31 }
 0x136   :  { %1592 = vrsqrt.f32 %v122_v32 }
 0x13b   :  { %v1589_v33 = vpop.eup %1588 }
 0x13c   :  { %v85_v35 = vmul.f32 %v1589_v33, %v77_v10  ;;  %v283_v10 = vlaneseq }
 0x13e   :  { %v92_v37 = vmul.f32 %v1347_v34, %v85_v35 }
 0x13f   :  { %v1591_v38 = vpop.eup %1590 }
 0x140   :  { %v1593_v40 = vpop.eup %1592  ;;  %v127_v41 = vmul.f32 %v1591_v38, %v111_v11  ;;  %v99_v42 = vadd.f32 %v1348_v36, %v92_v37  ;;  %v1831_v11 = vand.u32 127, %v283_v10 }
 0x141   :  { %v126_v43 = vmul.f32 %v1593_v40, %v110_v16 }
 0x142   :  { %v135_v45 = vmul.f32 %v1349_v39, %v127_v41  ;;  %v144_v46 = vpack.c.bf16 %v99_v42, %v99_v42  ;;  %vm303_vm3 = vcmp.ge.s32.totalorder %v1831_v11, 8  ;;  %vm306_vm4 = vcmp.lt.s32.totalorder %v1831_v11, 13 }
 0x143   :  { %v134_v47 = vmul.f32 %v1349_v39, %v126_v43  ;;  %vm294_vm5 = vcmp.lt.s32.totalorder %v1831_v11, 5  ;;  %vm1836_vm7 = vmand %vm303_vm3, %vm306_vm4 }
 0x144   :  { %1444 = vmatmul.mubr.msk.bf16.vlgmr.msra.gmra.mrb[0].mxu0 %vm71_vm0, %v144_v46  ;;  %v143_v51 = vadd.f32 %v1350_v48, %v135_v45 }
 0x145   :  { %1448 = vmatpush3.bf16.msra.mxu0 %v1574_v44  ;;  %1451 = vmatprep.mubr.msk.bf16.mxu0 %vm1635_vm1, %v1634_v22  ;;  %v142_v50 = vadd.f32 %v1350_v48, %v134_v47 }
 0x146   :  { %1449 = vmatprep.subr.bf16.mxu0 %v1634_v22 }
 0x147   :  { %v212_v52 = vpack.c.bf16 %v143_v51, %v142_v50 }
 0x149   :  { %1450 = vmatpush3.bf16.msra.mxu0 %v1575_v49 }
 0x14a   :  { %1455 = vmatprep.subr.bf16.mxu0 %v1634_v22 }
 0x14c   :  { %1452 = vmatmul.mubr.msk.bf16.vlgmr.msra.gmra.mrb[4].mxu0 %vm71_vm0, %v212_v52 }
 0x14d   :  { %1457 = vmatprep.mubr.msk.bf16.mxu0 %vm1635_vm1, %v1634_v22 }
 0x217   :  { %v205_v54 = vpop.f32.mrb[0].mxu0 }
 0x218   :  { %v1445_v55 = vpop.f32.mrb[1].mxu0  ;;  %v206_v57 = vadd.f32 %v1351_v53, %v205_v54 }
 0x219   :  { %v208_v56 = vpop.f32.mrb[2].mxu0 }
 0x21a   :  { %v209_v58 = vadd.f32 %v1351_v53, %v208_v56  ;;  %v1446_v59 = vpop.f32.mrb[3].mxu0 }
 0x21c   :  { %v1810_v60 = vpack.c.bf16 %v209_v58, %v206_v57 }
 0x21e   :  { %440 = vrot.lane.b32.xlu1 %v1810_v60, %s1636_s29 }
 0x21f   :  { %v273_v62 = vpop.f32.mrb[4].mxu0 }
 0x220   :  { %v1453_v63 = vpop.f32.mrb[5].mxu0  ;;  %v274_v2 = vadd.f32 %v1355_v61, %v273_v62 }
 0x221   :  { %v276_v1 = vpop.f32.mrb[6].mxu0 }
 0x222   :  { %v277_v3 = vadd.f32 %v1355_v61, %v276_v1  ;;  %v1454_v4 = vpop.f32.mrb[7].mxu0 }
 0x224   :  { %v1816_v5 = vpack.c.bf16 %v277_v3, %v274_v2 }
 0x226   :  { %442 = vrot.lane.b32.xlu0 %v1816_v5, %s1636_s29  ;;  %v318_v6 = vsel %vm313_vm2, %v1816_v5, 0 }
 0x227   :  { %1456 = vmatpush3.bf16.xpose.msra.mxu0 %v318_v6 }
 0x228   :  { %1467 = vmatprep.subr.bf16.mxu0 %v1634_v22 }
 0x22e   :  { %1458 = vmatmul.mubr.msk.bf16.vlgmr.msra.gmra.mrb[8].mxu0 %vm313_vm2, %v1810_v60 }
 0x22f   :  { %1469 = vmatprep.mubr.msk.bf16.mxu0 %vm1635_vm1, %v1634_v22 }
 0x290   :  { %v441_v9 = vpop.permute.xlu1 %440 }
 0x298   :  { %v443_v7 = vpop.permute.xlu0 %442 }
 0x299   :  { %v448_v8 = vsel %vm313_vm2, %v443_v7, 0 }
 0x29a   :  { %1468 = vmatpush3.bf16.xpose.msra.mxu0 %v448_v8 }
 0x29b   :  { %1479 = vmatprep.subr.bf16.mxu0 %v1634_v22 }
 0x2a1   :  { %1470 = vmatmul.mubr.msk.bf16.vlgmr.msra.gmra.mrb[12].mxu0 %vm313_vm2, %v441_v9  ;;  %v438_v9 = vld [vmem:[%s2046_s10] sm:$0xf] }
 0x2a2   :  { %1481 = vmatprep.mubr.msk.bf16.mxu0 %vm1635_vm1, %v1634_v22  ;;  %v620_v10 = vsel %vm571_vm8, %v438_v9, 0 }
 0x301   :  { %v354_v12 = vpop.f32.mrb[8].mxu0 }
 0x302   :  { %v361_v13 = vmul.f32 0.35355338, %v354_v12  ;;  %v1459_v14 = vpop.f32.mrb[9].mxu0  ;;  %v1363_v12 = vld [vmem:[%s2046_s10 + $0x4] sm:$0xf] }
 0x303   :  { %v357_v15 = vpop.f32.mrb[10].mxu0 }
 0x304   :  { %v362_v17 = vmul.f32 0.35355338, %v357_v15  ;;  %v1460_v18 = vpop.f32.mrb[11].mxu0  ;;  %v363_v19 = vsel %vm294_vm5, %v361_v13, -1e+09  ;;  %v573_v13 = vsel %vm571_vm8, %v1363_v12, 0 }
 0x305   :  { %v366_v20 = vsel %vm365_vm6, %v363_v19, -inf  ;;  %1480 = vmatpush3.bf16.msra.mxu0 %v573_v13 }
 0x306   :  { %367 = vmax.xlane.f32.xlu1 %v366_v20  ;;  %v364_v21 = vsel %vm1836_vm7, %v362_v17, -1e+09  ;;  %1491 = vmatprep.subr.bf16.mxu0 %v1634_v22 }
 0x307   :  { %v369_v23 = vsel %vm365_vm6, %v364_v21, -inf }
 0x308   :  { %370 = vmax.xlane.f32.xlu0 %v369_v23 }
 0x374   :  { %v484_v24 = vpop.f32.mrb[12].mxu0 }
 0x375   :  { %v491_v25 = vmul.f32 0.35355338, %v484_v24  ;;  %v1471_v26 = vpop.f32.mrb[13].mxu0 }
 0x376   :  { %v487_v27 = vpop.f32.mrb[14].mxu0 }
 0x377   :  { %v492_v28 = vmul.f32 0.35355338, %v487_v27  ;;  %v1472_v29 = vpop.f32.mrb[15].mxu0  ;;  %v493_v30 = vsel %vm294_vm5, %v491_v25, -1e+09 }
 0x378   :  { %v495_v31 = vsel %vm365_vm6, %v493_v30, -inf }
 0x379   :  { %496 = vmax.xlane.f32.xlu0 %v495_v31  ;;  %v494_v32 = vsel %vm1836_vm7, %v492_v28, -1e+09 }
 0x37a   :  { %v498_v33 = vsel %vm365_vm6, %v494_v32, -inf }
 0x37b   :  { %499 = vmax.xlane.f32.xlu1 %v498_v33 }
 0x393   :  { %v368_v34 = vpop.xlane.xlu1 %367 }
 0x394   :  { %v372_v35 = vsub.f32 %v363_v19, %v368_v34 }
 0x395   :  { %v371_v36 = vpop.xlane.xlu0 %370 }
 0x396   :  { %v374_v37 = vmul.f32 1.442695, %v372_v35  ;;  %v373_v38 = vsub.f32 %v364_v21, %v371_v36 }
 0x398   :  { %1594 = vpow2.f32 %v374_v37  ;;  %v376_v39 = vmul.f32 1.442695, %v373_v38 }
 0x39a   :  { %1596 = vpow2.f32 %v376_v39 }
 0x3a2   :  { %v1595_v40 = vpop.eup %1594 }
 0x3a3   :  { %v378_v41 = vsel %vm365_vm6, %v1595_v40, 0.0 }
 0x3a4   :  { %v1597_v42 = vpop.eup %1596  ;;  %379 = vadd.xlane.f32.xlu0 %v378_v41 }
 0x3a5   :  { %v381_v43 = vsel %vm365_vm6, %v1597_v42, 0.0 }
 0x3a6   :  { %382 = vadd.xlane.f32.xlu1 %v381_v43 }
 0x406   :  { %v497_v44 = vpop.xlane.xlu0 %496 }
 0x407   :  { %v501_v45 = vsub.f32 %v493_v30, %v497_v44 }
 0x408   :  { %v500_v46 = vpop.xlane.xlu1 %499 }
 0x409   :  { %v503_v47 = vmul.f32 1.442695, %v501_v45  ;;  %v502_v48 = vsub.f32 %v494_v32, %v500_v46 }
 0x40b   :  { %1598 = vpow2.f32 %v503_v47  ;;  %v505_v49 = vmul.f32 1.442695, %v502_v48 }
 0x40d   :  { %1600 = vpow2.f32 %v505_v49 }
 0x415   :  { %v1599_v50 = vpop.eup %1598 }
 0x416   :  { %v507_v51 = vsel %vm365_vm6, %v1599_v50, 0.0 }
 0x417   :  { %v1601_v52 = vpop.eup %1600  ;;  %508 = vadd.xlane.f32.xlu0 %v507_v51 }
 0x418   :  { %v510_v53 = vsel %vm365_vm6, %v1601_v52, 0.0 }
 0x419   :  { %511 = vadd.xlane.f32.xlu1 %v510_v53 }
 0x42a   :  { %518 = vrot.lane.b32.xlu1 %v1816_v5, %s1637_s7 }
 0x42d   :  { %390 = vrot.lane.b32.xlu0 %v1816_v5, %s1638_s9 }
 0x42e   :  { %665 = vrot.lane.b32.xlu1 %v1816_v5, %s1639_s21 }
 0x431   :  { %v380_v55 = vpop.xlane.xlu0 %379 }
 0x432   :  { %663 = vrot.lane.b32.xlu1 %v1810_v60, %s1639_s21 }
 0x433   :  { %v383_v54 = vpop.xlane.xlu1 %382 }
 0x434   :  { %1602 = vrcp.f32 %v383_v54 }
 0x435   :  { %1604 = vrcp.f32 %v380_v55 }
 0x43e   :  { %v1603_v56 = vpop.eup %1602 }
 0x43f   :  { %v1605_v58 = vpop.eup %1604  ;;  %v387_v61 = vmul.f32 %v1603_v56, %v1597_v42 }
 0x440   :  { %v386_v63 = vmul.f32 %v1605_v58, %v1595_v40 }
 0x442   :  { %v388_v1 = vpack.c.bf16 %v387_v61, %v386_v63 }
 0x4a4   :  { %v509_v57 = vpop.xlane.xlu0 %508 }
 0x4a5   :  { %1606 = vrcp.f32 %v509_v57 }
 0x4a6   :  { %v512_v59 = vpop.xlane.xlu1 %511 }
 0x4a7   :  { %1608 = vrcp.f32 %v512_v59 }
 0x4a8   :  { %v391_v62 = vpop.permute.xlu0 %390 }
 0x4a9   :  { %1462 = vmatpush3.bf16.msra.mxu1 %v391_v62 }
 0x4aa   :  { %1473 = vmatprep.subr.bf16.mxu1 %v1634_v22  ;;  %v519_v2 = vpop.permute.xlu1 %518 }
 0x4ac   :  { %1464 = vmatmul.mubr.msk.bf16.vlgmr.msra.gmra.mrb[0].mxu1 %vm365_vm6, %v388_v1 }
 0x4ad   :  { %1474 = vmatpush3.bf16.msra.mxu1 %v519_v2  ;;  %1475 = vmatprep.mubr.msk.bf16.mxu1 %vm1635_vm1, %v1634_v22 }
 0x4ae   :  { %1485 = vmatprep.subr.bf16.mxu1 %v1634_v22  ;;  %v666_v23 = vpop.permute.xlu1 %665 }
 0x4af   :  { %v1607_v3 = vpop.eup %1606  ;;  %v671_v27 = vsel %vm313_vm2, %v666_v23, 0 }
 0x4b0   :  { %v515_v6 = vmul.f32 %v1607_v3, %v1599_v50 }
 0x4b1   :  { %v1609_v4 = vpop.eup %1608 }
 0x4b2   :  { %v516_v7 = vmul.f32 %v1609_v4, %v1601_v52  ;;  %v664_v28 = vpop.permute.xlu1 %663 }
 0x4b4   :  { %v517_v8 = vpack.c.bf16 %v516_v7, %v515_v6 }
 0x4b6   :  { %1476 = vmatmul.mubr.msk.bf16.vlgmr.msra.gmra.mrb[4].mxu1 %vm365_vm6, %v517_v8  ;;  %v1368_v8 = vld [vmem:[%s2046_s10 + $0x8] sm:$0xf] }
 0x4b7   :  { %1487 = vmatprep.mubr.msk.bf16.mxu1 %vm1635_vm1, %v1634_v22  ;;  %1486 = vmatpush3.bf16.msra.mxu1 %v620_v10  ;;  %v795_v9 = vsel %vm571_vm8, %v1368_v8, 0 }
 0x4b8   :  { %1497 = vmatprep.subr.bf16.mxu1 %v1634_v22 }
 0x57f   :  { %v430_v14 = vpop.f32.mrb[0].mxu1 }
 0x580   :  { %v1465_v15 = vpop.f32.mrb[1].mxu1 }
 0x581   :  { %v433_v17 = vpop.f32.mrb[2].mxu1 }
 0x582   :  { %v437_v18 = vpack.c.bf16 %v433_v17, %v430_v14  ;;  %v1466_v19 = vpop.f32.mrb[3].mxu1 }
 0x584   :  { %1488 = vmatmul.mubr.msk.bf16.vlgmr.msra.gmra.mrb[8].mxu1 %vm313_vm2, %v437_v18 }
 0x585   :  { %1499 = vmatprep.mubr.msk.bf16.mxu1 %vm1635_vm1, %v1634_v22 }
 0x589   :  { %v558_v20 = vpop.f32.mrb[4].mxu1 }
 0x58a   :  { %v1477_v21 = vpop.f32.mrb[5].mxu1 }
 0x58b   :  { %v561_v24 = vpop.f32.mrb[6].mxu1 }
 0x58c   :  { %v565_v25 = vpack.c.bf16 %v561_v24, %v558_v20  ;;  %v1478_v26 = vpop.f32.mrb[7].mxu1 }
 0x58e   :  { %1482 = vmatmul.mubr.msk.bf16.vlgmr.msra.gmra.mrb[16].mxu0 %vm313_vm2, %v565_v25 }
 0x58f   :  { %1492 = vmatpush3.bf16.xpose.msra.mxu0 %v671_v27  ;;  %1493 = vmatprep.mubr.msk.bf16.mxu0 %vm1635_vm1, %v1634_v22 }
 0x590   :  { %1503 = vmatprep.subr.bf16.mxu0 %v1634_v22 }
 0x596   :  { %1494 = vmatmul.mubr.msk.bf16.vlgmr.msra.gmra.mrb[20].mxu0 %vm313_vm2, %v664_v28 }
 0x597   :  { %1505 = vmatprep.mubr.msk.bf16.mxu0 %vm1635_vm1, %v1634_v22  ;;  %1504 = vmatpush3.bf16.msra.mxu0 %v795_v9 }
 0x598   :  { %1515 = vmatprep.subr.bf16.mxu0 %v1634_v22 }
 0x657   :  { %v656_v29 = vpop.f32.mrb[8].mxu1 }
 0x658   :  { %v1489_v30 = vpop.f32.mrb[9].mxu1 }
 0x659   :  { %v659_v31 = vpop.f32.mrb[10].mxu1 }
 0x65a   :  { %v1490_v32 = vpop.f32.mrb[11].mxu1 }
 0x661   :  { %v609_v33 = vpop.f32.mrb[16].mxu0 }
 0x662   :  { %v1889_v34 = vadd.f32 %v656_v29, %v609_v33  ;;  %v1483_v35 = vpop.f32.mrb[17].mxu0 }
 0x663   :  { %v612_v36 = vpop.f32.mrb[18].mxu0 }
 0x664   :  { %v1891_v37 = vadd.f32 %v659_v31, %v612_v36  ;;  %v1484_v38 = vpop.f32.mrb[19].mxu0 }
 0x669   :  { %v707_v39 = vpop.f32.mrb[20].mxu0 }
 0x66a   :  { %v714_v40 = vmul.f32 0.35355338, %v707_v39  ;;  %v1495_v41 = vpop.f32.mrb[21].mxu0 }
 0x66b   :  { %v710_v42 = vpop.f32.mrb[22].mxu0 }
 0x66c   :  { %v715_v43 = vmul.f32 0.35355338, %v710_v42  ;;  %v1496_v44 = vpop.f32.mrb[23].mxu0  ;;  %v716_v45 = vsel %vm294_vm5, %v714_v40, -1e+09 }
 0x66d   :  { %v718_v46 = vsel %vm365_vm6, %v716_v45, -inf }
 0x66e   :  { %719 = vmax.xlane.f32.xlu0 %v718_v46  ;;  %v717_v47 = vsel %vm1836_vm7, %v715_v43, -1e+09 }
 0x66f   :  { %v721_v48 = vsel %vm365_vm6, %v717_v47, -inf }
 0x670   :  { %722 = vmax.xlane.f32.xlu1 %v721_v48 }
 0x681   :  { %842 = vrot.lane.b32.xlu1 %v1816_v5, %s1640_s6 }
 0x685   :  { %840 = vrot.lane.b32.xlu1 %v1810_v60, %s1640_s6 }
 0x6fb   :  { %v720_v49 = vpop.xlane.xlu0 %719 }
 0x6fc   :  { %v724_v50 = vsub.f32 %v716_v45, %v720_v49 }
 0x6fd   :  { %v723_v51 = vpop.xlane.xlu1 %722 }
 0x6fe   :  { %v726_v52 = vmul.f32 1.442695, %v724_v50  ;;  %v725_v53 = vsub.f32 %v717_v47, %v723_v51 }
 0x700   :  { %1610 = vpow2.f32 %v726_v52  ;;  %v728_v54 = vmul.f32 1.442695, %v725_v53 }
 0x701   :  { %v843_v3 = vpop.permute.xlu1 %842 }
 0x702   :  { %1612 = vpow2.f32 %v728_v54  ;;  %v848_v6 = vsel %vm313_vm2, %v843_v3, 0 }
 0x705   :  { %v841_v7 = vpop.permute.xlu1 %840 }
 0x70a   :  { %v1611_v55 = vpop.eup %1610 }
 0x70b   :  { %v730_v56 = vsel %vm365_vm6, %v1611_v55, 0.0 }
 0x70c   :  { %v1613_v57 = vpop.eup %1612  ;;  %731 = vadd.xlane.f32.xlu0 %v730_v56 }
 0x70d   :  { %v733_v58 = vsel %vm365_vm6, %v1613_v57, 0.0 }
 0x710   :  { %734 = vadd.xlane.f32.xlu0 %v733_v58 }
 0x726   :  { %741 = vrot.lane.b32.xlu0 %v1816_v5, %s1641_s25 }
 0x799   :  { %v732_v60 = vpop.xlane.xlu0 %731 }
 0x79a   :  { %1614 = vrcp.f32 %v732_v60 }
 0x79d   :  { %v735_v59 = vpop.xlane.xlu0 %734 }
 0x79e   :  { %1616 = vrcp.f32 %v735_v59 }
 0x7a1   :  { %v742_v61 = vpop.permute.xlu0 %741 }
 0x7a2   :  { %1498 = vmatpush3.bf16.msra.mxu1 %v742_v61 }
 0x7a3   :  { %1509 = vmatprep.subr.bf16.mxu1 %v1634_v22 }
 0x7a4   :  { %v1615_v62 = vpop.eup %1614 }
 0x7a5   :  { %v738_v1 = vmul.f32 %v1615_v62, %v1611_v55 }
 0x7a8   :  { %v1617_v63 = vpop.eup %1616 }
 0x7a9   :  { %v739_v2 = vmul.f32 %v1617_v63, %v1613_v57  ;;  %v1374_v57 = vld [vmem:[%s2047_s11] ss:$0 sm:$0xff] }
 0x7ab   :  { %v740_v4 = vpack.c.bf16 %v739_v2, %v738_v1 }
 0x7ad   :  { %1500 = vmatmul.mubr.msk.bf16.vlgmr.msra.gmra.mrb[12].mxu1 %vm365_vm6, %v740_v4 }
 0x7ae   :  { %1510 = vmatpush3.bf16.xpose.msra.mxu1 %v848_v6  ;;  %1511 = vmatprep.mubr.msk.bf16.mxu1 %vm1635_vm1, %v1634_v22 }
 0x7af   :  { %1521 = vmatprep.subr.bf16.mxu1 %v1634_v22 }
 0x7b5   :  { %1512 = vmatmul.mubr.msk.bf16.vlgmr.msra.gmra.mrb[16].mxu1 %vm313_vm2, %v841_v7 }
 0x7b6   :  { %1523 = vmatprep.mubr.msk.bf16.mxu1 %vm1635_vm1, %v1634_v22 }
 0x880   :  { %v781_v10 = vpop.f32.mrb[12].mxu1 }
 0x881   :  { %v1501_v12 = vpop.f32.mrb[13].mxu1 }
 0x882   :  { %v784_v13 = vpop.f32.mrb[14].mxu1 }
 0x883   :  { %v788_v14 = vpack.c.bf16 %v784_v13, %v781_v10  ;;  %v1502_v15 = vpop.f32.mrb[15].mxu1 }
 0x885   :  { %1506 = vmatmul.mubr.msk.bf16.vlgmr.msra.gmra.mrb[24].mxu0 %vm313_vm2, %v788_v14 }
 0x886   :  { %1517 = vmatprep.mubr.msk.bf16.mxu0 %vm1635_vm1, %v1634_v22 }
 0x888   :  { %v884_v17 = vpop.f32.mrb[16].mxu1 }
 0x889   :  { %v891_v18 = vmul.f32 0.35355338, %v884_v17  ;;  %v1513_v19 = vpop.f32.mrb[17].mxu1 }
 0x88a   :  { %v887_v20 = vpop.f32.mrb[18].mxu1  ;;  %v1577_v19 = vld [vmem:[%s2048_s14 + $0x8] sm:$0xff]  }
 0x88b   :  { %v892_v21 = vmul.f32 0.35355338, %v887_v20  ;;  %v1514_v23 = vpop.f32.mrb[19].mxu1  ;;  %v893_v24 = vsel %vm294_vm5, %v891_v18, -1e+09  ;;  %v1576_v18 = vld [vmem:[%s2048_s14] sm:$0xff]  }
 0x88c   :  { %v895_v25 = vsel %vm365_vm6, %v893_v24, -inf }
 0x88d   :  { %896 = vmax.xlane.f32.xlu1 %v895_v25  ;;  %v894_v26 = vsel %vm1836_vm7, %v892_v21, -1e+09 }
 0x88e   :  { %v898_v27 = vsel %vm365_vm6, %v894_v26, -inf }
 0x88f   :  { %899 = vmax.xlane.f32.xlu0 %v898_v27 }
 0x89e   :  { %918 = vrot.lane.b32.xlu1 %v1816_v5, %s1642_s27  ;;  %v1372_v5 = vld [vmem:[%s2046_s10 + $0xc] sm:$0xf] }
 0x89f   :  { %v972_v39 = vsel %vm571_vm8, %v1372_v5, 0  ;;  %v1579_v5 = vld [vmem:[%s2051_s16 + $0x8] sm:$0xff]  }
 0x8a0   :  { %1522 = vmatpush3.bf16.msra.mxu1 %v972_v39  ;;  %v1580_v39 = vld [vmem:[%s2051_s16 + $0x10] sm:$0xff]  }
 0x8a1   :  { %1535 = vmatprep.subr.bf16.mxu1 %v1634_v22 }
 0x91a   :  { %v897_v28 = vpop.xlane.xlu1 %896 }
 0x91b   :  { %v901_v29 = vsub.f32 %v893_v24, %v897_v28 }
 0x91c   :  { %v900_v30 = vpop.xlane.xlu0 %899 }
 0x91d   :  { %v903_v31 = vmul.f32 1.442695, %v901_v29  ;;  %v902_v32 = vsub.f32 %v894_v26, %v900_v30  ;;  %v1375_v29 = vld [vmem:[%s2049_s12] ss:$0 sm:$0xff] }
 0x91e   :  { %v919_v33 = vpop.permute.xlu1 %918 }
 0x91f   :  { %1618 = vpow2.f32 %v903_v31  ;;  %v905_v11 = vmul.f32 1.442695, %v902_v32  ;;  %1516 = vmatpush3.bf16.msra.mxu0 %v919_v33  ;;  %v1376_v33 = vld [vmem:[%s2050_s13] ss:$0 sm:$0xff] }
 0x920   :  { %1527 = vmatprep.subr.bf16.mxu0 %v1634_v22 }
 0x921   :  { %1620 = vpow2.f32 %v905_v11 }
 0x929   :  { %v1619_v16 = vpop.eup %1618 }
 0x92a   :  { %v907_v35 = vsel %vm365_vm6, %v1619_v16, 0.0 }
 0x92b   :  { %v1621_v36 = vpop.eup %1620  ;;  %908 = vadd.xlane.f32.xlu0 %v907_v35 }
 0x92c   :  { %v910_v38 = vsel %vm365_vm6, %v1621_v36, 0.0 }
 0x92f   :  { %911 = vadd.xlane.f32.xlu0 %v910_v38  ;;  %v1578_v38 = vld [vmem:[%s2051_s16] sm:$0xff]  }
 0x958   :  { %v831_v40 = vpop.f32.mrb[24].mxu0 }
 0x959   :  { %v838_v41 = vadd.f32 %v831_v40, %v1889_v34  ;;  %v1507_v42 = vpop.f32.mrb[25].mxu0  ;;  %v1581_v40 = vld [vmem:[%s2051_s16 + $0x18] sm:$0xff]  }
 0x95a   :  { %v834_v43 = vpop.f32.mrb[26].mxu0  ;;  %v1583_v42 = vld [vmem:[%s2051_s16 + $0x28] sm:$0xff]  }
 0x95b   :  { %v839_v44 = vadd.f32 %v834_v43, %v1891_v37  ;;  %v1508_v45 = vpop.f32.mrb[27].mxu0  ;;  %v1584_v43 = vld [vmem:[%s2051_s16 + $0x30] sm:$0xff]  }
 0x95c   :  { %v1377_v45 = vld [vmem:[%s2052_s15] ss:$0 sm:$0xff] }
 0x9b8   :  { %v909_v46 = vpop.xlane.xlu0 %908 }
 0x9b9   :  { %1622 = vrcp.f32 %v909_v46 }
 0x9bc   :  { %v912_v47 = vpop.xlane.xlu0 %911 }
 0x9bd   :  { %1624 = vrcp.f32 %v912_v47 }
 0x9c3   :  { %v1623_v48 = vpop.eup %1622 }
 0x9c4   :  { %v915_v50 = vmul.f32 %v1623_v48, %v1619_v16 }
 0x9c7   :  { %v1625_v49 = vpop.eup %1624 }
 0x9c8   :  { %v916_v51 = vmul.f32 %v1625_v49, %v1621_v36 }
 0x9ca   :  { %v917_v52 = vpack.c.bf16 %v916_v51, %v915_v50 }
 0x9cc   :  { %1518 = vmatmul.mubr.msk.bf16.vlgmr.msra.gmra.mrb[28].mxu0 %vm365_vm6, %v917_v52 }
 0x9cd   :  { %1531 = vmatprep.mubr.msk.bf16.mxu0 %vm1635_vm1, %v1634_v22  ;;  %1528 = vmatpush3.bf16.msra.mxu0 %v1576_v18 }
 0x9ce   :  { %1529 = vmatprep.subr.bf16.mxu0 %v1634_v22 }
 0x9d1   :  { %1530 = vmatpush3.bf16.msra.mxu0 %v1577_v19 }
 0x9d2   :  { %1555 = vmatprep.subr.bf16.mxu0 %v1634_v22 }
 0xa9f   :  { %v958_v34 = vpop.f32.mrb[28].mxu0 }
 0xaa0   :  { %v1519_v53 = vpop.f32.mrb[29].mxu0 }
 0xaa1   :  { %v961_v54 = vpop.f32.mrb[30].mxu0 }
 0xaa2   :  { %v965_v55 = vpack.c.bf16 %v961_v54, %v958_v34  ;;  %v1520_v37 = vpop.f32.mrb[31].mxu0 }
 0xaa4   :  { %1524 = vmatmul.mubr.msk.bf16.vlgmr.msra.gmra.mrb[20].mxu1 %vm313_vm2, %v965_v55 }
 0xaa5   :  { %1551 = vmatprep.mubr.msk.bf16.mxu1 %vm1635_vm1, %v1634_v22  ;;  %1536 = vmatpush3.bf16.msra.mxu1 %v1578_v38 }
 0xaa6   :  { %1537 = vmatprep.subr.bf16.mxu1 %v1634_v22 }
 0xaa9   :  { %1538 = vmatpush3.bf16.msra.mxu1 %v1579_v5 }
 0xaaa   :  { %1539 = vmatprep.subr.bf16.mxu1 %v1634_v22 }
 0xaad   :  { %1540 = vmatpush3.bf16.msra.mxu1 %v1580_v39 }
 0xaae   :  { %1541 = vmatprep.subr.bf16.mxu1 %v1634_v22 }
 0xab1   :  { %1542 = vmatpush3.bf16.msra.mxu1 %v1581_v40 }
 0xab2   :  { %1543 = vmatprep.subr.bf16.mxu1 %v1634_v22 }
 0xb77   :  { %v1008_v56 = vpop.f32.mrb[20].mxu1 }
 0xb78   :  { %v1015_v58 = vadd.f32 %v1008_v56, %v838_v41  ;;  %v1525_v60 = vpop.f32.mrb[21].mxu1  ;;  %v1582_v41 = vld [vmem:[%s2051_s16 + $0x20] sm:$0xff]  }
 0xb79   :  { %v1011_v59 = vpop.f32.mrb[22].mxu1  ;;  %1544 = vmatpush3.bf16.msra.mxu1 %v1582_v41 }
 0xb7a   :  { %v1024_v61 = vadd.f32 %v1374_v57, %v1015_v58  ;;  %v1016_v62 = vadd.f32 %v1011_v59, %v839_v44  ;;  %v1526_v63 = vpop.f32.mrb[23].mxu1  ;;  %1545 = vmatprep.subr.bf16.mxu1 %v1634_v22  ;;  %v1585_v44 = vld [vmem:[%s2051_s16 + $0x38] sm:$0xff]  }
 0xb7c   :  { %v1948_v1 = vadd.f32 %v1024_v61, %v1751_v0  ;;  %v1025_v2 = vadd.f32 %v1374_v57, %v1016_v62 }
 0xb7d   :  { %1546 = vmatpush3.bf16.msra.mxu1 %v1583_v42 }
 0xb7e   :  { %v1951_v3 = vadd.f32 %v1025_v2, %v1751_v0  ;;  %v1030_v4 = vsel %vm71_vm0, %v1948_v1, 0.0  ;;  %1547 = vmatprep.subr.bf16.mxu1 %v1634_v22 }
 0xb7f   :  { %1031 = vadd.xlane.f32.xlu0 %v1030_v4 }
 0xb80   :  { %v1033_v6 = vsel %vm71_vm0, %v1951_v3, 0.0 }
 0xb81   :  { %1548 = vmatpush3.bf16.msra.mxu1 %v1584_v43 }
 0xb82   :  { %1549 = vmatprep.subr.bf16.mxu1 %v1634_v22 }
 0xb83   :  { %1034 = vadd.xlane.f32.xlu0 %v1033_v6 }
 0xb85   :  { %1550 = vmatpush3.bf16.msra.mxu1 %v1585_v44 }
 0xc0c   :  { %v1032_v7 = vpop.xlane.xlu0 %1031 }
 0xc0d   :  { %v1036_v8 = vmul.f32 0.03125, %v1032_v7 }
 0xc0f   :  { %v1038_v9 = vsub.f32 %v1948_v1, %v1036_v8 }
 0xc10   :  { %v1035_v10 = vpop.xlane.xlu0 %1034 }
 0xc11   :  { %v1037_v12 = vmul.f32 0.03125, %v1035_v10  ;;  %v1040_v13 = vmul.f32 %v1038_v9, %v1038_v9  ;;  %v1587_v10 = vld [vmem:[%s2053_s18 + $0x8] sm:$0xff]  }
 0xc13   :  { %v1039_v14 = vsub.f32 %v1951_v3, %v1037_v12  ;;  %v1042_v0 = vsel %vm71_vm0, %v1040_v13, 0.0  ;;  %v1381_v12 = vld [vmem:[%s2054_s17] ss:$0 sm:$0xff] }
 0xc14   :  { %1043 = vadd.xlane.f32.xlu0 %v1042_v0 }
 0xc15   :  { %v1041_v15 = vmul.f32 %v1039_v14, %v1039_v14 }
 0xc17   :  { %v1045_v17 = vsel %vm71_vm0, %v1041_v15, 0.0 }
 0xc18   :  { %1046 = vadd.xlane.f32.xlu0 %v1045_v17 }
 0xca1   :  { %v1044_v20 = vpop.xlane.xlu0 %1043 }
 0xca2   :  { %v1048_v21 = vmul.f32 0.03125, %v1044_v20 }
 0xca4   :  { %v1050_v23 = vadd.f32 1e-06, %v1048_v21  ;;  %v1390_v21 = vld [vmem:[%s2055_s19] ss:$0 sm:$0xff] }
 0xca5   :  { %v1047_v24 = vpop.xlane.xlu0 %1046 }
 0xca6   :  { %1626 = vrsqrt.f32 %v1050_v23  ;;  %v1049_v25 = vmul.f32 0.03125, %v1047_v24 }
 0xca8   :  { %v1051_v26 = vadd.f32 1e-06, %v1049_v25 }
 0xcaa   :  { %1628 = vrsqrt.f32 %v1051_v26 }
 0xcb0   :  { %v1627_v27 = vpop.eup %1626 }
 0xcb1   :  { %v1054_v28 = vmul.f32 %v1627_v27, %v1038_v9  ;;  %v1586_v9 = vld [vmem:[%s2053_s18] sm:$0xff]  }
 0xcb3   :  { %v1062_v31 = vmul.f32 %v1375_v29, %v1054_v28 }
 0xcb4   :  { %v1629_v30 = vpop.eup %1628 }
 0xcb5   :  { %v1055_v32 = vmul.f32 %v1629_v30, %v1039_v14  ;;  %v1070_v16 = vadd.f32 %v1376_v33, %v1062_v31 }
 0xcb7   :  { %v1063_v11 = vmul.f32 %v1375_v29, %v1055_v32 }
 0xcb9   :  { %v1071_v35 = vadd.f32 %v1376_v33, %v1063_v11 }
 0xcbb   :  { %v1072_v36 = vpack.c.bf16 %v1071_v35, %v1070_v16 }
 0xcbd   :  { %1532 = vmatmul.mubr.msk.bf16.vlgmr.msra.gmra.mrb[32].mxu0 %vm71_vm0, %v1072_v36 }
 0xcbe   :  { %1559 = vmatprep.mubr.msk.bf16.mxu0 %vm1635_vm1, %v1634_v22  ;;  %1556 = vmatpush3.bf16.msra.mxu0 %v1586_v9 }
 0xcbf   :  { %1557 = vmatprep.subr.bf16.mxu0 %v1634_v22 }
 0xcc2   :  { %1558 = vmatpush3.bf16.msra.mxu0 %v1587_v10 }
 0xd90   :  { %v1133_v46 = vpop.f32.mrb[32].mxu0 }
 0xd91   :  { %v1134_v47 = vadd.f32 %v1377_v45, %v1133_v46  ;;  %v1533_v48 = vpop.f32.mrb[33].mxu0 }
 0xd92   :  { %v1136_v49 = vpop.f32.mrb[34].mxu0 }
 0xd93   :  { %v1140_v50 = vmul.f32 %v1134_v47, %v1134_v47  ;;  %v1137_v51 = vadd.f32 %v1377_v45, %v1136_v49  ;;  %v1534_v52 = vpop.f32.mrb[35].mxu0 }
 0xd95   :  { %v1142_v34 = vmul.f32 %v1140_v50, %v1134_v47  ;;  %v1141_v53 = vmul.f32 %v1137_v51, %v1137_v51 }
 0xd97   :  { %v1144_v54 = vmul.f32 0.044715, %v1142_v34  ;;  %v1143_v55 = vmul.f32 %v1141_v53, %v1137_v51 }
 0xd99   :  { %v1146_v37 = vadd.f32 %v1144_v54, %v1134_v47  ;;  %v1145_v56 = vmul.f32 0.044715, %v1143_v55 }
 0xd9b   :  { %v1148_v57 = vmul.f32 0.7978846, %v1146_v37  ;;  %v1147_v58 = vadd.f32 %v1145_v56, %v1137_v51 }
 0xd9d   :  { %1630 = vtanh.f32 %v1148_v57  ;;  %v1149_v60 = vmul.f32 0.7978846, %v1147_v58 }
 0xd9f   :  { %1632 = vtanh.f32 %v1149_v60 }
 0xda7   :  { %v1631_v59 = vpop.eup %1630 }
 0xda8   :  { %v1152_v61 = vadd.f32 1.0, %v1631_v59 }
 0xda9   :  { %v1633_v62 = vpop.eup %1632 }
 0xdaa   :  { %v1154_v63 = vmul.f32 0.5, %v1152_v61  ;;  %v1153_v2 = vadd.f32 1.0, %v1633_v62 }
 0xdac   :  { %v1155_v4 = vmul.f32 0.5, %v1153_v2  ;;  %v1156_v6 = vmul.f32 %v1154_v63, %v1134_v47 }
 0xdae   :  { %v1157_v7 = vmul.f32 %v1155_v4, %v1137_v51 }
 0xdb0   :  { %v1158_v8 = vpack.c.bf16 %v1157_v7, %v1156_v6 }
 0xdb2   :  { %1552 = vmatmul.mubr.bf16.vlgmr.msra.gmra.mrb[24].mxu1 %v1158_v8 }
 0xe85   :  { %v1264_v13 = vpop.f32.mrb[24].mxu1 }
 0xe86   :  { %v1265_v14 = vadd.f32 %v1381_v12, %v1264_v13  ;;  %v1553_v0 = vpop.f32.mrb[25].mxu1 }
 0xe87   :  { %v1267_v15 = vpop.f32.mrb[26].mxu1 }
 0xe88   :  { %v1268_v17 = vadd.f32 %v1381_v12, %v1267_v15  ;;  %v1554_v18 = vpop.f32.mrb[27].mxu1  ;;  %v1271_v19 = vadd.f32 %v1265_v14, %v1948_v1 }
 0xe8a   :  { %v1272_v20 = vadd.f32 %v1268_v17, %v1951_v3 }
 0xe8c   :  { %v1273_v22 = vpack.c.bf16 %v1272_v20, %v1271_v19 }
 0xe8e   :  { %1560 = vmatmul.mubr.msk.bf16.vlgmr.msra.gmra.mrb[36].mxu0 %vm71_vm0, %v1273_v22 }
 0xf61   :  { %v1334_v23 = vpop.f32.mrb[36].mxu0 }
 0xf62   :  { %v1335_v24 = vadd.f32 %v1390_v21, %v1334_v23  ;;  %v1561_v25 = vpop.f32.mrb[37].mxu0 }
 0xf63   :  { %v1337_v26 = vpop.f32.mrb[38].mxu0 }
 0xf64   :  { %1341 = vst.msk [vmem:[%s2056_s20] sm:$0xff] %vm71_vm0, %v1335_v24  ;;  %v1338_v27 = vadd.f32 %v1390_v21, %v1337_v26  ;;  %v1562_v1 = vpop.f32.mrb[39].mxu0 }
 0xf66   :  { %1342 = vst.msk [vmem:[%s2056_s20 + $0x8] sm:$0xff] %vm71_vm0, %v1338_v27 }

// kernel: distributed_gpt3_pretrain_forward.7
= control target key start
LH: loop header
LB: loop body
LE: loop exit
PB: predicated region body
PF: predicated region fallthrough
CT: control target
= control target key end

     0   :  { %11 = vsyncpa [#allocation7], 0  ;;  %s891_s21 = smov 0   ;;  %s1094_s0 = inlined_call_operand.vmem [shape: f32[32,32], index: 0, kind: input, shape index: {}]   ;;  %s1095_s1 = inlined_call_operand.vmem [shape: f32[1,32], index: 1, kind: input, shape index: {}]   ;;  %s1096_s2 = inlined_call_operand.vmem [shape: f32[1,32], index: 2, kind: input, shape index: {}]   ;;  %s1097_s3 = inlined_call_operand.vmem [shape: bf16[128,32], index: 3, kind: input, shape index: {}]   ;;  %s1098_s4 = inlined_call_operand.vmem [shape: s32[32,1], index: 4, kind: input, shape index: {}]   ;;  %s1099_s5 = inlined_call_operand.vmem [shape: f32[32,1], index: 5, kind: input, shape index: {}]   ;;  %s1100_s6 = inlined_call_operand.hbm [shape: f32[1,1], index: 6, kind: output, shape index: {}]  }
   0x1 LB: > { %s897_s22 = sadd.s32 4294967295, %s849_s21   ;;  %p722_p0 = scmp.ge.s32.totalorder %s849_s21, 1  ;;  %s849_s21 = sphi %s891_s21, %s17_s21  }
   0x2   : > { %p209_p1 = scmp.lt.s32.totalorder %s849_s21, 3 }
   0x4   : > { %p210_p2 = pnand %p722_p0, %p209_p1 }
   0x5   : > { %s723_s23 = sshll.u32 (!%p210_p2), %s897_s22, 3  ;;  %p725_p4 = scmp.ne.s32.totalorder (!%p210_p2), %s897_s22, 0 }
   0x6   : > { %213 = sbr.rel (%p210_p2) target bundleno = 1346 (0x542), region = 44  ;;  %p235_p3 = scmp.lt.s32.totalorder (!%p210_p2), %s723_s23, 15 }
   0xd   : > { %s1102_s23 = smov (!%p235_p3, %s723_s23), 15  ;;  %244 = sbr.rel (%p725_p4) target bundleno = 337 (0x151), region = 48 }
   0xe   : > { %s724_s24 = sshll.u32 %s1102_s23, 2  ;;  %v245_v0 = vld [vmem:[%s1094_s0] sm:$0xff] (!%p725_p4)  ;;  %vm251_vm0 = vcmask (!%p725_p4), 261120   ;;  %v247_v1 = vld [vmem:[%s1094_s0 + $0x10] sm:$0xff] (!%p725_p4)  ;;  %v246_v2 = vld [vmem:[%s1094_s0 + $0x8] sm:$0xff] (!%p725_p4)  ;;  %vm329_vm1 = vcmask (!%p725_p4), 7168  }
   0xf   : > { %s905_s27 = scalar_lea.vmem %s1097_s3, %s724_s24  ;;  %v252_v3 = vsel (!%p725_p4), %vm251_vm0, %v245_v0, 0.0  ;;  %v258_v4 = vsel (!%p725_p4), %vm251_vm0, %v247_v1, 0.0  ;;  %v248_v5 = vld [vmem:[%s1094_s0 + $0x18] sm:$0xff] (!%p725_p4)  ;;  %v255_v6 = vsel (!%p725_p4), %vm251_vm0, %v246_v2, 0.0  ;;  %v851_v28 = vmov (!%p725_p4), -1e+30  }
  0x10   : > { %253 = vadd.xlane.f32.xlu0 (!%p725_p4), %v252_v3  ;;  %259 = vadd.xlane.f32.xlu1 (!%p725_p4), %v258_v4  ;;  %v261_v7 = vsel (!%p725_p4), %vm251_vm0, %v248_v5, 0.0  ;;  %330 = vst.msk [vmem:[#allocation3] sm:$0xff] (!%p725_p4), %vm329_vm1, %v851_v28  ;;  %331 = vst.msk [vmem:[#allocation3 + $0x8] sm:$0xff] (!%p725_p4), %vm329_vm1, %v851_v28  ;;  %v852_v29 = vmov (!%p725_p4), 0.0   ;;  %v726_v43 = vld [vmem:[%s1095_s1] ss:$0 sm:$0xff] (!%p725_p4) }
  0x11   : > { %332 = vst.msk [vmem:[#allocation3 + $0x10] sm:$0xff] (!%p725_p4), %vm329_vm1, %v851_v28  ;;  %333 = vst.msk [vmem:[#allocation3 + $0x18] sm:$0xff] (!%p725_p4), %vm329_vm1, %v851_v28  ;;  %v727_v45 = vld [vmem:[%s1096_s2] ss:$0 sm:$0xff] (!%p725_p4) }
  0x12   : > { %334 = vst.msk [vmem:[#allocation4] sm:$0xff] (!%p725_p4), %vm329_vm1, %v852_v29  ;;  %335 = vst.msk [vmem:[#allocation4 + $0x8] sm:$0xff] (!%p725_p4), %vm329_vm1, %v852_v29 }
  0x13   : > { %336 = vst.msk [vmem:[#allocation4 + $0x10] sm:$0xff] (!%p725_p4), %vm329_vm1, %v852_v29  ;;  %337 = vst.msk [vmem:[#allocation4 + $0x18] sm:$0xff] (!%p725_p4), %vm329_vm1, %v852_v29 }
  0x14   : > { %256 = vadd.xlane.f32.xlu0 %v255_v6  ;;  %262 = vadd.xlane.f32.xlu1 %v261_v7  ;;  %338 = vst.msk [vmem:[#allocation5] sm:$0xff] %vm329_vm1, %v852_v29  ;;  %339 = vst.msk [vmem:[#allocation5 + $0x8] sm:$0xff] %vm329_vm1, %v852_v29 }
  0x15   : > { %340 = vst.msk [vmem:[#allocation5 + $0x10] sm:$0xff] %vm329_vm1, %v852_v29  ;;  %341 = vst.msk [vmem:[#allocation5 + $0x18] sm:$0xff] %vm329_vm1, %v852_v29 }
  0x9d   : > { %v254_v8 = vpop.xlane.xlu0 %253  ;;  %v260_v9 = vpop.xlane.xlu1 %259 }
  0x9e   : > { %v265_v10 = vmul.f32 0.03125, %v254_v8  ;;  %v267_v11 = vmul.f32 0.03125, %v260_v9 }
  0xa0   : > { %v269_v12 = vsub.f32 %v245_v0, %v265_v10  ;;  %v271_v13 = vsub.f32 %v247_v1, %v267_v11 }
  0xa1   : > { %v257_v14 = vpop.xlane.xlu0 %256  ;;  %v263_v15 = vpop.xlane.xlu1 %262 }
  0xa2   : > { %v266_v16 = vmul.f32 0.03125, %v257_v14  ;;  %v268_v17 = vmul.f32 0.03125, %v263_v15  ;;  %v273_v18 = vmul.f32 %v269_v12, %v269_v12  ;;  %v275_v19 = vmul.f32 %v271_v13, %v271_v13 }
  0xa4   : > { %v270_v20 = vsub.f32 %v246_v2, %v266_v16  ;;  %v272_v21 = vsub.f32 %v248_v5, %v268_v17  ;;  %v277_v22 = vsel %vm251_vm0, %v273_v18, 0.0  ;;  %v283_v23 = vsel %vm251_vm0, %v275_v19, 0.0 }
  0xa5   : > { %278 = vadd.xlane.f32.xlu0 %v277_v22 }
  0xa6   : > { %v274_v24 = vmul.f32 %v270_v20, %v270_v20  ;;  %v276_v25 = vmul.f32 %v272_v21, %v272_v21 }
  0xa8   : > { %v280_v26 = vsel %vm251_vm0, %v274_v24, 0.0  ;;  %v286_v27 = vsel %vm251_vm0, %v276_v25, 0.0 }
  0xa9   : > { %284 = vadd.xlane.f32.xlu0 %v283_v23  ;;  %281 = vadd.xlane.f32.xlu1 %v280_v26 }
  0xad   : > { %287 = vadd.xlane.f32.xlu1 %v286_v27 }
 0x132   : > { %v279_v30 = vpop.xlane.xlu0 %278 }
 0x133   : > { %v289_v31 = vmul.f32 0.03125, %v279_v30 }
 0x135   : > { %v293_v32 = vadd.f32 1e-06, %v289_v31 }
 0x136   : > { %v282_v33 = vpop.xlane.xlu1 %281  ;;  %v285_v34 = vpop.xlane.xlu0 %284 }
 0x137   : > { %787 = vrsqrt.f32 %v293_v32  ;;  %v290_v35 = vmul.f32 0.03125, %v282_v33  ;;  %v291_v36 = vmul.f32 0.03125, %v285_v34 }
 0x139   : > { %v294_v37 = vadd.f32 1e-06, %v290_v35  ;;  %v295_v38 = vadd.f32 1e-06, %v291_v36 }
 0x13a   : > { %v288_v39 = vpop.xlane.xlu1 %287 }
 0x13b   : > { %789 = vrsqrt.f32 %v294_v37  ;;  %v292_v40 = vmul.f32 0.03125, %v288_v39 }
 0x13c   : > { %791 = vrsqrt.f32 %v295_v38 }
 0x13d   : > { %v296_v41 = vadd.f32 1e-06, %v292_v40 }
 0x13f   : > { %793 = vrsqrt.f32 %v296_v41 }
 0x141   : > { %v788_v42 = vpop.eup %787 }
 0x142   : > { %v301_v44 = vmul.f32 %v788_v42, %v269_v12 }
 0x144   : > { %v311_v46 = vmul.f32 %v726_v43, %v301_v44 }
 0x145   : > { %v790_v47 = vpop.eup %789 }
 0x146   : > { %v792_v48 = vpop.eup %791  ;;  %v321_v49 = vadd.f32 %v727_v45, %v311_v46  ;;  %v302_v50 = vmul.f32 %v790_v47, %v270_v20 }
 0x147   : > { %v303_v51 = vmul.f32 %v792_v48, %v271_v13 }
 0x148   : > { %325 = vst.msk [vmem:[#allocation2] sm:$0xff] %vm251_vm0, %v321_v49  ;;  %v312_v52 = vmul.f32 %v726_v43, %v302_v50 }
 0x149   : > { %v794_v53 = vpop.eup %793  ;;  %v313_v54 = vmul.f32 %v726_v43, %v303_v51 }
 0x14a   : > { %v322_v55 = vadd.f32 %v727_v45, %v312_v52  ;;  %v304_v56 = vmul.f32 %v794_v53, %v272_v21 }
 0x14b   : > { %v323_v57 = vadd.f32 %v727_v45, %v313_v54 }
 0x14c   : > { %326 = vst.msk [vmem:[#allocation2 + $0x8] sm:$0xff] %vm251_vm0, %v322_v55  ;;  %v314_v58 = vmul.f32 %v726_v43, %v304_v56 }
 0x14d   : > { %327 = vst.msk [vmem:[#allocation2 + $0x10] sm:$0xff] %vm251_vm0, %v323_v57 }
 0x14e   : > { %v324_v59 = vadd.f32 %v727_v45, %v314_v58 }
 0x150   : > { %328 = vst.msk [vmem:[#allocation2 + $0x18] sm:$0xff] %vm251_vm0, %v324_v59 }
 0x151 PF: > { %v797_v60 = vld [vmem:[%s905_s27] sm:$0xff]   ;;  %vm376_vm2 = vcmask 261120   ;;  %v798_v61 = vld [vmem:[%s905_s27 + $0x8] sm:$0xff]   ;;  %v799_v3 = vld [vmem:[%s905_s27 + $0x10] sm:$0xff]   ;;  %vm448_vm3 = vcmask 523264   ;;  %v853_v18 = vmov 0   ;;  %v543_v42 = vlaneseq }
 0x152   : > { %758 = vmatprep.subr.msk.bf16.mxu0 %vm376_vm2, %v797_v60  ;;  %v384_v62 = vsel %vm376_vm2, %v797_v60, 0  ;;  %v342_v63 = vld [vmem:[#allocation2] sm:$0xff]  ;;  %v387_v2 = vsel %vm376_vm2, %v798_v61, 0  ;;  %v390_v4 = vsel %vm376_vm2, %v799_v3, 0  ;;  %v800_v5 = vld [vmem:[%s905_s27 + $0x18] sm:$0xff]   ;;  %796 = vset.pattern.permute.xlu1 %v853_v18  ;;  %vm533_vm4 = vcmask 7168  }
 0x153   : > { %747 = vmatpush3.bf16.xpose.msra.mxu0 %v384_v62  ;;  %v343_v0 = vld [vmem:[#allocation2 + $0x8] sm:$0xff]  ;;  %v393_v6 = vsel %vm376_vm2, %v800_v5, 0  ;;  %795 = vset.pattern.permute.xlu0 %v853_v18  ;;  %v551_v35 = vld [vmem:[%s1098_s4] sm:$0xff]  ;;  %v553_v37 = vld [vmem:[%s1098_s4 + $0x10] sm:$0xff]  ;;  %s734_s26 = sshll.u32 %s897_s22, 6  ;;  %v544_v46 = vand.u32 127, %v543_v42 }
 0x154   : > { %759 = vmatprep.subr.msk.bf16.mxu0 %vm376_vm2, %v798_v61  ;;  %v346_v1 = vpack.c.bf16 %v343_v0, %v342_v63  ;;  %v344_v7 = vld [vmem:[#allocation2 + $0x10] sm:$0xff]  ;;  %v970_v20 = vld [vmem:[#allocation3] sm:$0xff]  ;;  %v985_v27 = vld [vmem:[#allocation3 + $0x8] sm:$0xff]  ;;  %v545_v49 = vstv %s734_s26  ;;  %p735_p5 = scmp.ne.s32.totalorder %s897_s22, 1 }
 0x155   : > { %v968_v19 = vld [vmem:[#allocation3 + $0x10] sm:$0xff]  ;;  %v978_v25 = vld [vmem:[#allocation3 + $0x18] sm:$0xff]  ;;  %v552_v36 = vld [vmem:[%s1098_s4 + $0x8] sm:$0xff]  ;;  %v546_v52 = vadd.s32 %v545_v49, %v544_v46  ;;  %s854_s13 = smov (!%p735_p5), 1.0  }
 0x156   : > { %754 = vmatprep.mubr.msk.bf16.mxu0 %vm376_vm2, %v346_v1  ;;  %v554_v38 = vld [vmem:[%s1098_s4 + $0x18] sm:$0xff] }
 0x157   : > { %v345_v8 = vld [vmem:[#allocation2 + $0x18] sm:$0xff]  ;;  %v467_v18 = vld [vmem:[#allocation4 + $0x10] sm:$0xff] }
 0x158   : > { %v347_v9 = vpack.c.bf16 %v345_v8, %v344_v7 }
 0x15b   : > { %749 = vmatpush3.bf16.xpose.msra.mxu0 %v387_v2 }
 0x15c   : > { %760 = vmatprep.subr.msk.bf16.mxu0 %vm376_vm2, %v799_v3 }
 0x163   : > { %751 = vmatpush3.bf16.xpose.msra.mxu0 %v390_v4 }
 0x164   : > { %761 = vmatprep.subr.msk.bf16.mxu0 %vm376_vm2, %v800_v5 }
 0x16b   : > { %753 = vmatpush3.bf16.xpose.msra.mxu0 %v393_v6 }
 0x172   : > { %755 = vmatmul.mubr.msk.bf16.vlgmr.msra.gmra.mrb[0].mxu0 %vm376_vm2, %v347_v9 }
 0x245   : > { %v952_v10 = vpop.f32.mrb[0].mxu0 }
 0x246   : > { %v954_v11 = vpop.f32.mrb[1].mxu0  ;;  %v455_v12 = vsel %vm448_vm3, %v952_v10, -inf }
 0x247   : > { %456 = vmax.xlane.f32.xlu1 %v455_v12  ;;  %v958_v13 = vpop.f32.mrb[2].mxu0  ;;  %v449_v14 = vsel %vm448_vm3, %v954_v11, -inf }
 0x248   : > { %450 = vmax.xlane.f32.xlu0 %v449_v14  ;;  %v962_v15 = vpop.f32.mrb[3].mxu0  ;;  %v458_v16 = vsel %vm448_vm3, %v958_v13, -inf }
 0x249   : > { %v452_v17 = vsel %vm448_vm3, %v962_v15, -inf }
 0x24b   : > { %459 = vmax.xlane.f32.xlu1 %v458_v16 }
 0x24c   : > { %453 = vmax.xlane.f32.xlu0 %v452_v17 }
 0x2d4   : > { %v457_v21 = vpop.xlane.xlu1 %456 }
 0x2d5   : > { %v973_v22 = vmax.f32 %v968_v19, %v457_v21  ;;  %v451_v23 = vpop.xlane.xlu0 %450  ;;  %v548_v21 = vld [vmem:[#allocation5 + $0x8] sm:$0xff] }
 0x2d6   : > { %v976_v24 = vmax.f32 %v970_v20, %v451_v23 }
 0x2d7   : > { %v471_v26 = vsub.f32 %v968_v19, %v973_v22  ;;  %540 = vst.msk [vmem:[#allocation3 + $0x10] sm:$0xff] %vm533_vm4, %v973_v22  ;;  %497 = vperm.xlu1 %796, %v973_v22  }
 0x2d8   : > { %v469_v28 = vsub.f32 %v970_v20, %v976_v24  ;;  %538 = vst.msk [vmem:[#allocation3] sm:$0xff] %vm533_vm4, %v976_v24  ;;  %v460_v29 = vpop.xlane.xlu1 %459  ;;  %487 = vperm.xlu0 %795, %v976_v24  }
 0x2d9   : > { %v993_v30 = vmax.f32 %v978_v25, %v460_v29  ;;  %v454_v31 = vpop.xlane.xlu0 %453  ;;  %v477_v12 = vmul.f32 1.442695, %v471_v26  ;;  %v465_v26 = vld [vmem:[#allocation4] sm:$0xff] }
 0x2da   : > { %v996_v32 = vmax.f32 %v985_v27, %v454_v31 }
 0x2db   : > { %v472_v33 = vsub.f32 %v978_v25, %v993_v30  ;;  %541 = vst.msk [vmem:[#allocation3 + $0x18] sm:$0xff] %vm533_vm4, %v993_v30  ;;  %502 = vperm.xlu1 %796, %v993_v30   ;;  %v466_v25 = vld [vmem:[#allocation4 + $0x8] sm:$0xff] }
 0x2dc   : > { %v470_v34 = vsub.f32 %v985_v27, %v996_v32  ;;  %539 = vst.msk [vmem:[#allocation3 + $0x8] sm:$0xff] %vm533_vm4, %v996_v32 }
 0x2de   : > { %v475_v14 = vmul.f32 1.442695, %v470_v34  ;;  %v468_v34 = vld [vmem:[#allocation4 + $0x18] sm:$0xff] }
 0x2df   : > { %492 = vperm.xlu1 %796, %v996_v32  }
 0x2e3   : > { %556 = vperm.xlu1 %796, %v551_v35  }
 0x2e7   : > { %559 = vperm.xlu1 %796, %v552_v36  }
 0x2eb   : > { %562 = vperm.xlu1 %796, %v553_v37  }
 0x2ef   : > { %565 = vperm.xlu1 %796, %v554_v38  }
 0x356   : > { %v498_v39 = vpop.permute.xlu1 %497 }
 0x357   : > { %v507_v40 = vsub.f32 %v952_v10, %v498_v39  ;;  %v488_v41 = vpop.permute.xlu0 %487  ;;  %v549_v39 = vld [vmem:[#allocation5 + $0x10] sm:$0xff] }
 0x358   : > { %v505_v43 = vsub.f32 %v954_v11, %v488_v41 }
 0x359   : > { %v513_v44 = vmul.f32 1.442695, %v507_v40 }
 0x35a   : > { %v503_v45 = vpop.permute.xlu1 %502  ;;  %v509_v47 = vmul.f32 1.442695, %v505_v43 }
 0x35b   : > { %801 = vpow2.f32 %v513_v44  ;;  %v508_v48 = vsub.f32 %v958_v13, %v503_v45  ;;  %v550_v44 = vld [vmem:[#allocation5 + $0x18] sm:$0xff] }
 0x35c   : > { %803 = vpow2.f32 %v509_v47 }
 0x35d   : > { %v515_v53 = vmul.f32 1.442695, %v508_v48 }
 0x35e   : > { %v493_v50 = vpop.permute.xlu1 %492 }
 0x35f   : > { %v506_v51 = vsub.f32 %v962_v15, %v493_v50 }
 0x361   : > { %v511_v54 = vmul.f32 1.442695, %v506_v51 }
 0x362   : > { %v557_v55 = vpop.permute.xlu1 %556 }
 0x363   : > { %805 = vpow2.f32 %v511_v54  ;;  %vm567_vm5 = vcmp.eq.s32.totalorder %v546_v52, %v557_v55  ;;  %v600_v54 = vld [vmem:[#allocation3 + $0x8] sm:$0xff] (!%p735_p5) }
 0x364   : > { %807 = vpow2.f32 %v515_v53  ;;  %v571_v56 = vsel %vm567_vm5, %v954_v11, 0.0 }
 0x365   : > { %v575_v57 = vsel %vm448_vm3, %v571_v56, 0.0  ;;  %v802_v58 = vpop.eup %801  ;;  %809 = vpow2.f32 %v477_v12  ;;  %v629_v12 = vld [vmem:[%s1099_s5 + $0x10] sm:$0xff] (!%p735_p5) }
 0x366   : > { %576 = vadd.xlane.f32.xlu0 %v575_v57  ;;  %v560_v59 = vpop.permute.xlu1 %559  ;;  %v523_v61 = vsel %vm448_vm3, %v802_v58, 0.0  ;;  %v804_v63 = vpop.eup %803  ;;  %v601_v57 = vld [vmem:[#allocation3 + $0x10] sm:$0xff] (!%p735_p5) }
 0x367   : > { %vm568_vm6 = vcmp.eq.s32.totalorder %v546_v52, %v560_v59  ;;  %v517_v2 = vsel %vm448_vm3, %v804_v63, 0.0 }
 0x368   : > { %v572_v60 = vsel %vm568_vm6, %v962_v15, 0.0  ;;  %v547_v15 = vld [vmem:[#allocation5] sm:$0xff] }
 0x369   : > { %v578_v62 = vsel %vm448_vm3, %v572_v60, 0.0 }
 0x36a   : > { %524 = vadd.xlane.f32.xlu0 %v523_v61  ;;  %579 = vadd.xlane.f32.xlu1 %v578_v62  ;;  %v563_v0 = vpop.permute.xlu1 %562  ;;  %v602_v61 = vld [vmem:[#allocation3 + $0x18] sm:$0xff] (!%p735_p5) }
 0x36b   : > { %vm569_vm7 = vcmp.eq.s32.totalorder %v546_v52, %v563_v0 }
 0x36c   : > { %v573_v6 = vsel %vm569_vm7, %v952_v10, 0.0  ;;  %v473_v10 = vmul.f32 1.442695, %v469_v28 }
 0x36d   : > { %v806_v1 = vpop.eup %805  ;;  %v581_v8 = vsel %vm448_vm3, %v573_v6, 0.0 }
 0x36e   : > { %v808_v3 = vpop.eup %807  ;;  %v566_v4 = vpop.permute.xlu1 %565  ;;  %518 = vadd.xlane.f32.xlu1 %v517_v2  ;;  %v520_v5 = vsel %vm448_vm3, %v806_v1, 0.0  ;;  %811 = vpow2.f32 %v473_v10 }
 0x36f   : > { %vm570_vm8 = vcmp.eq.s32.totalorder %v546_v52, %v566_v4  ;;  %521 = vadd.xlane.f32.xlu0 %v520_v5  ;;  %v526_v7 = vsel %vm448_vm3, %v808_v3, 0.0  ;;  %813 = vpow2.f32 %v475_v14  ;;  %v810_v16 = vpop.eup %809  ;;  %v599_v52 = vld [vmem:[#allocation3] sm:$0xff] (!%p735_p5) }
 0x370   : > { %v574_v9 = vsel %vm570_vm8, %v958_v13, 0.0  ;;  %v479_v13 = vmul.f32 1.442695, %v472_v33  ;;  %v483_v20 = vmul.f32 %v810_v16, %v467_v18  ;;  %v627_v4 = vld [vmem:[%s1099_s5] sm:$0xff] (!%p735_p5) }
 0x371   : > { %v584_v11 = vsel %vm448_vm3, %v574_v9, 0.0  ;;  %v651_v10 = vsel (!%p735_p5), %vm533_vm4, %v627_v4, 0.0 }
 0x372   : > { %527 = vadd.xlane.f32.xlu1 %v526_v7  ;;  %815 = vpow2.f32 %v479_v13 }
 0x373   : > { %582 = vadd.xlane.f32.xlu0 %v581_v8  ;;  %v628_v8 = vld [vmem:[%s1099_s5 + $0x8] sm:$0xff] (!%p735_p5) }
 0x374   : > { %v652_v14 = vsel (!%p735_p5), %vm533_vm4, %v628_v8, 0.0 }
 0x376   : > { %585 = vadd.xlane.f32.xlu1 %v584_v11 }
 0x378   : > { %v812_v22 = vpop.eup %811 }
 0x379   : > { %v814_v27 = vpop.eup %813  ;;  %v481_v30 = vmul.f32 %v812_v22, %v465_v26 }
 0x37a   : > { %v482_v33 = vmul.f32 %v814_v27, %v466_v25 }
 0x37c   : > { %v816_v31 = vpop.eup %815 }
 0x37d   : > { %v484_v38 = vmul.f32 %v816_v31, %v468_v34 }
 0x3f3   : > { %v577_v17 = vpop.xlane.xlu0 %576 }
 0x3f4   : > { %v587_v19 = vadd.f32 %v577_v17, %v547_v15  ;;  %v630_v15 = vld [vmem:[%s1099_s5 + $0x18] sm:$0xff] (!%p735_p5) }
 0x3f6   : > { %591 = vst.msk [vmem:[#allocation5] sm:$0xff] %vm533_vm4, %v587_v19 }
 0x3f7   : > { %v580_v23 = vpop.xlane.xlu1 %579  ;;  %v525_v24 = vpop.xlane.xlu0 %524 }
 0x3f8   : > { %v588_v28 = vadd.f32 %v580_v23, %v548_v21  ;;  %v531_v29 = vadd.f32 %v525_v24, %v483_v20  ;;  %v653_v20 = vadd.f32 (!%p735_p5), %v652_v14, %v651_v10  ;;  %v654_v24 = vsel (!%p735_p5), %vm533_vm4, %v629_v12, 0.0 }
 0x3fa   : > { %592 = vst.msk [vmem:[#allocation5 + $0x8] sm:$0xff] %vm533_vm4, %v588_v28  ;;  %536 = vst.msk [vmem:[#allocation4 + $0x10] sm:$0xff] %vm533_vm4, %v531_v29  ;;  %v655_v25 = vadd.f32 (!%p735_p5), %v654_v24, %v653_v20 }
 0x3fb   : > { %v519_v32 = vpop.xlane.xlu1 %518 }
 0x3fc   : > { %v529_v35 = vadd.f32 %v519_v32, %v481_v30  ;;  %v522_v36 = vpop.xlane.xlu0 %521  ;;  %v656_v30 = vsel (!%p735_p5), %vm533_vm4, %v630_v15, 0.0 }
 0x3fd   : > { %v530_v37 = vadd.f32 %v522_v36, %v482_v33  ;;  %v619_v59 = vld [vmem:[#allocation5] sm:$0xff] (!%p735_p5)  ;;  %v657_v32 = vadd.f32 (!%p735_p5), %v656_v30, %v655_v25 }
 0x3fe   : > { %534 = vst.msk [vmem:[#allocation4] sm:$0xff] %vm533_vm4, %v529_v35 }
 0x3ff   : > { %535 = vst.msk [vmem:[#allocation4 + $0x8] sm:$0xff] %vm533_vm4, %v530_v37  ;;  %v528_v40 = vpop.xlane.xlu1 %527 }
 0x400   : > { %v532_v41 = vadd.f32 %v528_v40, %v484_v38  ;;  %v583_v42 = vpop.xlane.xlu0 %582  ;;  %598 = sbr.rel (%p735_p5) target bundleno = 1331 (0x533), region = 52 }
 0x401   : > { %v589_v43 = vadd.f32 %v583_v42, %v549_v39  ;;  %v605_v49 = vld [vmem:[#allocation4 + $0x10] sm:$0xff] (!%p735_p5)  ;;  %v620_v0 = vld [vmem:[#allocation5 + $0x8] sm:$0xff] (!%p735_p5) }
 0x402   : > { %537 = vst.msk [vmem:[#allocation4 + $0x18] sm:$0xff] %vm533_vm4, %v532_v41 }
 0x403   : > { %593 = vst.msk [vmem:[#allocation5 + $0x10] sm:$0xff] %vm533_vm4, %v589_v43  ;;  %v586_v45 = vpop.xlane.xlu1 %585 }
 0x404   : > { %v590_v46 = vadd.f32 %v586_v45, %v550_v44 }
 0x405   : > { %v603_v47 = vld [vmem:[#allocation4] sm:$0xff] (!%p735_p5) }
 0x406   : > { %594 = vst.msk [vmem:[#allocation5 + $0x18] sm:$0xff] %vm533_vm4, %v590_v46  ;;  %v604_v48 = vld [vmem:[#allocation4 + $0x8] sm:$0xff] (!%p735_p5)  ;;  %817 = vlog2.f32 (!%p735_p5), %v603_v47 }
 0x407   : > { %819 = vlog2.f32 %v604_v48 }
 0x408   : > { %821 = vlog2.f32 %v605_v49 }
 0x409   : > { %v606_v50 = vld [vmem:[#allocation4 + $0x18] sm:$0xff] }
 0x40a   : > { %823 = vlog2.f32 %v606_v50  ;;  %v621_v3 = vld [vmem:[#allocation5 + $0x10] sm:$0xff] }
 0x40d   : > { %v622_v6 = vld [vmem:[#allocation5 + $0x18] sm:$0xff] }
 0x410   : > { %v818_v51 = vpop.eup %817 }
 0x411   : > { %v820_v53 = vpop.eup %819  ;;  %v608_v55 = vmul.f32 0.6931472, %v818_v51 }
 0x412   : > { %v822_v56 = vpop.eup %821  ;;  %v610_v58 = vmul.f32 0.6931472, %v820_v53 }
 0x413   : > { %v612_v62 = vmul.f32 0.6931472, %v822_v56  ;;  %v615_v63 = vadd.f32 %v608_v55, %v599_v52 }
 0x414   : > { %v824_v60 = vpop.eup %823  ;;  %v616_v2 = vadd.f32 %v610_v58, %v600_v54 }
 0x415   : > { %v614_v1 = vmul.f32 0.6931472, %v824_v60  ;;  %v617_v5 = vadd.f32 %v612_v62, %v601_v57  ;;  %v623_v7 = vsub.f32 %v615_v63, %v619_v59 }
 0x416   : > { %v624_v11 = vsub.f32 %v616_v2, %v620_v0 }
 0x417   : > { %v618_v9 = vadd.f32 %v614_v1, %v602_v61  ;;  %v625_v13 = vsub.f32 %v617_v5, %v621_v3  ;;  %v631_v16 = vmul.f32 %v627_v4, %v623_v7 }
 0x418   : > { %v632_v18 = vmul.f32 %v628_v8, %v624_v11 }
 0x419   : > { %v626_v17 = vsub.f32 %v618_v9, %v622_v6  ;;  %v633_v19 = vmul.f32 %v629_v12, %v625_v13  ;;  %v635_v21 = vsel %vm533_vm4, %v631_v16, 0.0 }
 0x41a   : > { %v636_v23 = vsel %vm533_vm4, %v632_v18, 0.0 }
 0x41b   : > { %v634_v22 = vmul.f32 %v630_v15, %v626_v17  ;;  %v637_v26 = vadd.f32 %v636_v23, %v635_v21  ;;  %v638_v27 = vsel %vm533_vm4, %v633_v19, 0.0 }
 0x41d   : > { %v640_v28 = vsel %vm533_vm4, %v634_v22, 0.0  ;;  %v639_v29 = vadd.f32 %v638_v27, %v637_v26 }
 0x41f   : > { %v641_v31 = vadd.f32 %v640_v28, %v639_v29 }
 0x421   : > { %642 = vadd.xlane.f32.xlu0 %v641_v31 }
 0x425   : > { %658 = vadd.xlane.f32.xlu0 %v657_v32 }
 0x4ae   : > { %v643_v33 = vpop.xlane.xlu0 %642 }
 0x4af   : > { %v644_v34 = vrot.slane %v643_v33, 4 }
 0x4b1   : > { %v645_v35 = vadd.f32 %v644_v34, %v643_v33 }
 0x4b2   : > { %v659_v36 = vpop.xlane.xlu0 %658 }
 0x4b3   : > { %v646_v37 = vrot.slane %v645_v35, 2  ;;  %v660_v38 = vrot.slane %v659_v36, 4 }
 0x4b5   : > { %v661_v39 = vadd.f32 %v660_v38, %v659_v36  ;;  %v647_v40 = vadd.f32 %v646_v37, %v645_v35 }
 0x4b7   : > { %v662_v41 = vrot.slane %v661_v39, 2  ;;  %v648_v42 = vrot.slane %v647_v40, 1 }
 0x4b9   : > { %v663_v43 = vadd.f32 %v662_v41, %v661_v39  ;;  %v649_v44 = vadd.f32 %v648_v42, %v647_v40 }
 0x4bb   : > { %762 = vpush %v649_v44  ;;  %v664_v45 = vrot.slane %v663_v43, 1 }
 0x4bd   : > { %v665_v46 = vadd.f32 %v664_v45, %v663_v43 }
 0x4bf   : > { %764 = vpush %v665_v46 }
 0x4ec   : > { %s763_s11 = spop %762 }
 0x4f0   : > { %s765_s12 = spop %764 }
 0x4f1   : > { %s667_s14 = smax.f32 %s854_s13, %s765_s12 }
 0x4f2   : > { %v668_v47 = vstv %s667_s14 }
 0x4f3   : > { %825 = vrcp.f32 %v668_v47 }
 0x4fd   : > { %v826_v48 = vpop.eup %825 }
 0x4fe   : > { %766 = vpush %v826_v48 }
 0x52f   : > { %s767_s15 = spop %766 }
 0x530   : > { %s671_s16 = smul.f32 %s767_s15, %s763_s11 }
 0x532   : > { %673 = sst [smem:[#allocation6]] %s671_s16 }
 0x533 PF: > { %p772_p6 = scmp.eq.s32.totalorder %s897_s22, 1  ;;  %s827_s19 = scalar_lea.hbm %s1100_s6, 16 }
 0x534   : > { %p828_p7 = scmp.ne.s32.totalorder %s1100_s6, %s827_s19  ;;  %p833_p10 = scmp.lt.u32.totalorder %s827_s19, %s1100_s6 }
 0x536   : > { %p829_p8 = pnand %p828_p7, %p772_p6 }
 0x538   : > { %p830_p9 = pneg %p829_p8 }
 0x53a   : > { %p835_p11 = pnand %p833_p10, %p830_p9 }
 0x53c   : > { %838 = shalt.err (!%p835_p11)
}
 0x53d   : > { %s855_s26 = smov [#allocation6]  }
 0x53e   : > { %769 = dma.smem_to_hbm (%p772_p6), %s855_s26, 16, %s1100_s6, [#allocation7]  }
 0x53f   : > { %844 = dma.done.wait (%p772_p6), [#allocation7], 16  }
 0x540   : > { %846 = vsyncadd (%p772_p6), [#allocation7], 4294967280 }
 0x541   : > { %687 = sfence }
 0x542 PF: > { %s17_s21 = sadd.s32 1, %s849_s21  }
 0x543   : > { %p14_p12 = scmp.ge.s32.totalorder %s17_s21, 4  }
 0x545   :  { %16 = sbr.rel (!%p14_p12) target bundleno = 1 (0x1), region = 80 }
 0x54c   :  { %693 = vsyncpa [#allocation7], 1 }
 0x54d   :  { %695 = vsyncpa [#allocation7 + $0x1], 1 }

// kernel: distributed_gpt3_pretrain_forward.6
= control target key start
LH: loop header
LB: loop body
LE: loop exit
PB: predicated region body
PF: predicated region fallthrough
CT: control target
= control target key end

     0   :  { %vm126_vm0 = vcmask 261120   ;;  %vm288_vm1 = vcmask 64512   ;;  %s1986_s20 = smov 120   ;;  %s1987_s21 = smov 64   ;;  %vm662_vm14 = vcmask 1043456   ;;  %s2433_s0 = inlined_call_operand.vmem [shape: f32[2,8,32], index: 0, kind: input, shape index: {}]   ;;  %s2434_s2 = inlined_call_operand.vmem [shape: f32[1,16,32], index: 2, kind: input, shape index: {}]   ;;  %s2435_s1 = inlined_call_operand.vmem [shape: f32[2,8,32], index: 1, kind: input, shape index: {}]   ;;  %s2436_s5 = inlined_call_operand.vmem [shape: bf16[32,96], index: 5, kind: input, shape index: {}]   ;;  %s2437_s3 = inlined_call_operand.vmem [shape: f32[1,32], index: 3, kind: input, shape index: {}]   ;;  %s2438_s4 = inlined_call_operand.vmem [shape: f32[1,32], index: 4, kind: input, shape index: {}]   ;;  %s2439_s6 = inlined_call_operand.vmem [shape: f32[1,96], index: 6, kind: input, shape index: {}]   ;;  %s2440_s7 = inlined_call_operand.vmem [shape: bf16[4,8,32], index: 7, kind: input, shape index: {}]   ;;  %s2441_s8 = inlined_call_operand.vmem [shape: f32[1,32], index: 8, kind: input, shape index: {}]   ;;  %s2442_s11 = inlined_call_operand.vmem [shape: bf16[32,128], index: 11, kind: input, shape index: {}]   ;;  %s2443_s9 = inlined_call_operand.vmem [shape: f32[1,32], index: 9, kind: input, shape index: {}]   ;;  %s2444_s10 = inlined_call_operand.vmem [shape: f32[1,32], index: 10, kind: input, shape index: {}]   ;;  %s2445_s13 = inlined_call_operand.vmem [shape: bf16[128,32], index: 13, kind: input, shape index: {}]   ;;  %s2446_s12 = inlined_call_operand.vmem [shape: f32[1,128], index: 12, kind: input, shape index: {}]   ;;  %s2447_s14 = inlined_call_operand.vmem [shape: f32[1,32], index: 14, kind: input, shape index: {}]   ;;  %s2448_s15 = inlined_call_operand.vmem [shape: f32[2,16,32], index: 15, kind: output, shape index: {}]  }
   0x1   :  { %v51_v0 = vld [vmem:[%s2433_s0] sm:$0xff]  ;;  %v52_v2 = vld [vmem:[%s2433_s0 + $0x8] sm:$0xff]  ;;  %s1988_s22 = smov 80   ;;  %s1989_s23 = smov 112  }
   0x2   :  { %v55_v1 = vld [vmem:[%s2434_s2] sm:$0xff]  ;;  %v56_v6 = vld [vmem:[%s2434_s2 + $0x8] sm:$0xff]  ;;  %s1990_s24 = smov 56   ;;  %s1991_s25 = smov 72  }
   0x3   :  { %v2084_v3 = vadd.f32 %v55_v1, %v51_v0  ;;  %v2086_v4 = vadd.f32 %v55_v1, %v52_v2  ;;  %v53_v5 = vld [vmem:[%s2435_s1] sm:$0xff]  ;;  %v54_v7 = vld [vmem:[%s2435_s1 + $0x8] sm:$0xff]  ;;  %s1992_s26 = smov 104   ;;  %s1993_s1 = smov 48  }
   0x4   :  { %v2097_v8 = vadd.f32 %v56_v6, %v53_v5  ;;  %v2099_v9 = vadd.f32 %v56_v6, %v54_v7  ;;  %v1884_v34 = vld [vmem:[%s2436_s5] sm:$0xff]   ;;  %v1885_v35 = vld [vmem:[%s2436_s5 + $0x8] sm:$0xff]   ;;  %s1994_s5 = smov 40  }
   0x5   :  { %v127_v10 = vsel %vm126_vm0, %v2084_v3, 0.0  ;;  %v133_v11 = vsel %vm126_vm0, %v2086_v4, 0.0  ;;  %1725 = vmatprep.subr.bf16.mxu0 %v1884_v34  ;;  %v1612_v50 = vld [vmem:[%s2437_s3] ss:$0 sm:$0xff] }
   0x6   :  { %128 = vadd.xlane.f32.xlu0 %v127_v10  ;;  %134 = vadd.xlane.f32.xlu1 %v133_v11  ;;  %v130_v12 = vsel %vm126_vm0, %v2097_v8, 0.0  ;;  %v136_v13 = vsel %vm126_vm0, %v2099_v9, 0.0  ;;  %v1613_v56 = vld [vmem:[%s2438_s4] ss:$0 sm:$0xff]  ;;  %s1984_s4 = smov 96  }
   0x7   :  { %1726 = vmatpush3.bf16.msra.mxu0 %v1884_v34  ;;  %v1614_v7 = vld [vmem:[%s2439_s6] ss:$0 sm:$0xff]  ;;  %s1985_s6 = smov 88  }
   0x8   :  { %1727 = vmatprep.subr.bf16.mxu0 %v1885_v35 }
   0xa   :  { %131 = vadd.xlane.f32.xlu0 %v130_v12  ;;  %137 = vadd.xlane.f32.xlu1 %v136_v13 }
   0xb   :  { %1728 = vmatpush3.bf16.msra.mxu0 %v1885_v35 }
  0x93   :  { %v129_v14 = vpop.xlane.xlu0 %128  ;;  %v135_v15 = vpop.xlane.xlu1 %134 }
  0x94   :  { %v140_v16 = vmul.f32 0.03125, %v129_v14  ;;  %v142_v17 = vmul.f32 0.03125, %v135_v15 }
  0x96   :  { %v144_v18 = vsub.f32 %v2084_v3, %v140_v16  ;;  %v146_v19 = vsub.f32 %v2086_v4, %v142_v17 }
  0x97   :  { %v132_v20 = vpop.xlane.xlu0 %131  ;;  %v138_v21 = vpop.xlane.xlu1 %137 }
  0x98   :  { %v141_v22 = vmul.f32 0.03125, %v132_v20  ;;  %v143_v23 = vmul.f32 0.03125, %v138_v21  ;;  %v148_v24 = vmul.f32 %v144_v18, %v144_v18  ;;  %v150_v25 = vmul.f32 %v146_v19, %v146_v19 }
  0x9a   :  { %v145_v26 = vsub.f32 %v2097_v8, %v141_v22  ;;  %v147_v27 = vsub.f32 %v2099_v9, %v143_v23  ;;  %v152_v28 = vsel %vm126_vm0, %v148_v24, 0.0  ;;  %v158_v29 = vsel %vm126_vm0, %v150_v25, 0.0 }
  0x9b   :  { %153 = vadd.xlane.f32.xlu0 %v152_v28 }
  0x9c   :  { %v149_v30 = vmul.f32 %v145_v26, %v145_v26  ;;  %v151_v31 = vmul.f32 %v147_v27, %v147_v27 }
  0x9e   :  { %v155_v32 = vsel %vm126_vm0, %v149_v30, 0.0  ;;  %v161_v33 = vsel %vm126_vm0, %v151_v31, 0.0 }
  0x9f   :  { %159 = vadd.xlane.f32.xlu0 %v158_v29  ;;  %156 = vadd.xlane.f32.xlu1 %v155_v32  ;;  %v61_v29 = vlaneseq }
  0xa1   :  { %v62_v30 = vshrl.u32 %v61_v29, 7  ;;  %v67_v31 = vand.u32 127, %v61_v29 }
  0xa3   :  { %162 = vadd.xlane.f32.xlu1 %v161_v33  ;;  %v64_v32 = vadd.s32 16, %v62_v30  ;;  %v63_v33 = vadd.s32 8, %v62_v30  ;;  %vm102_vm2 = vcmp.ge.s32.totalorder %v67_v31, 16  ;;  %vm107_vm3 = vcmp.lt.s32.totalorder %v67_v31, 32 }
  0xa4   :  { %vm85_vm4 = vcmp.lt.s32.totalorder %v67_v31, 16  ;;  %vm116_vm5 = vcmp.ge.s32.totalorder %v62_v30, %v67_v31  ;;  %vm2158_vm6 = vmand %vm102_vm2, %vm107_vm3 }
  0xa5   :  { %vm118_vm7 = vcmp.ge.s32.totalorder %v64_v32, %v67_v31  ;;  %vm117_vm8 = vcmp.ge.s32.totalorder %v63_v33, %v67_v31  ;;  %vm2162_vm9 = vmand %vm85_vm4, %vm116_vm5 }
  0xa6   :  { %vm2168_vm10 = vmand %vm2158_vm6, %vm118_vm7 }
  0xa7   :  { %vm2172_vm11 = vmand %vm85_vm4, %vm117_vm8 }
 0x128   :  { %v154_v36 = vpop.xlane.xlu0 %153 }
 0x129   :  { %v164_v37 = vmul.f32 0.03125, %v154_v36  ;;  %v65_v36 = vadd.s32 24, %v62_v30 }
 0x12b   :  { %v168_v38 = vadd.f32 1e-06, %v164_v37  ;;  %vm119_vm12 = vcmp.ge.s32.totalorder %v65_v36, %v67_v31 }
 0x12c   :  { %v157_v39 = vpop.xlane.xlu1 %156  ;;  %v160_v40 = vpop.xlane.xlu0 %159  ;;  %vm2186_vm13 = vmand %vm2158_vm6, %vm119_vm12 }
 0x12d   :  { %1896 = vrsqrt.f32 %v168_v38  ;;  %v165_v41 = vmul.f32 0.03125, %v157_v39  ;;  %v166_v42 = vmul.f32 0.03125, %v160_v40 }
 0x12f   :  { %v169_v43 = vadd.f32 1e-06, %v165_v41  ;;  %v170_v44 = vadd.f32 1e-06, %v166_v42 }
 0x130   :  { %v163_v45 = vpop.xlane.xlu1 %162 }
 0x131   :  { %1898 = vrsqrt.f32 %v169_v43  ;;  %v167_v46 = vmul.f32 0.03125, %v163_v45 }
 0x132   :  { %1900 = vrsqrt.f32 %v170_v44 }
 0x133   :  { %v171_v47 = vadd.f32 1e-06, %v167_v46 }
 0x135   :  { %1902 = vrsqrt.f32 %v171_v47 }
 0x137   :  { %v1897_v48 = vpop.eup %1896 }
 0x138   :  { %v176_v49 = vmul.f32 %v1897_v48, %v144_v18 }
 0x13a   :  { %v186_v54 = vmul.f32 %v1612_v50, %v176_v49 }
 0x13b   :  { %v1899_v51 = vpop.eup %1898 }
 0x13c   :  { %v1901_v52 = vpop.eup %1900  ;;  %v177_v53 = vmul.f32 %v1899_v51, %v145_v26  ;;  %v196_v60 = vadd.f32 %v1613_v56, %v186_v54 }
 0x13d   :  { %v178_v55 = vmul.f32 %v1901_v52, %v146_v19 }
 0x13e   :  { %v187_v57 = vmul.f32 %v1612_v50, %v177_v53 }
 0x13f   :  { %v1903_v58 = vpop.eup %1902  ;;  %v188_v62 = vmul.f32 %v1612_v50, %v178_v55 }
 0x140   :  { %v179_v59 = vmul.f32 %v1903_v58, %v147_v27  ;;  %v197_v61 = vadd.f32 %v1613_v56, %v187_v57 }
 0x141   :  { %v198_v1 = vadd.f32 %v1613_v56, %v188_v62 }
 0x142   :  { %v200_v63 = vpack.c.bf16 %v197_v61, %v196_v60  ;;  %v189_v0 = vmul.f32 %v1612_v50, %v179_v59 }
 0x144   :  { %1729 = vmatprep.mubr.msk.bf16.mxu0 %vm126_vm0, %v200_v63  ;;  %v199_v2 = vadd.f32 %v1613_v56, %v189_v0 }
 0x146   :  { %v201_v5 = vpack.c.bf16 %v199_v2, %v198_v1 }
 0x148   :  { %1730 = vmatmul.mubr.msk.bf16.vlgmr.msra.gmra.mrb[0].mxu0 %vm126_vm0, %v201_v5 }
 0x21b   :  { %v1731_v6 = vpop.f32.mrb[0].mxu0 }
 0x21c   :  { %v265_v10 = vpop.f32.mrb[1].mxu0  ;;  %v274_v12 = vadd.f32 %v1731_v6, %v1614_v7 }
 0x21d   :  { %v1732_v11 = vpop.f32.mrb[2].mxu0  ;;  %v266_v15 = vadd.f32 %v1614_v7, %v265_v10 }
 0x21e   :  { %v277_v13 = vadd.f32 %v1732_v11, %v1614_v7  ;;  %v268_v14 = vpop.f32.mrb[3].mxu0 }
 0x21f   :  { %v269_v16 = vadd.f32 %v1614_v7, %v268_v14 }
 0x220   :  { %v2134_v17 = vpack.c.bf16 %v277_v13, %v274_v12 }
 0x221   :  { %v2136_v18 = vpack.c.bf16 %v269_v16, %v266_v15 }
 0x222   :  { %286 = vrot.lane.b32.xlu1 %v2134_v17, %s1984_s4 }
 0x223   :  { %284 = vrot.lane.b32.xlu0 %v2136_v18, %s1984_s4  ;;  %1737 = vmatprep.mubr.msk.bf16.mxu1 %vm288_vm1, %v2136_v18 }
 0x226   :  { %472 = vrot.lane.b32.xlu1 %v2136_v18, %s1985_s6 }
 0x227   :  { %468 = vrot.lane.b32.xlu0 %v2136_v18, %s1986_s20 }
 0x22a   :  { %474 = vrot.lane.b32.xlu1 %v2134_v17, %s1985_s6 }
 0x22e   :  { %470 = vrot.lane.b32.xlu1 %v2134_v17, %s1986_s20 }
 0x294   :  { %v287_v21 = vpop.permute.xlu1 %286 }
 0x295   :  { %v285_v19 = vpop.permute.xlu0 %284  ;;  %v299_v22 = vsel %vm288_vm1, %v287_v21, 0 }
 0x296   :  { %1861 = vmatprep.subr.msk.bf16.mxu1 %vm288_vm1, %v285_v19  ;;  %v296_v20 = vsel %vm288_vm1, %v285_v19, 0 }
 0x297   :  { %1734 = vmatpush3.bf16.xpose.msra.mxu1 %v296_v20 }
 0x298   :  { %1862 = vmatprep.subr.msk.bf16.mxu1 %vm288_vm1, %v287_v21  ;;  %v473_v23 = vpop.permute.xlu1 %472 }
 0x299   :  { %v483_v24 = vsel %vm288_vm1, %v473_v23, 0  ;;  %v469_v25 = vpop.permute.xlu0 %468 }
 0x29c   :  { %v475_v26 = vpop.permute.xlu1 %474 }
 0x29d   :  { %v486_v27 = vsel %vm288_vm1, %v475_v26, 0 }
 0x29f   :  { %1736 = vmatpush3.bf16.xpose.msra.mxu1 %v299_v22 }
 0x2a0   :  { %1863 = vmatprep.subr.msk.bf16.mxu1 %vm288_vm1, %v473_v23  ;;  %v471_v28 = vpop.permute.xlu1 %470 }
 0x2a6   :  { %1738 = vmatmul.mubr.msk.bf16.vlgmr.msra.gmra.mrb[0].mxu1 %vm288_vm1, %v2134_v17 }
 0x2a7   :  { %1750 = vmatpush3.bf16.xpose.msra.mxu1 %v483_v24  ;;  %1753 = vmatprep.mubr.msk.bf16.mxu1 %vm288_vm1, %v469_v25 }
 0x2a8   :  { %1864 = vmatprep.subr.msk.bf16.mxu1 %vm288_vm1, %v475_v26 }
 0x2af   :  { %1752 = vmatpush3.bf16.xpose.msra.mxu1 %v486_v27 }
 0x2b6   :  { %1754 = vmatmul.mubr.msk.bf16.vlgmr.msra.gmra.mrb[4].mxu1 %vm288_vm1, %v471_v28 }
 0x379   :  { %v1739_v35 = vpop.f32.mrb[0].mxu1 }
 0x37a   :  { %v335_v37 = vpop.f32.mrb[1].mxu1  ;;  %v352_v39 = vmul.f32 0.35355338, %v1739_v35 }
 0x37b   :  { %v350_v40 = vmul.f32 0.35355338, %v335_v37  ;;  %v1740_v41 = vpop.f32.mrb[2].mxu1 }
 0x37c   :  { %v338_v43 = vpop.f32.mrb[3].mxu1  ;;  %v353_v48 = vmul.f32 0.35355338, %v1740_v41  ;;  %v356_v50 = vsel %vm2168_vm10, %v352_v39, -1e+09 }
 0x37d   :  { %v351_v45 = vmul.f32 0.35355338, %v338_v43  ;;  %v354_v46 = vsel %vm2162_vm9, %v350_v40, -1e+09  ;;  %v364_v53 = vsel %vm126_vm0, %v356_v50, -inf }
 0x37e   :  { %v358_v47 = vsel %vm126_vm0, %v354_v46, -inf  ;;  %v357_v54 = vsel %vm2186_vm13, %v353_v48, -1e+09 }
 0x37f   :  { %359 = vmax.xlane.f32.xlu0 %v358_v47  ;;  %v355_v49 = vsel %vm2172_vm11, %v351_v45, -1e+09  ;;  %v367_v55 = vsel %vm126_vm0, %v357_v54, -inf }
 0x380   :  { %v361_v51 = vsel %vm126_vm0, %v355_v49, -inf }
 0x381   :  { %362 = vmax.xlane.f32.xlu1 %v361_v51 }
 0x383   :  { %365 = vmax.xlane.f32.xlu0 %v364_v53 }
 0x387   :  { %368 = vmax.xlane.f32.xlu0 %v367_v55 }
 0x389   :  { %v1755_v56 = vpop.f32.mrb[4].mxu1 }
 0x38a   :  { %v522_v57 = vpop.f32.mrb[5].mxu1  ;;  %v539_v23 = vmul.f32 0.35355338, %v1755_v56 }
 0x38b   :  { %v1756_v58 = vpop.f32.mrb[6].mxu1  ;;  %v537_v22 = vmul.f32 0.35355338, %v522_v57 }
 0x38c   :  { %v525_v59 = vpop.f32.mrb[7].mxu1  ;;  %v540_v26 = vmul.f32 0.35355338, %v1756_v58  ;;  %v543_v28 = vsel %vm2168_vm10, %v539_v23, -1e+09 }
 0x38d   :  { %v541_v24 = vsel %vm2162_vm9, %v537_v22, -1e+09  ;;  %v538_v27 = vmul.f32 0.35355338, %v525_v59  ;;  %v551_v29 = vsel %vm126_vm0, %v543_v28, -inf }
 0x38e   :  { %v545_v25 = vsel %vm126_vm0, %v541_v24, -inf  ;;  %v544_v30 = vsel %vm2186_vm13, %v540_v26, -1e+09 }
 0x38f   :  { %v542_v31 = vsel %vm2172_vm11, %v538_v27, -1e+09  ;;  %v554_v32 = vsel %vm126_vm0, %v544_v30, -inf }
 0x390   :  { %v548_v33 = vsel %vm126_vm0, %v542_v31, -inf }
 0x392   :  { %406 = vrot.lane.b32.xlu1 %v2134_v17, %s1987_s21 }
 0x40c   :  { %v360_v60 = vpop.xlane.xlu0 %359 }
 0x40d   :  { %v370_v61 = vsub.f32 %v354_v46, %v360_v60 }
 0x40e   :  { %v363_v62 = vpop.xlane.xlu1 %362 }
 0x40f   :  { %v374_v1 = vmul.f32 1.442695, %v370_v61  ;;  %v371_v2 = vsub.f32 %v355_v49, %v363_v62 }
 0x410   :  { %v366_v63 = vpop.xlane.xlu0 %365 }
 0x411   :  { %v372_v0 = vsub.f32 %v356_v50, %v366_v63  ;;  %v376_v10 = vmul.f32 1.442695, %v371_v2 }
 0x412   :  { %v407_v34 = vpop.permute.xlu1 %406 }
 0x413   :  { %v378_v5 = vmul.f32 1.442695, %v372_v0 }
 0x414   :  { %v369_v6 = vpop.xlane.xlu0 %368 }
 0x415   :  { %1904 = vpow2.f32 %v378_v5  ;;  %v373_v7 = vsub.f32 %v357_v54, %v369_v6 }
 0x416   :  { %1906 = vpow2.f32 %v374_v1 }
 0x417   :  { %v380_v11 = vmul.f32 1.442695, %v373_v7 }
 0x419   :  { %1908 = vpow2.f32 %v380_v11 }
 0x41a   :  { %1910 = vpow2.f32 %v376_v10 }
 0x41f   :  { %v1905_v12 = vpop.eup %1904 }
 0x420   :  { %v388_v13 = vsel %vm126_vm0, %v1905_v12, 0.0  ;;  %v1907_v14 = vpop.eup %1906 }
 0x421   :  { %389 = vadd.xlane.f32.xlu0 %v388_v13  ;;  %v382_v16 = vsel %vm126_vm0, %v1907_v14, 0.0 }
 0x423   :  { %v1909_v15 = vpop.eup %1908 }
 0x424   :  { %v391_v19 = vsel %vm126_vm0, %v1909_v15, 0.0  ;;  %v1911_v20 = vpop.eup %1910 }
 0x425   :  { %383 = vadd.xlane.f32.xlu0 %v382_v16  ;;  %392 = vadd.xlane.f32.xlu1 %v391_v19  ;;  %v385_v21 = vsel %vm126_vm0, %v1911_v20, 0.0 }
 0x429   :  { %386 = vadd.xlane.f32.xlu1 %v385_v21 }
 0x43a   :  { %777 = vrot.lane.b32.xlu1 %v2136_v18, %s1988_s22 }
 0x43b   :  { %404 = vrot.lane.b32.xlu0 %v2136_v18, %s1987_s21 }
 0x43e   :  { %779 = vrot.lane.b32.xlu1 %v2134_v17, %s1988_s22 }
 0x43f   :  { %773 = vrot.lane.b32.xlu0 %v2136_v18, %s1989_s23 }
 0x442   :  { %775 = vrot.lane.b32.xlu1 %v2134_v17, %s1989_s23 }
 0x45e   :  { %546 = vmax.xlane.f32.xlu0 %v545_v25 }
 0x462   :  { %552 = vmax.xlane.f32.xlu0 %v551_v29 }
 0x466   :  { %555 = vmax.xlane.f32.xlu0 %v554_v32  ;;  %549 = vmax.xlane.f32.xlu1 %v548_v33 }
 0x4ae   :  { %v390_v35 = vpop.xlane.xlu0 %389 }
 0x4b2   :  { %v384_v36 = vpop.xlane.xlu0 %383  ;;  %v393_v37 = vpop.xlane.xlu1 %392 }
 0x4b3   :  { %1912 = vrcp.f32 %v393_v37 }
 0x4b4   :  { %1914 = vrcp.f32 %v384_v36 }
 0x4b5   :  { %1916 = vrcp.f32 %v390_v35 }
 0x4b6   :  { %v405_v39 = vpop.permute.xlu0 %404  ;;  %v387_v40 = vpop.xlane.xlu1 %386 }
 0x4b7   :  { %1918 = vrcp.f32 %v387_v40  ;;  %1741 = vmatprep.subr.bf16.mxu0 %v405_v39 }
 0x4b8   :  { %1742 = vmatpush3.bf16.msra.mxu0 %v405_v39 }
 0x4b9   :  { %1743 = vmatprep.subr.bf16.mxu0 %v407_v34 }
 0x4ba   :  { %v778_v41 = vpop.permute.xlu1 %777  ;;  %v774_v55 = vpop.permute.xlu0 %773 }
 0x4bb   :  { %v788_v56 = vsel %vm288_vm1, %v778_v41, 0 }
 0x4bc   :  { %1744 = vmatpush3.bf16.msra.mxu0 %v407_v34 }
 0x4bd   :  { %1867 = vmatprep.subr.msk.bf16.mxu0 %vm288_vm1, %v778_v41  ;;  %v1913_v43 = vpop.eup %1912 }
 0x4be   :  { %v1915_v45 = vpop.eup %1914  ;;  %v401_v48 = vmul.f32 %v1913_v43, %v1909_v15  ;;  %v780_v57 = vpop.permute.xlu1 %779 }
 0x4bf   :  { %v1917_v46 = vpop.eup %1916  ;;  %v398_v49 = vmul.f32 %v1915_v45, %v1907_v14  ;;  %v791_v58 = vsel %vm288_vm1, %v780_v57, 0 }
 0x4c0   :  { %v400_v51 = vmul.f32 %v1917_v46, %v1905_v12 }
 0x4c1   :  { %v1919_v47 = vpop.eup %1918 }
 0x4c2   :  { %v399_v50 = vmul.f32 %v1919_v47, %v1911_v20  ;;  %v403_v54 = vpack.c.bf16 %v401_v48, %v400_v51  ;;  %v776_v59 = vpop.permute.xlu1 %775 }
 0x4c4   :  { %v402_v53 = vpack.c.bf16 %v399_v50, %v398_v49 }
 0x4c6   :  { %1745 = vmatprep.mubr.msk.bf16.mxu0 %vm126_vm0, %v402_v53 }
 0x4c7   :  { %1746 = vmatmul.mubr.msk.bf16.vlgmr.msra.gmra.mrb[4].mxu0 %vm126_vm0, %v403_v54 }
 0x4c8   :  { %1778 = vmatpush3.bf16.xpose.msra.mxu0 %v788_v56  ;;  %1781 = vmatprep.mubr.msk.bf16.mxu0 %vm288_vm1, %v774_v55 }
 0x4c9   :  { %1868 = vmatprep.subr.msk.bf16.mxu0 %vm288_vm1, %v780_v57 }
 0x4d0   :  { %1780 = vmatpush3.bf16.xpose.msra.mxu0 %v791_v58 }
 0x4d7   :  { %1782 = vmatmul.mubr.msk.bf16.vlgmr.msra.gmra.mrb[8].mxu0 %vm288_vm1, %v776_v59 }
 0x4eb   :  { %v547_v60 = vpop.xlane.xlu0 %546 }
 0x4ec   :  { %v557_v61 = vsub.f32 %v541_v24, %v547_v60 }
 0x4ee   :  { %v561_v0 = vmul.f32 1.442695, %v557_v61 }
 0x4ef   :  { %v553_v62 = vpop.xlane.xlu0 %552 }
 0x4f0   :  { %v559_v63 = vsub.f32 %v543_v28, %v553_v62 }
 0x4f2   :  { %v565_v1 = vmul.f32 1.442695, %v559_v63 }
 0x4f3   :  { %v556_v2 = vpop.xlane.xlu0 %555  ;;  %v550_v5 = vpop.xlane.xlu1 %549 }
 0x4f4   :  { %1920 = vpow2.f32 %v565_v1  ;;  %v560_v6 = vsub.f32 %v544_v30, %v556_v2  ;;  %v558_v7 = vsub.f32 %v542_v31, %v550_v5 }
 0x4f5   :  { %1922 = vpow2.f32 %v561_v0 }
 0x4f6   :  { %v567_v10 = vmul.f32 1.442695, %v560_v6  ;;  %v563_v11 = vmul.f32 1.442695, %v558_v7 }
 0x4f8   :  { %1924 = vpow2.f32 %v567_v10  ;;  %v1627_v10 = vld [vmem:[%s2440_s7 + $0x4] sm:$0xf] }
 0x4f9   :  { %1926 = vpow2.f32 %v563_v11  ;;  %v664_v11 = vsel %vm662_vm14, %v1627_v10, 0 }
 0x4fe   :  { %v1921_v12 = vpop.eup %1920 }
 0x4ff   :  { %v575_v13 = vsel %vm126_vm0, %v1921_v12, 0.0  ;;  %v1923_v14 = vpop.eup %1922 }
 0x500   :  { %576 = vadd.xlane.f32.xlu0 %v575_v13  ;;  %v569_v16 = vsel %vm126_vm0, %v1923_v14, 0.0 }
 0x502   :  { %v1925_v15 = vpop.eup %1924 }
 0x503   :  { %v578_v19 = vsel %vm126_vm0, %v1925_v15, 0.0  ;;  %v1927_v20 = vpop.eup %1926 }
 0x504   :  { %570 = vadd.xlane.f32.xlu0 %v569_v16  ;;  %579 = vadd.xlane.f32.xlu1 %v578_v19  ;;  %v572_v21 = vsel %vm126_vm0, %v1927_v20, 0.0 }
 0x508   :  { %573 = vadd.xlane.f32.xlu1 %v572_v21 }
 0x519   :  { %593 = vrot.lane.b32.xlu1 %v2134_v17, %s1990_s24 }
 0x51a   :  { %591 = vrot.lane.b32.xlu0 %v2136_v18, %s1990_s24 }
 0x51d   :  { %1027 = vrot.lane.b32.xlu1 %v2136_v18, %s1991_s25 }
 0x51e   :  { %1023 = vrot.lane.b32.xlu0 %v2136_v18, %s1992_s26 }
 0x521   :  { %1029 = vrot.lane.b32.xlu1 %v2134_v17, %s1991_s25 }
 0x525   :  { %1025 = vrot.lane.b32.xlu1 %v2134_v17, %s1992_s26 }
 0x58d   :  { %v577_v22 = vpop.xlane.xlu0 %576 }
 0x591   :  { %v571_v23 = vpop.xlane.xlu0 %570  ;;  %v580_v24 = vpop.xlane.xlu1 %579 }
 0x592   :  { %1928 = vrcp.f32 %v580_v24 }
 0x593   :  { %1930 = vrcp.f32 %v571_v23 }
 0x594   :  { %1932 = vrcp.f32 %v577_v22 }
 0x595   :  { %v592_v25 = vpop.permute.xlu0 %591  ;;  %v574_v26 = vpop.xlane.xlu1 %573 }
 0x596   :  { %1934 = vrcp.f32 %v574_v26  ;;  %1757 = vmatprep.subr.bf16.mxu1 %v592_v25 }
 0x597   :  { %1758 = vmatpush3.bf16.msra.mxu1 %v592_v25 }
 0x599   :  { %v1024_v27 = vpop.permute.xlu0 %1023  ;;  %v594_v28 = vpop.permute.xlu1 %593 }
 0x59a   :  { %v2236_v29 = vpop.f32.mrb[4].mxu0  ;;  %1759 = vmatprep.subr.bf16.mxu1 %v594_v28  ;;  %1803 = vmatprep.mubr.msk.bf16.mxu0 %vm288_vm1, %v1024_v27 }
 0x59b   :  { %v2239_v30 = vpop.f32.mrb[5].mxu0  ;;  %1760 = vmatpush3.bf16.msra.mxu1 %v594_v28 }
 0x59c   :  { %v2241_v31 = vpop.f32.mrb[6].mxu0  ;;  %v1929_v32 = vpop.eup %1928  ;;  %1865 = vmatprep.subr.msk.bf16.mxu1 %vm662_vm14, %v1627_v10 }
 0x59d   :  { %v466_v33 = vpack.c.bf16 %v2241_v31, %v2236_v29  ;;  %v2245_v34 = vpop.f32.mrb[7].mxu0  ;;  %v1028_v35 = vpop.permute.xlu1 %1027  ;;  %v588_v43 = vmul.f32 %v1929_v32, %v1925_v15 }
 0x59e   :  { %v1931_v36 = vpop.eup %1930  ;;  %v465_v37 = vpack.c.bf16 %v2245_v34, %v2239_v30  ;;  %v1038_v39 = vsel %vm288_vm1, %v1028_v35, 0  ;;  %1870 = vmatprep.subr.msk.bf16.mxu0 %vm288_vm1, %v1028_v35 }
 0x59f   :  { %v1933_v40 = vpop.eup %1932  ;;  %1800 = vmatpush3.bf16.xpose.msra.mxu0 %v1038_v39  ;;  %v585_v46 = vmul.f32 %v1931_v36, %v1923_v14 }
 0x5a0   :  { %v1935_v41 = vpop.eup %1934  ;;  %v587_v48 = vmul.f32 %v1933_v40, %v1921_v12  ;;  %v467_v12 = vld [vmem:[%s2440_s7] sm:$0xf] }
 0x5a1   :  { %v1030_v45 = vpop.permute.xlu1 %1029  ;;  %v586_v47 = vmul.f32 %v1935_v41, %v1927_v20 }
 0x5a2   :  { %1871 = vmatprep.subr.msk.bf16.mxu0 %vm288_vm1, %v1030_v45  ;;  %v590_v50 = vpack.c.bf16 %v588_v43, %v587_v48  ;;  %v1041_v51 = vsel %vm288_vm1, %v1030_v45, 0 }
 0x5a3   :  { %v589_v49 = vpack.c.bf16 %v586_v47, %v585_v46 }
 0x5a5   :  { %1761 = vmatprep.mubr.msk.bf16.mxu1 %vm126_vm0, %v589_v49  ;;  %v1026_v58 = vpop.permute.xlu1 %1025 }
 0x5a6   :  { %1762 = vmatmul.mubr.msk.bf16.vlgmr.msra.gmra.mrb[8].mxu1 %vm126_vm0, %v590_v50  ;;  %v722_v50 = vsel %vm662_vm14, %v467_v12, 0 }
 0x5a7   :  { %1802 = vmatpush3.bf16.xpose.msra.mxu0 %v1041_v51  ;;  %1766 = vmatpush3.bf16.msra.mxu1 %v664_v11 }
 0x5a8   :  { %1866 = vmatprep.subr.msk.bf16.mxu1 %vm662_vm14, %v467_v12 }
 0x5aa   :  { %v1783_v53 = vpop.f32.mrb[8].mxu0 }
 0x5ab   :  { %v827_v54 = vpop.f32.mrb[9].mxu0  ;;  %v844_v55 = vmul.f32 0.35355338, %v1783_v53 }
 0x5ac   :  { %v842_v56 = vmul.f32 0.35355338, %v827_v54  ;;  %v1784_v57 = vpop.f32.mrb[10].mxu0 }
 0x5ad   :  { %v830_v59 = vpop.f32.mrb[11].mxu0  ;;  %v845_v63 = vmul.f32 0.35355338, %v1784_v57  ;;  %v848_v1 = vsel %vm2168_vm10, %v844_v55, -1e+09 }
 0x5ae   :  { %v843_v60 = vmul.f32 0.35355338, %v830_v59  ;;  %1804 = vmatmul.mubr.msk.bf16.vlgmr.msra.gmra.mrb[12].mxu0 %vm288_vm1, %v1026_v58  ;;  %v846_v61 = vsel %vm2162_vm9, %v842_v56, -1e+09  ;;  %v856_v5 = vsel %vm126_vm0, %v848_v1, -inf }
 0x5af   :  { %v850_v62 = vsel %vm126_vm0, %v846_v61, -inf  ;;  %v849_v6 = vsel %vm2186_vm13, %v845_v63, -1e+09 }
 0x5b0   :  { %851 = vmax.xlane.f32.xlu0 %v850_v62  ;;  %v847_v0 = vsel %vm2172_vm11, %v843_v60, -1e+09  ;;  %v859_v7 = vsel %vm126_vm0, %v849_v6, -inf }
 0x5b1   :  { %v853_v2 = vsel %vm126_vm0, %v847_v0, -inf }
 0x5b2   :  { %854 = vmax.xlane.f32.xlu1 %v853_v2 }
 0x5b4   :  { %857 = vmax.xlane.f32.xlu0 %v856_v5 }
 0x5b8   :  { %860 = vmax.xlane.f32.xlu0 %v859_v7 }
 0x63d   :  { %v852_v13 = vpop.xlane.xlu0 %851 }
 0x63e   :  { %v862_v14 = vsub.f32 %v846_v61, %v852_v13 }
 0x63f   :  { %v855_v15 = vpop.xlane.xlu1 %854 }
 0x640   :  { %v866_v20 = vmul.f32 1.442695, %v862_v14  ;;  %v863_v21 = vsub.f32 %v847_v0, %v855_v15 }
 0x641   :  { %v858_v16 = vpop.xlane.xlu0 %857 }
 0x642   :  { %v864_v19 = vsub.f32 %v848_v1, %v858_v16  ;;  %v868_v25 = vmul.f32 1.442695, %v863_v21 }
 0x644   :  { %v870_v22 = vmul.f32 1.442695, %v864_v19 }
 0x645   :  { %v861_v23 = vpop.xlane.xlu0 %860 }
 0x646   :  { %1936 = vpow2.f32 %v870_v22  ;;  %v865_v24 = vsub.f32 %v849_v6, %v861_v23 }
 0x647   :  { %1938 = vpow2.f32 %v866_v20 }
 0x648   :  { %v872_v26 = vmul.f32 1.442695, %v865_v24 }
 0x64a   :  { %1940 = vpow2.f32 %v872_v26 }
 0x64b   :  { %1942 = vpow2.f32 %v868_v25 }
 0x650   :  { %v2277_v27 = vpop.eup %1936 }
 0x651   :  { %v880_v28 = vsel %vm126_vm0, %v2277_v27, 0.0  ;;  %v2281_v32 = vpop.eup %1938 }
 0x652   :  { %881 = vadd.xlane.f32.xlu0 %v880_v28  ;;  %v874_v36 = vsel %vm126_vm0, %v2281_v32, 0.0 }
 0x654   :  { %v1941_v35 = vpop.eup %1940 }
 0x655   :  { %v883_v39 = vsel %vm126_vm0, %v1941_v35, 0.0  ;;  %v1943_v40 = vpop.eup %1942 }
 0x656   :  { %875 = vadd.xlane.f32.xlu0 %v874_v36  ;;  %884 = vadd.xlane.f32.xlu1 %v883_v39  ;;  %v877_v41 = vsel %vm126_vm0, %v1943_v40, 0.0 }
 0x65a   :  { %878 = vadd.xlane.f32.xlu1 %v877_v41 }
 0x66b   :  { %898 = vrot.lane.b32.xlu1 %v2134_v17, %s1993_s1 }
 0x66c   :  { %896 = vrot.lane.b32.xlu0 %v2136_v18, %s1993_s1 }
 0x679   :  { %v1763_v43 = vpop.f32.mrb[8].mxu1 }
 0x67a   :  { %v637_v45 = vpop.f32.mrb[9].mxu1 }
 0x67b   :  { %v1764_v46 = vpop.f32.mrb[10].mxu1 }
 0x67c   :  { %v653_v47 = vpack.c.bf16 %v1764_v46, %v1763_v43  ;;  %v640_v48 = vpop.f32.mrb[11].mxu1 }
 0x67d   :  { %v652_v49 = vpack.c.bf16 %v640_v48, %v637_v45  ;;  %v1636_v45 = vld [vmem:[%s2440_s7 + $0x8] sm:$0xf] }
 0x67e   :  { %v968_v46 = vsel %vm662_vm14, %v1636_v45, 0 }
 0x67f   :  { %1767 = vmatprep.mubr.msk.bf16.mxu1 %vm288_vm1, %v652_v49 }
 0x680   :  { %1768 = vmatmul.mubr.msk.bf16.vlgmr.msra.gmra.mrb[12].mxu1 %vm288_vm1, %v653_v47 }
 0x681   :  { %1773 = vmatprep.mubr.msk.bf16.mxu1 %vm288_vm1, %v465_v37  ;;  %v1805_v51 = vpop.f32.mrb[12].mxu0  ;;  %1772 = vmatpush3.bf16.msra.mxu1 %v722_v50 }
 0x682   :  { %v1077_v53 = vpop.f32.mrb[13].mxu0  ;;  %v1094_v57 = vmul.f32 0.35355338, %v1805_v51 }
 0x683   :  { %v1806_v54 = vpop.f32.mrb[14].mxu0  ;;  %v1092_v58 = vmul.f32 0.35355338, %v1077_v53 }
 0x684   :  { %v1080_v55 = vpop.f32.mrb[15].mxu0  ;;  %v1095_v61 = vmul.f32 0.35355338, %v1806_v54  ;;  %v1098_v30 = vsel %vm2168_vm10, %v1094_v57, -1e+09 }
 0x685   :  { %v1093_v56 = vmul.f32 0.35355338, %v1080_v55  ;;  %v1096_v34 = vsel %vm2162_vm9, %v1092_v58, -1e+09  ;;  %v1106_v37 = vsel %vm126_vm0, %v1098_v30, -inf }
 0x686   :  { %v1100_v44 = vsel %vm126_vm0, %v1096_v34, -inf  ;;  %v1099_v62 = vsel %vm2186_vm13, %v1095_v61, -1e+09 }
 0x687   :  { %v1097_v59 = vsel %vm2172_vm11, %v1093_v56, -1e+09  ;;  %v1109_v42 = vsel %vm126_vm0, %v1099_v62, -inf }
 0x688   :  { %v1103_v60 = vsel %vm126_vm0, %v1097_v59, -inf }
 0x68b   :  { %1104 = vmax.xlane.f32.xlu0 %v1103_v60 }
 0x68c   :  { %1774 = vmatmul.mubr.msk.bf16.vlgmr.msra.gmra.mrb[12].mxu1 %vm288_vm1, %v466_v33 }
 0x68f   :  { %1107 = vmax.xlane.f32.xlu0 %v1106_v37  ;;  %1101 = vmax.xlane.f32.xlu1 %v1100_v44 }
 0x693   :  { %1110 = vmax.xlane.f32.xlu1 %v1109_v42 }
 0x6df   :  { %v882_v63 = vpop.xlane.xlu0 %881 }
 0x6e3   :  { %v876_v38 = vpop.xlane.xlu0 %875  ;;  %v885_v0 = vpop.xlane.xlu1 %884 }
 0x6e4   :  { %1944 = vrcp.f32 %v885_v0 }
 0x6e5   :  { %1946 = vrcp.f32 %v876_v38 }
 0x6e6   :  { %1948 = vrcp.f32 %v882_v63 }
 0x6e7   :  { %v897_v29 = vpop.permute.xlu0 %896  ;;  %v879_v31 = vpop.xlane.xlu1 %878 }
 0x6e8   :  { %1950 = vrcp.f32 %v879_v31  ;;  %1785 = vmatprep.subr.bf16.mxu1 %v897_v29 }
 0x6e9   :  { %1786 = vmatpush3.bf16.msra.mxu1 %v897_v29 }
 0x6eb   :  { %v899_v33 = vpop.permute.xlu1 %898 }
 0x6ec   :  { %1787 = vmatprep.subr.bf16.mxu1 %v899_v33 }
 0x6ed   :  { %1788 = vmatpush3.bf16.msra.mxu1 %v899_v33 }
 0x6ee   :  { %v1945_v1 = vpop.eup %1944  ;;  %1869 = vmatprep.subr.msk.bf16.mxu1 %vm662_vm14, %v1636_v45 }
 0x6ef   :  { %v1947_v52 = vpop.eup %1946  ;;  %v893_v6 = vmul.f32 %v1945_v1, %v1941_v35 }
 0x6f0   :  { %v1949_v2 = vpop.eup %1948  ;;  %v890_v7 = vmul.f32 %v1947_v52, %v2281_v32 }
 0x6f1   :  { %v892_v11 = vmul.f32 %v1949_v2, %v2277_v27  ;;  %v1646_v2 = vld [vmem:[%s2441_s8] ss:$0 sm:$0xff] }
 0x6f2   :  { %v1951_v5 = vpop.eup %1950 }
 0x6f3   :  { %v891_v10 = vmul.f32 %v1951_v5, %v1943_v40  ;;  %v895_v13 = vpack.c.bf16 %v893_v6, %v892_v11 }
 0x6f5   :  { %v894_v12 = vpack.c.bf16 %v891_v10, %v890_v7 }
 0x6f7   :  { %1789 = vmatprep.mubr.msk.bf16.mxu1 %vm126_vm0, %v894_v12 }
 0x6f8   :  { %1790 = vmatmul.mubr.msk.bf16.vlgmr.msra.gmra.mrb[16].mxu1 %vm126_vm0, %v895_v13 }
 0x6f9   :  { %1794 = vmatpush3.bf16.msra.mxu1 %v968_v46 }
 0x718   :  { %v1105_v14 = vpop.xlane.xlu0 %1104 }
 0x719   :  { %v1113_v21 = vsub.f32 %v1097_v59, %v1105_v14 }
 0x71b   :  { %v1118_v26 = vmul.f32 1.442695, %v1113_v21 }
 0x71c   :  { %v1108_v15 = vpop.xlane.xlu0 %1107  ;;  %v1102_v16 = vpop.xlane.xlu1 %1101 }
 0x71d   :  { %v1114_v19 = vsub.f32 %v1098_v30, %v1108_v15  ;;  %v1112_v20 = vsub.f32 %v1096_v34, %v1102_v16 }
 0x71f   :  { %v1120_v22 = vmul.f32 1.442695, %v1114_v19  ;;  %v1116_v23 = vmul.f32 1.442695, %v1112_v20 }
 0x720   :  { %v1111_v24 = vpop.xlane.xlu1 %1110 }
 0x721   :  { %1952 = vpow2.f32 %v1120_v22  ;;  %v1115_v25 = vsub.f32 %v1099_v62, %v1111_v24  ;;  %v1643_v62 = vld [vmem:[%s2440_s7 + $0xc] sm:$0xf] }
 0x722   :  { %1954 = vpow2.f32 %v1116_v23  ;;  %v1218_v38 = vsel %vm662_vm14, %v1643_v62, 0 }
 0x723   :  { %v1122_v27 = vmul.f32 1.442695, %v1115_v25 }
 0x725   :  { %1956 = vpow2.f32 %v1122_v27 }
 0x726   :  { %1958 = vpow2.f32 %v1118_v26 }
 0x72b   :  { %v1953_v28 = vpop.eup %1952 }
 0x72c   :  { %v1130_v32 = vsel %vm126_vm0, %v1953_v28, 0.0  ;;  %v1955_v35 = vpop.eup %1954 }
 0x72d   :  { %1131 = vadd.xlane.f32.xlu0 %v1130_v32  ;;  %v1124_v39 = vsel %vm126_vm0, %v1955_v35, 0.0 }
 0x72f   :  { %v1957_v36 = vpop.eup %1956 }
 0x730   :  { %v1133_v40 = vsel %vm126_vm0, %v1957_v36, 0.0  ;;  %v1959_v41 = vpop.eup %1958 }
 0x731   :  { %1125 = vadd.xlane.f32.xlu0 %v1124_v39  ;;  %1134 = vadd.xlane.f32.xlu1 %v1133_v40  ;;  %v1127_v43 = vsel %vm126_vm0, %v1959_v41, 0.0 }
 0x735   :  { %1128 = vadd.xlane.f32.xlu1 %v1127_v43 }
 0x746   :  { %1148 = vrot.lane.b32.xlu1 %v2134_v17, %s1994_s5 }
 0x747   :  { %1146 = vrot.lane.b32.xlu0 %v2136_v18, %s1994_s5 }
 0x7ba   :  { %v1132_v47 = vpop.xlane.xlu0 %1131 }
 0x7be   :  { %v1126_v48 = vpop.xlane.xlu0 %1125  ;;  %v1135_v49 = vpop.xlane.xlu1 %1134 }
 0x7bf   :  { %1960 = vrcp.f32 %v1126_v48 }
 0x7c2   :  { %v1147_v50 = vpop.permute.xlu0 %1146  ;;  %v1129_v51 = vpop.xlane.xlu1 %1128 }
 0x7c3   :  { %1962 = vrcp.f32 %v1129_v51  ;;  %1807 = vmatprep.subr.bf16.mxu1 %v1147_v50  ;;  %v1887_v51 = vld [vmem:[%s2442_s11 + $0x8] sm:$0xff]  }
 0x7c4   :  { %1964 = vrcp.f32 %v1135_v49 }
 0x7c5   :  { %1966 = vrcp.f32 %v1132_v47 }
 0x7c6   :  { %v1149_v37 = vpop.permute.xlu1 %1148 }
 0x7c9   :  { %v1961_v53 = vpop.eup %1960 }
 0x7ca   :  { %v1140_v17 = vmul.f32 %v1961_v53, %v1955_v35 }
 0x7cb   :  { %v1791_v54 = vpop.f32.mrb[16].mxu1 }
 0x7cc   :  { %v942_v55 = vpop.f32.mrb[17].mxu1 }
 0x7cd   :  { %v1963_v56 = vpop.eup %1962  ;;  %v1792_v57 = vpop.f32.mrb[18].mxu1 }
 0x7ce   :  { %v958_v58 = vpack.c.bf16 %v1792_v57, %v1791_v54  ;;  %v945_v59 = vpop.f32.mrb[19].mxu1  ;;  %v1141_v60 = vmul.f32 %v1963_v56, %v1959_v41  ;;  %v1965_v30 = vpop.eup %1964 }
 0x7cf   :  { %v957_v18 = vpack.c.bf16 %v945_v59, %v942_v55  ;;  %v1967_v34 = vpop.eup %1966  ;;  %v1143_v44 = vmul.f32 %v1965_v30, %v1957_v36 }
 0x7d0   :  { %v1144_v61 = vpack.c.bf16 %v1141_v60, %v1140_v17  ;;  %v1142_v42 = vmul.f32 %v1967_v34, %v1953_v28 }
 0x7d1   :  { %1795 = vmatprep.mubr.msk.bf16.mxu1 %vm288_vm1, %v957_v18 }
 0x7d2   :  { %1796 = vmatmul.mubr.msk.bf16.vlgmr.msra.gmra.mrb[12].mxu1 %vm288_vm1, %v958_v58  ;;  %v1145_v63 = vpack.c.bf16 %v1143_v44, %v1142_v42 }
 0x7d3   :  { %1808 = vmatpush3.bf16.msra.mxu1 %v1147_v50  ;;  %1811 = vmatprep.mubr.msk.bf16.mxu1 %vm126_vm0, %v1144_v61  ;;  %v1886_v50 = vld [vmem:[%s2442_s11] sm:$0xff]  }
 0x7d4   :  { %1809 = vmatprep.subr.bf16.mxu1 %v1149_v37  ;;  %1821 = vmatprep.subr.bf16.mxu0 %v1886_v50 }
 0x7d5   :  { %1822 = vmatpush3.bf16.msra.mxu0 %v1886_v50 }
 0x7d6   :  { %1823 = vmatprep.subr.bf16.mxu0 %v1887_v51 }
 0x7d7   :  { %1810 = vmatpush3.bf16.msra.mxu1 %v1149_v37  ;;  %v1647_v37 = vld [vmem:[%s2443_s9] ss:$0 sm:$0xff] }
 0x7d8   :  { %1872 = vmatprep.subr.msk.bf16.mxu1 %vm662_vm14, %v1643_v62 }
 0x7d9   :  { %1824 = vmatpush3.bf16.msra.mxu0 %v1887_v51 }
 0x7da   :  { %1812 = vmatmul.mubr.msk.bf16.vlgmr.msra.gmra.mrb[20].mxu1 %vm126_vm0, %v1145_v63 }
 0x7db   :  { %1816 = vmatpush3.bf16.msra.mxu1 %v1218_v38  ;;  %v1648_v38 = vld [vmem:[%s2444_s10] ss:$0 sm:$0xff] }
 0x8ad   :  { %v1813_v0 = vpop.f32.mrb[20].mxu1 }
 0x8ae   :  { %v1192_v29 = vpop.f32.mrb[21].mxu1 }
 0x8af   :  { %v1814_v31 = vpop.f32.mrb[22].mxu1 }
 0x8b0   :  { %v1208_v33 = vpack.c.bf16 %v1814_v31, %v1813_v0  ;;  %v1195_v1 = vpop.f32.mrb[23].mxu1 }
 0x8b1   :  { %v1207_v52 = vpack.c.bf16 %v1195_v1, %v1192_v29 }
 0x8b3   :  { %1817 = vmatprep.mubr.msk.bf16.mxu1 %vm288_vm1, %v1207_v52 }
 0x8b4   :  { %1818 = vmatmul.mubr.msk.bf16.vlgmr.msra.gmra.mrb[12].mxu1 %vm288_vm1, %v1208_v33 }
 0x987   :  { %v1819_v5 = vpop.f32.mrb[12].mxu1 }
 0x988   :  { %v1254_v6 = vpop.f32.mrb[13].mxu1  ;;  %v1282_v13 = vadd.f32 %v1819_v5, %v1646_v2 }
 0x989   :  { %v1280_v7 = vadd.f32 %v1646_v2, %v1254_v6  ;;  %v1820_v10 = vpop.f32.mrb[14].mxu1 }
 0x98a   :  { %v1283_v11 = vadd.f32 %v1820_v10, %v1646_v2  ;;  %v1257_v12 = vpop.f32.mrb[15].mxu1  ;;  %v2353_v21 = vadd.f32 %v1282_v13, %v2086_v4  ;;  %v1888_v13 = vld [vmem:[%s2445_s13] sm:$0xff]  }
 0x98b   :  { %v2342_v14 = vadd.f32 %v1280_v7, %v2084_v3  ;;  %v1281_v15 = vadd.f32 %v1646_v2, %v1257_v12  ;;  %1829 = vmatprep.subr.bf16.mxu0 %v1888_v13 }
 0x98c   :  { %v2345_v16 = vadd.f32 %v1283_v11, %v2099_v9  ;;  %v1296_v9 = vsel %vm126_vm0, %v2353_v21, 0.0 }
 0x98d   :  { %v2348_v19 = vadd.f32 %v1281_v15, %v2097_v8  ;;  %v1290_v20 = vsel %vm126_vm0, %v2342_v14, 0.0  ;;  %v1889_v15 = vld [vmem:[%s2445_s13 + $0x8] sm:$0xff]  }
 0x98e   :  { %1291 = vadd.xlane.f32.xlu1 %v1290_v20  ;;  %v1299_v3 = vsel %vm126_vm0, %v2345_v16, 0.0  ;;  %v1890_v20 = vld [vmem:[%s2445_s13 + $0x10] sm:$0xff]  }
 0x98f   :  { %v1293_v22 = vsel %vm126_vm0, %v2348_v19, 0.0 }
 0x990   :  { %1294 = vadd.xlane.f32.xlu0 %v1293_v22  ;;  %v1891_v22 = vld [vmem:[%s2445_s13 + $0x18] sm:$0xff]  }
 0x992   :  { %1300 = vadd.xlane.f32.xlu1 %v1299_v3  ;;  %v1892_v3 = vld [vmem:[%s2445_s13 + $0x20] sm:$0xff]  }
 0x994   :  { %1297 = vadd.xlane.f32.xlu0 %v1296_v9  ;;  %v1893_v9 = vld [vmem:[%s2445_s13 + $0x28] sm:$0xff]  }
 0xa1b   :  { %v1292_v8 = vpop.xlane.xlu1 %1291 }
 0xa1c   :  { %v1302_v23 = vmul.f32 0.03125, %v1292_v8  ;;  %v1894_v8 = vld [vmem:[%s2445_s13 + $0x30] sm:$0xff]  }
 0xa1d   :  { %v1295_v24 = vpop.xlane.xlu0 %1294 }
 0xa1e   :  { %v1306_v25 = vsub.f32 %v2342_v14, %v1302_v23  ;;  %v1303_v26 = vmul.f32 0.03125, %v1295_v24  ;;  %v1895_v23 = vld [vmem:[%s2445_s13 + $0x38] sm:$0xff]   ;;  %v1649_v24 = vld [vmem:[%s2446_s12] ss:$0 sm:$0xff] }
 0xa1f   :  { %v1301_v4 = vpop.xlane.xlu1 %1300 }
 0xa20   :  { %v1307_v27 = vsub.f32 %v2348_v19, %v1303_v26  ;;  %v1305_v28 = vmul.f32 0.03125, %v1301_v4  ;;  %v1310_v32 = vmul.f32 %v1306_v25, %v1306_v25 }
 0xa21   :  { %v1298_v35 = vpop.xlane.xlu0 %1297 }
 0xa22   :  { %v1309_v36 = vsub.f32 %v2345_v16, %v1305_v28  ;;  %v1304_v39 = vmul.f32 0.03125, %v1298_v35  ;;  %v1314_v40 = vsel %vm126_vm0, %v1310_v32, 0.0  ;;  %v1311_v41 = vmul.f32 %v1307_v27, %v1307_v27 }
 0xa23   :  { %1315 = vadd.xlane.f32.xlu0 %v1314_v40 }
 0xa24   :  { %v1308_v43 = vsub.f32 %v2353_v21, %v1304_v39  ;;  %v1317_v45 = vsel %vm126_vm0, %v1311_v41, 0.0  ;;  %v1313_v46 = vmul.f32 %v1309_v36, %v1309_v36 }
 0xa25   :  { %1318 = vadd.xlane.f32.xlu1 %v1317_v45 }
 0xa26   :  { %v1312_v47 = vmul.f32 %v1308_v43, %v1308_v43  ;;  %v1323_v48 = vsel %vm126_vm0, %v1313_v46, 0.0 }
 0xa28   :  { %v1320_v49 = vsel %vm126_vm0, %v1312_v47, 0.0 }
 0xa29   :  { %1324 = vadd.xlane.f32.xlu1 %v1323_v48  ;;  %1321 = vadd.xlane.f32.xlu0 %v1320_v49 }
 0xab0   :  { %v1316_v53 = vpop.xlane.xlu0 %1315 }
 0xab1   :  { %v1326_v54 = vmul.f32 0.03125, %v1316_v53 }
 0xab2   :  { %v1319_v55 = vpop.xlane.xlu1 %1318 }
 0xab3   :  { %v1330_v56 = vadd.f32 1e-06, %v1326_v54  ;;  %v1327_v57 = vmul.f32 0.03125, %v1319_v55 }
 0xab5   :  { %1968 = vrsqrt.f32 %v1330_v56  ;;  %v1331_v58 = vadd.f32 1e-06, %v1327_v57 }
 0xab6   :  { %v1325_v59 = vpop.xlane.xlu1 %1324  ;;  %v1322_v17 = vpop.xlane.xlu0 %1321 }
 0xab7   :  { %1970 = vrsqrt.f32 %v1331_v58  ;;  %v1329_v60 = vmul.f32 0.03125, %v1325_v59  ;;  %v1328_v18 = vmul.f32 0.03125, %v1322_v17 }
 0xab9   :  { %v1333_v61 = vadd.f32 1e-06, %v1329_v60  ;;  %v1332_v30 = vadd.f32 1e-06, %v1328_v18 }
 0xabb   :  { %1972 = vrsqrt.f32 %v1333_v61 }
 0xabc   :  { %1974 = vrsqrt.f32 %v1332_v30 }
 0xabf   :  { %v1969_v34 = vpop.eup %1968 }
 0xac0   :  { %v1338_v44 = vmul.f32 %v1969_v34, %v1306_v25 }
 0xac1   :  { %v1971_v62 = vpop.eup %1970 }
 0xac2   :  { %v1339_v42 = vmul.f32 %v1971_v62, %v1307_v27  ;;  %v1348_v63 = vmul.f32 %v1647_v37, %v1338_v44 }
 0xac4   :  { %v1349_v0 = vmul.f32 %v1647_v37, %v1339_v42  ;;  %v1358_v1 = vadd.f32 %v1648_v38, %v1348_v63 }
 0xac5   :  { %v1973_v29 = vpop.eup %1972 }
 0xac6   :  { %v1975_v31 = vpop.eup %1974  ;;  %v1341_v33 = vmul.f32 %v1973_v29, %v1309_v36  ;;  %v1359_v52 = vadd.f32 %v1648_v38, %v1349_v0 }
 0xac7   :  { %v1340_v2 = vmul.f32 %v1975_v31, %v1308_v43 }
 0xac8   :  { %v1351_v5 = vmul.f32 %v1647_v37, %v1341_v33  ;;  %v1362_v6 = vpack.c.bf16 %v1359_v52, %v1358_v1 }
 0xac9   :  { %v1350_v7 = vmul.f32 %v1647_v37, %v1340_v2 }
 0xaca   :  { %1825 = vmatprep.mubr.msk.bf16.mxu0 %vm126_vm0, %v1362_v6  ;;  %v1361_v10 = vadd.f32 %v1648_v38, %v1351_v5  ;;  %v1654_v6 = vld [vmem:[%s2447_s14] ss:$0 sm:$0xff] }
 0xacb   :  { %v1360_v11 = vadd.f32 %v1648_v38, %v1350_v7 }
 0xacd   :  { %v1363_v12 = vpack.c.bf16 %v1361_v10, %v1360_v11 }
 0xacf   :  { %1826 = vmatmul.mubr.msk.bf16.vlgmr.msra.gmra.mrb[16].mxu0 %vm126_vm0, %v1363_v12 }
 0xad0   :  { %1830 = vmatpush3.bf16.msra.mxu0 %v1888_v13 }
 0xad1   :  { %1831 = vmatprep.subr.bf16.mxu0 %v1889_v15 }
 0xad4   :  { %1832 = vmatpush3.bf16.msra.mxu0 %v1889_v15 }
 0xad5   :  { %1833 = vmatprep.subr.bf16.mxu0 %v1890_v20 }
 0xad8   :  { %1834 = vmatpush3.bf16.msra.mxu0 %v1890_v20 }
 0xad9   :  { %1835 = vmatprep.subr.bf16.mxu0 %v1891_v22 }
 0xadc   :  { %1836 = vmatpush3.bf16.msra.mxu0 %v1891_v22 }
 0xadd   :  { %1837 = vmatprep.subr.bf16.mxu0 %v1892_v3 }
 0xae0   :  { %1838 = vmatpush3.bf16.msra.mxu0 %v1892_v3 }
 0xae1   :  { %1839 = vmatprep.subr.bf16.mxu0 %v1893_v9 }
 0xae4   :  { %1840 = vmatpush3.bf16.msra.mxu0 %v1893_v9 }
 0xae5   :  { %1841 = vmatprep.subr.bf16.mxu0 %v1894_v8 }
 0xae8   :  { %1842 = vmatpush3.bf16.msra.mxu0 %v1894_v8 }
 0xae9   :  { %1843 = vmatprep.subr.bf16.mxu0 %v1895_v23 }
 0xaec   :  { %1844 = vmatpush3.bf16.msra.mxu0 %v1895_v23 }
 0xba2   :  { %v1827_v25 = vpop.f32.mrb[16].mxu0 }
 0xba3   :  { %v1436_v26 = vadd.f32 %v1827_v25, %v1649_v24  ;;  %v1427_v4 = vpop.f32.mrb[17].mxu0 }
 0xba4   :  { %v1428_v27 = vadd.f32 %v1649_v24, %v1427_v4  ;;  %v1828_v28 = vpop.f32.mrb[18].mxu0 }
 0xba5   :  { %v1444_v32 = vmul.f32 %v1436_v26, %v1436_v26  ;;  %v1439_v35 = vadd.f32 %v1828_v28, %v1649_v24  ;;  %v1430_v36 = vpop.f32.mrb[19].mxu0 }
 0xba6   :  { %v1442_v39 = vmul.f32 %v1428_v27, %v1428_v27  ;;  %v1431_v40 = vadd.f32 %v1649_v24, %v1430_v36 }
 0xba7   :  { %v1448_v41 = vmul.f32 %v1444_v32, %v1436_v26  ;;  %v1445_v43 = vmul.f32 %v1439_v35, %v1439_v35 }
 0xba8   :  { %v1446_v45 = vmul.f32 %v1442_v39, %v1428_v27  ;;  %v1443_v46 = vmul.f32 %v1431_v40, %v1431_v40 }
 0xba9   :  { %v1452_v47 = vmul.f32 0.044715, %v1448_v41  ;;  %v1449_v48 = vmul.f32 %v1445_v43, %v1439_v35 }
 0xbaa   :  { %v1450_v49 = vmul.f32 0.044715, %v1446_v45  ;;  %v1447_v50 = vmul.f32 %v1443_v46, %v1431_v40 }
 0xbab   :  { %v1456_v51 = vadd.f32 %v1452_v47, %v1436_v26  ;;  %v1453_v53 = vmul.f32 0.044715, %v1449_v48 }
 0xbac   :  { %v1454_v54 = vadd.f32 %v1450_v49, %v1428_v27  ;;  %v1451_v55 = vmul.f32 0.044715, %v1447_v50 }
 0xbad   :  { %v1460_v56 = vmul.f32 0.7978846, %v1456_v51  ;;  %v1457_v57 = vadd.f32 %v1453_v53, %v1439_v35 }
 0xbae   :  { %v1458_v58 = vmul.f32 0.7978846, %v1454_v54  ;;  %v1455_v59 = vadd.f32 %v1451_v55, %v1431_v40 }
 0xbaf   :  { %1976 = vtanh.f32 %v1460_v56  ;;  %v1461_v17 = vmul.f32 0.7978846, %v1457_v57 }
 0xbb0   :  { %1978 = vtanh.f32 %v1458_v58  ;;  %v1459_v60 = vmul.f32 0.7978846, %v1455_v59 }
 0xbb1   :  { %1980 = vtanh.f32 %v1461_v17 }
 0xbb2   :  { %1982 = vtanh.f32 %v1459_v60 }
 0xbb9   :  { %v1977_v18 = vpop.eup %1976 }
 0xbba   :  { %v1979_v61 = vpop.eup %1978  ;;  %v1468_v30 = vadd.f32 1.0, %v1977_v18 }
 0xbbb   :  { %v1981_v34 = vpop.eup %1980  ;;  %v1466_v37 = vadd.f32 1.0, %v1979_v61 }
 0xbbc   :  { %v1983_v44 = vpop.eup %1982  ;;  %v1472_v62 = vmul.f32 0.5, %v1468_v30  ;;  %v1469_v42 = vadd.f32 1.0, %v1981_v34 }
 0xbbd   :  { %v1467_v63 = vadd.f32 1.0, %v1983_v44  ;;  %v1470_v38 = vmul.f32 0.5, %v1466_v37 }
 0xbbe   :  { %v1473_v0 = vmul.f32 0.5, %v1469_v42  ;;  %v1476_v31 = vmul.f32 %v1472_v62, %v1436_v26 }
 0xbbf   :  { %v1471_v29 = vmul.f32 0.5, %v1467_v63  ;;  %v1474_v1 = vmul.f32 %v1470_v38, %v1428_v27 }
 0xbc0   :  { %v1477_v33 = vmul.f32 %v1473_v0, %v1439_v35 }
 0xbc1   :  { %v1475_v52 = vmul.f32 %v1471_v29, %v1431_v40 }
 0xbc2   :  { %v1479_v2 = vpack.c.bf16 %v1477_v33, %v1476_v31 }
 0xbc3   :  { %v1478_v5 = vpack.c.bf16 %v1475_v52, %v1474_v1 }
 0xbc5   :  { %1845 = vmatprep.mubr.bf16.mxu0 %v1478_v5 }
 0xbc6   :  { %1846 = vmatmul.mubr.bf16.vlgmr.msra.gmra.mrb[20].mxu0 %v1479_v2 }
 0xc99   :  { %v1847_v7 = vpop.f32.mrb[20].mxu0 }
 0xc9a   :  { %v1594_v10 = vadd.f32 %v1847_v7, %v1654_v6  ;;  %v1585_v11 = vpop.f32.mrb[21].mxu0 }
 0xc9b   :  { %v1586_v12 = vadd.f32 %v1654_v6, %v1585_v11  ;;  %v1848_v13 = vpop.f32.mrb[22].mxu0 }
 0xc9c   :  { %v1602_v15 = vadd.f32 %v1594_v10, %v2353_v21  ;;  %v1597_v20 = vadd.f32 %v1848_v13, %v1654_v6  ;;  %v1588_v22 = vpop.f32.mrb[23].mxu0 }
 0xc9d   :  { %v1600_v3 = vadd.f32 %v1586_v12, %v2342_v14  ;;  %v1589_v9 = vadd.f32 %v1654_v6, %v1588_v22 }
 0xc9e   :  { %1606 = vst.msk [vmem:[%s2448_s15 + $0x10] sm:$0xff] %vm126_vm0, %v1602_v15  ;;  %v1603_v8 = vadd.f32 %v1597_v20, %v2345_v16 }
 0xc9f   :  { %1604 = vst.msk [vmem:[%s2448_s15] sm:$0xff] %vm126_vm0, %v1600_v3  ;;  %v1601_v23 = vadd.f32 %v1589_v9, %v2348_v19 }
 0xca0   :  { %1607 = vst.msk [vmem:[%s2448_s15 + $0x18] sm:$0xff] %vm126_vm0, %v1603_v8 }
 0xca1   :  { %1605 = vst.msk [vmem:[%s2448_s15 + $0x8] sm:$0xff] %vm126_vm0, %v1601_v23 }

</bundles_post_ra>
